<compile_context>
chip_gen: v7x
topology: tpu7x:2x2x1
jax: 0.10.0
libtpu: 0.0.40
codegen_flags: <defaults>
</compile_context>

<pallas_src>
import functools

import jax
import jax.numpy as jnp
from jax import lax
from jax.experimental import pallas as pl
from jax.experimental.pallas import tpu as pltpu

LEAKY = 0.2
BN_EPS = 1e-5
VMEM_LIMIT = 48 * 1024 * 1024      # explicit scoped-VMEM budget (v7x-safe)


def _leaky(x):
    return jnp.where(x > 0, x, LEAKY * x)


def _padlane(c):
    """Channel count padded to the 128-lane vreg width (VMEM footprint)."""
    return ((c + 127) // 128) * 128


def _pick_row_tile(m, bytes_per_row, budget=16 * 1024 * 1024, cap=1024):
    """Largest divisor of m that is a multiple of 8, <= cap, fits the budget."""
    if m % 8 != 0:
        return m
    limit = min(m, cap, max(8, budget // max(bytes_per_row, 1)))
    best = 8
    t = 8
    while t <= limit:
        if m % t == 0:
            best = t
        t += 8
    return best


# ----------------------------------------------------------------------------
# Pallas kernels
# ----------------------------------------------------------------------------
def _pairwise_dist_kernel(q_ref, x_ref, out_ref):
    # q_ref: (1, TN, C) query rows   x_ref: (1, N, C) all points
    # out_ref: (1, TN, N) negative squared pairwise distance
    q = q_ref[0]                                                     # (TN, C)
    xall = x_ref[0]                                                  # (N, C)
    g = lax.dot_general(q, xall, (((1,), (1,)), ((), ())),
                        preferred_element_type=jnp.float32)          # (TN, N)
    sq_q = jnp.sum(q * q, axis=-1, keepdims=True)                    # (TN, 1)
    sq_x = jnp.sum(xall * xall, axis=-1, keepdims=True)              # (N, 1)
    # torch: -xx + 2 x^T x - xx^T
    out_ref[0] = 2.0 * g - sq_q - sq_x.T


def pairwise_neg_sq_dist(x_bnc):
    B, N, C = x_bnc.shape
    row_bytes = 2 * _padlane(N) * 4 + 2 * _padlane(C) * 4
    tn = _pick_row_tile(N, row_bytes, cap=512)
    return pl.pallas_call(
        _pairwise_dist_kernel,
        out_shape=jax.ShapeDtypeStruct((B, N, N), jnp.float32),
        grid=(B, N // tn),
        in_specs=[pl.BlockSpec((1, tn, C), lambda b, i: (b, i, 0)),
                  pl.BlockSpec((1, N, C), lambda b, i: (b, 0, 0))],
        out_specs=pl.BlockSpec((1, tn, N), lambda b, i: (b, i, 0)),
        compiler_params=pltpu.CompilerParams(
            dimension_semantics=("parallel", "parallel"),
            vmem_limit_bytes=VMEM_LIMIT),
    )(x_bnc, x_bnc)


def _edgeconv_kernel(k, feat_ref, w_ref, scale_ref, bias_ref, out_ref):
    # feat_ref: (k, TM, Cin) bf16   w_ref: (Cin, Cout) bf16
    # scale/bias: (1, Cout) f32     out_ref: (TM, Cout) f32
    # out = max_k leaky(BN(W @ feat_k))   (affine+leaky BEFORE max: scale may
    # be negative, so order matches torch exactly)
    tm, cout = out_ref.shape
    w = w_ref[...]
    scale = jnp.broadcast_to(scale_ref[...], (tm, cout))   # hoisted out of loop
    bias = jnp.broadcast_to(bias_ref[...], (tm, cout))
    acc = None
    for kk in range(k):                                    # k is small & static
        y = jnp.dot(feat_ref[kk], w, preferred_element_type=jnp.float32)
        y = _leaky(y * scale + bias)
        acc = y if acc is None else jnp.maximum(acc, y)
    out_ref[...] = acc


def edgeconv(feat_kmc, w, scale, bias):
    k, M, Cin = feat_kmc.shape
    Cout = w.shape[1]
    # double-buffered bf16 feat rows + f32 output rows + intermediates
    row_bytes = 2 * k * _padlane(Cin) * 2 + 4 * _padlane(Cout) * 4
    tm = _pick_row_tile(M, row_bytes, cap=1024)
    return pl.pallas_call(
        functools.partial(_edgeconv_kernel, k),
        out_shape=jax.ShapeDtypeStruct((M, Cout), jnp.float32),
        grid=(M // tm,),
        in_specs=[
            pl.BlockSpec((k, tm, Cin), lambda i: (0, i, 0)),
            pl.BlockSpec((Cin, Cout), lambda i: (0, 0)),
            pl.BlockSpec((1, Cout), lambda i: (0, 0)),
            pl.BlockSpec((1, Cout), lambda i: (0, 0)),
        ],
        out_specs=pl.BlockSpec((tm, Cout), lambda i: (i, 0)),
        compiler_params=pltpu.CompilerParams(
            dimension_semantics=("parallel",),
            vmem_limit_bytes=VMEM_LIMIT),
    )(feat_kmc, w, scale, bias)


def _conv5_head_kernel(x_ref, w5_ref, s5_ref, b5_ref,
                       wl1_ref, s6_ref, b6_ref,
                       wl2_ref, bl2_ref, s7_ref, b7_ref,
                       wl3_ref, bl3_ref, out_ref):
    # x_ref: (1, N, 512)   out_ref: (1, 1, num_classes)
    y = jnp.dot(x_ref[0], w5_ref[...], preferred_element_type=jnp.float32)
    y = _leaky(y * s5_ref[...] + b5_ref[...])                        # (N, E)
    pooled = jnp.concatenate(                                        # (1, 2E)
        [jnp.max(y, axis=0, keepdims=True),
         jnp.mean(y, axis=0, keepdims=True)], axis=-1)
    # linear1(no bias)->bn6->leaky->[dropout=id]->linear2->bn7->leaky->linear3
    h = jnp.dot(pooled, wl1_ref[...], preferred_element_type=jnp.float32)
    h = _leaky(h * s6_ref[...] + b6_ref[...])
    h = jnp.dot(h, wl2_ref[...], preferred_element_type=jnp.float32) + bl2_ref[...]
    h = _leaky(h * s7_ref[...] + b7_ref[...])
    out_ref[0] = jnp.dot(h, wl3_ref[...], preferred_element_type=jnp.float32) + bl3_ref[...]


def conv5_head(x_bnc, p):
    B, N, Cin = x_bnc.shape
    nc = p["w_l3"].shape[1]
    full2d = lambda b: (0, 0)
    out = pl.pallas_call(
        _conv5_head_kernel,
        out_shape=jax.ShapeDtypeStruct((B, 1, nc), jnp.float32),
        grid=(B,),
        in_specs=[
            pl.BlockSpec((1, N, Cin), lambda b: (b, 0, 0)),
            pl.BlockSpec(p["w5"].shape, full2d),
            pl.BlockSpec(p["s5"].shape, full2d),
            pl.BlockSpec(p["b5"].shape, full2d),
            pl.BlockSpec(p["w_l1"].shape, full2d),
            pl.BlockSpec(p["s6"].shape, full2d),
            pl.BlockSpec(p["b6"].shape, full2d),
            pl.BlockSpec(p["w_l2"].shape, full2d),
            pl.BlockSpec(p["bias_l2"].shape, full2d),
            pl.BlockSpec(p["s7"].shape, full2d),
            pl.BlockSpec(p["b7"].shape, full2d),
            pl.BlockSpec(p["w_l3"].shape, full2d),
            pl.BlockSpec(p["bias_l3"].shape, full2d),
        ],
        out_specs=pl.BlockSpec((1, 1, nc), lambda b: (b, 0, 0)),
        compiler_params=pltpu.CompilerParams(
            dimension_semantics=("parallel",),
            vmem_limit_bytes=VMEM_LIMIT),
    )(x_bnc, p["w5"], p["s5"], p["b5"], p["w_l1"], p["s6"], p["b6"],
      p["w_l2"], p["bias_l2"], p["s7"], p["b7"], p["w_l3"], p["bias_l3"])
    return out.reshape(B, nc)


# ----------------------------------------------------------------------------
# JAX glue (top-k / neighbor gather are data dependent)
# ----------------------------------------------------------------------------
def get_graph_feature(x_bnc, k):
    # x_bnc: (B, N, C) channel-last  ->  (k, B*N, 2C) bf16 graph feature
    B, N, C = x_bnc.shape
    d = pairwise_neg_sq_dist(x_bnc)                          # (B, N, N) f32
    _, idx = jax.lax.top_k(d, k)                             # (B, N, k)
    # transpose the tiny index tensor (not the feature) so the gather writes
    # directly in the (k, B, N, C) order the kernel consumes.
    idx_k = jnp.transpose(idx, (2, 0, 1))                    # (k, B, N)
    b_idx = jnp.arange(B, dtype=idx.dtype)[None, :, None]    # (1, B, 1)
    neigh = x_bnc[b_idx, idx_k]                              # (k, B, N, C)
    center = jnp.broadcast_to(x_bnc[None], neigh.shape)      # (k, B, N, C)
    feat = jnp.concatenate([neigh - center, center], axis=-1)  # (k, B, N, 2C)
    # bf16 graph feature: halves HBM traffic / VMEM, MXU accumulates in f32.
    return feat.astype(jnp.bfloat16).reshape(k, B * N, 2 * C)
    # TODO(synk): the gather itself still materializes in HBM; fusing it into
    # the edgeconv kernel (scalar-prefetched idx) would remove one more pass.


def make_forward(k):
    def forward(x_bcn, p):
        B, _, N = x_bcn.shape
        x_bnc = jnp.transpose(x_bcn, (0, 2, 1))              # channel-last once

        def edge_block(xin_bnc, w, s, b):
            f = get_graph_feature(xin_bnc, k)                # (k, B*N, 2C) bf16
            y = edgeconv(f, w.astype(jnp.bfloat16), s, b)    # (B*N, Cout) f32
            return y.reshape(B, N, -1)

        y1 = edge_block(x_bnc, p["w1"], p["s1"], p["b1"])    # (B, N, 64)
        y2 = edge_block(y1, p["w2"], p["s2"], p["b2"])       # (B, N, 64)
        y3 = edge_block(y2, p["w3"], p["s3"], p["b3"])       # (B, N, 128)
        y4 = edge_block(y3, p["w4"], p["s4"], p["b4"])       # (B, N, 256)

        cat = jnp.concatenate([y1, y2, y3, y4], axis=-1)     # (B, N, 512)
        return conv5_head(cat, p)                            # (B, num_classes)

    return forward


# ----------------------------------------------------------------------------
# Deterministic parameter init (synthetic; matches the module's shapes)
# ----------------------------------------------------------------------------
def _bn_affine(key, c):
    k1, k2, k3, k4 = jax.random.split(key, 4)
    gamma = 1.0 + 0.1 * jax.random.normal(k1, (c,), jnp.float32)
    beta = 0.1 * jax.random.normal(k2, (c,), jnp.float32)
    mean = 0.1 * jax.random.normal(k3, (c,), jnp.float32)
    var = jax.random.uniform(k4, (c,), jnp.float32, minval=0.5, maxval=1.5)
    scale = gamma / jnp.sqrt(var + BN_EPS)
    bias = beta - mean * scale
    return scale.reshape(1, c), bias.reshape(1, c)


def _w(key, cin, cout):
    return (jax.random.normal(key, (cin, cout), jnp.float32) / jnp.sqrt(cin)).astype(jnp.float32)


def init_params(key, emb_dims=64, num_classes=40):
    ks = jax.random.split(key, 16)
    p = {}
    p["w1"], (p["s1"], p["b1"]) = _w(ks[0], 6, 64), _bn_affine(ks[1], 64)
    p["w2"], (p["s2"], p["b2"]) = _w(ks[2], 128, 64), _bn_affine(ks[3], 64)
    p["w3"], (p["s3"], p["b3"]) = _w(ks[4], 128, 128), _bn_affine(ks[5], 128)
    p["w4"], (p["s4"], p["b4"]) = _w(ks[6], 256, 256), _bn_affine(ks[7], 256)
    p["w5"], (p["s5"], p["b5"]) = _w(ks[8], 512, emb_dims), _bn_affine(ks[9], emb_dims)
    p["w_l1"] = _w(ks[10], emb_dims * 2, 512)
    p["s6"], p["b6"] = _bn_affine(ks[11], 512)
    p["w_l2"] = _w(ks[12], 512, 256)
    p["bias_l2"] = 0.1 * jax.random.normal(ks[13], (1, 256), jnp.float32)
    p["s7"], p["b7"] = _bn_affine(ks[14], 256)
    p["w_l3"] = _w(ks[15], 256, num_classes)
    p["bias_l3"] = jnp.zeros((1, num_classes), jnp.float32)
    return p


if __name__ == "__main__":
    # small shapes: batch=2, 3 input channels (conv1 expects 6 = 2*3),
    # 16 points, k=4 neighbors, emb_dims=64, 40 output classes
    B, C, N, K, EMB, NCLS = 2, 3, 16, 4, 64, 40
    key = jax.random.PRNGKey(0)
    kx, kp = jax.random.split(key)
    x = jax.random.normal(kx, (B, C, N), jnp.float32)
    params = init_params(kp, emb_dims=EMB, num_classes=NCLS)

    fwd = jax.jit(make_forward(K))
    out = fwd(x, params)
    jax.block_until_ready(out)
    assert out.shape == (B, NCLS) and out.dtype == jnp.float32
    # TODO(synk): Dropout is identity and BatchNorm uses folded running stats
    # (eval-mode semantics); training-mode batch statistics are not modeled.
    print("KERNEL_OK")
</pallas_src>

<mosaic_0001>
module attributes {stable_mosaic.version = 11 : i64} {
  func.func @_pairwise_dist_kernel(%arg0: i32, %arg1: i32, %arg2: memref<1x16x3xf32, #tpu.memory_space<vmem>>, %arg3: memref<1x16x3xf32, #tpu.memory_space<vmem>>, %arg4: memref<1x16x16xf32, #tpu.memory_space<vmem>>) attributes {dimension_semantics = [#tpu.dimension_semantics<parallel>, #tpu.dimension_semantics<parallel>], iteration_bounds = array<i64: 2, 1>, scalar_prefetch = 0 : i64, scratch_operands = 0 : i64, tpu.core_type = #tpu.core_type<tc>, window_params = [{transform_indices = @transform_0, window_bounds = array<i64: 1, 16, 3>}, {transform_indices = @transform_1, window_bounds = array<i64: 1, 16, 3>}, {transform_indices = @transform_2, window_bounds = array<i64: 1, 16, 16>}]} {
    %c0 = arith.constant 0 : index
    %c0_0 = arith.constant 0 : index
    %c0_1 = arith.constant 0 : index
    %0 = vector.load %arg2[%c0, %c0_0, %c0_1] : memref<1x16x3xf32, #tpu.memory_space<vmem>>, vector<1x16x3xf32>
    %1 = vector.shape_cast %0 : vector<1x16x3xf32> to vector<16x3xf32>
    %c0_2 = arith.constant 0 : index
    %c0_3 = arith.constant 0 : index
    %c0_4 = arith.constant 0 : index
    %2 = vector.load %arg3[%c0_2, %c0_3, %c0_4] : memref<1x16x3xf32, #tpu.memory_space<vmem>>, vector<1x16x3xf32>
    %3 = vector.shape_cast %2 : vector<1x16x3xf32> to vector<16x3xf32>
    %cst = arith.constant dense<0.000000e+00> : vector<16x16xf32>
    %4 = tpu.matmul %1, %3, %cst {dimension_numbers = #tpu.dot_dimension_numbers<[1], [1], [0], [0], [0, 0, 1, 0], [], []>} : vector<16x3xf32>, vector<16x3xf32>, vector<16x16xf32> -> vector<16x16xf32>
    %5 = arith.mulf %1, %1 : vector<16x3xf32>
    %cst_5 = arith.constant dense<0.000000e+00> : vector<16xf32>
    %6 = vector.multi_reduction <add>, %5, %cst_5 [1] : vector<16x3xf32> to vector<16xf32>
    %7 = vector.shape_cast %6 : vector<16xf32> to vector<16x1xf32>
    %8 = arith.mulf %3, %3 : vector<16x3xf32>
    %cst_6 = arith.constant dense<0.000000e+00> : vector<16xf32>
    %9 = vector.multi_reduction <add>, %8, %cst_6 [1] : vector<16x3xf32> to vector<16xf32>
    %10 = vector.shape_cast %9 : vector<16xf32> to vector<16x1xf32>
    %cst_7 = arith.constant 2.000000e+00 : f32
    %11 = vector.broadcast %cst_7 : f32 to vector<16x16xf32>
    %12 = arith.mulf %11, %4 : vector<16x16xf32>
    %13 = vector.broadcast %7 : vector<16x1xf32> to vector<16x16xf32>
    %14 = arith.subf %12, %13 : vector<16x16xf32>
    %15 = tpu.transpose %10, [1, 0] : vector<16x1xf32> -> vector<1x16xf32>
    %16 = vector.broadcast %15 : vector<1x16xf32> to vector<16x16xf32>
    %17 = arith.subf %14, %16 : vector<16x16xf32>
    %c0_8 = arith.constant 0 : index
    %c0_9 = arith.constant 0 : index
    %c0_10 = arith.constant 0 : index
    %18 = vector.load %arg4[%c0_8, %c0_9, %c0_10] : memref<1x16x16xf32, #tpu.memory_space<vmem>>, vector<1x16x16xf32>
    %19 = vector.shape_cast %18 : vector<1x16x16xf32> to vector<16x16xf32>
    %20 = vector.shape_cast %17 : vector<16x16xf32> to vector<1x16x16xf32>
    tpu.vector_store %arg4[%c0_8, %c0_9, %c0_10], %20 {strides = array<i32>} : memref<1x16x16xf32, #tpu.memory_space<vmem>>, vector<1x16x16xf32>,
    return
  }
  func.func @transform_0(%arg0: i32, %arg1: i32) -> (i32, i32, i32) {
    %c0_i32 = arith.constant 0 : i32
    %c0_i32_0 = arith.constant 0 : i32
    return %arg0, %arg1, %c0_i32 : i32, i32, i32
  }
  func.func @transform_1(%arg0: i32, %arg1: i32) -> (i32, i32, i32) {
    %c0_i32 = arith.constant 0 : i32
    %c0_i32_0 = arith.constant 0 : i32
    %c0_i32_1 = arith.constant 0 : i32
    return %arg0, %c0_i32, %c0_i32_0 : i32, i32, i32
  }
  func.func @transform_2(%arg0: i32, %arg1: i32) -> (i32, i32, i32) {
    %c0_i32 = arith.constant 0 : i32
    %c0_i32_0 = arith.constant 0 : i32
    return %arg0, %arg1, %c0_i32 : i32, i32, i32
  }
}

module attributes {stable_mosaic.version = 11 : i64} {
  func.func @_pairwise_dist_kernel(%arg0: i32, %arg1: i32, %arg2: memref<1x16x64xf32, #tpu.memory_space<vmem>>, %arg3: memref<1x16x64xf32, #tpu.memory_space<vmem>>, %arg4: memref<1x16x16xf32, #tpu.memory_space<vmem>>) attributes {dimension_semantics = [#tpu.dimension_semantics<parallel>, #tpu.dimension_semantics<parallel>], iteration_bounds = array<i64: 2, 1>, scalar_prefetch = 0 : i64, scratch_operands = 0 : i64, tpu.core_type = #tpu.core_type<tc>, window_params = [{transform_indices = @transform_0, window_bounds = array<i64: 1, 16, 64>}, {transform_indices = @transform_1, window_bounds = array<i64: 1, 16, 64>}, {transform_indices = @transform_2, window_bounds = array<i64: 1, 16, 16>}]} {
    %c0 = arith.constant 0 : index
    %c0_0 = arith.constant 0 : index
    %c0_1 = arith.constant 0 : index
    %0 = vector.load %arg2[%c0, %c0_0, %c0_1] : memref<1x16x64xf32, #tpu.memory_space<vmem>>, vector<1x16x64xf32>
    %1 = vector.shape_cast %0 : vector<1x16x64xf32> to vector<16x64xf32>
    %c0_2 = arith.constant 0 : index
    %c0_3 = arith.constant 0 : index
    %c0_4 = arith.constant 0 : index
    %2 = vector.load %arg3[%c0_2, %c0_3, %c0_4] : memref<1x16x64xf32, #tpu.memory_space<vmem>>, vector<1x16x64xf32>
    %3 = vector.shape_cast %2 : vector<1x16x64xf32> to vector<16x64xf32>
    %cst = arith.constant dense<0.000000e+00> : vector<16x16xf32>
    %4 = tpu.matmul %1, %3, %cst {dimension_numbers = #tpu.dot_dimension_numbers<[1], [1], [0], [0], [0, 0, 1, 0], [], []>} : vector<16x64xf32>, vector<16x64xf32>, vector<16x16xf32> -> vector<16x16xf32>
    %5 = arith.mulf %1, %1 : vector<16x64xf32>
    %cst_5 = arith.constant dense<0.000000e+00> : vector<16xf32>
    %6 = vector.multi_reduction <add>, %5, %cst_5 [1] : vector<16x64xf32> to vector<16xf32>
    %7 = vector.shape_cast %6 : vector<16xf32> to vector<16x1xf32>
    %8 = arith.mulf %3, %3 : vector<16x64xf32>
    %cst_6 = arith.constant dense<0.000000e+00> : vector<16xf32>
    %9 = vector.multi_reduction <add>, %8, %cst_6 [1] : vector<16x64xf32> to vector<16xf32>
    %10 = vector.shape_cast %9 : vector<16xf32> to vector<16x1xf32>
    %cst_7 = arith.constant 2.000000e+00 : f32
    %11 = vector.broadcast %cst_7 : f32 to vector<16x16xf32>
    %12 = arith.mulf %11, %4 : vector<16x16xf32>
    %13 = vector.broadcast %7 : vector<16x1xf32> to vector<16x16xf32>
    %14 = arith.subf %12, %13 : vector<16x16xf32>
    %15 = tpu.transpose %10, [1, 0] : vector<16x1xf32> -> vector<1x16xf32>
    %16 = vector.broadcast %15 : vector<1x16xf32> to vector<16x16xf32>
    %17 = arith.subf %14, %16 : vector<16x16xf32>
    %c0_8 = arith.constant 0 : index
    %c0_9 = arith.constant 0 : index
    %c0_10 = arith.constant 0 : index
    %18 = vector.load %arg4[%c0_8, %c0_9, %c0_10] : memref<1x16x16xf32, #tpu.memory_space<vmem>>, vector<1x16x16xf32>
    %19 = vector.shape_cast %18 : vector<1x16x16xf32> to vector<16x16xf32>
    %20 = vector.shape_cast %17 : vector<16x16xf32> to vector<1x16x16xf32>
    tpu.vector_store %arg4[%c0_8, %c0_9, %c0_10], %20 {strides = array<i32>} : memref<1x16x16xf32, #tpu.memory_space<vmem>>, vector<1x16x16xf32>,
    return
  }
  func.func @transform_0(%arg0: i32, %arg1: i32) -> (i32, i32, i32) {
    %c0_i32 = arith.constant 0 : i32
    %c0_i32_0 = arith.constant 0 : i32
    return %arg0, %arg1, %c0_i32 : i32, i32, i32
  }
  func.func @transform_1(%arg0: i32, %arg1: i32) -> (i32, i32, i32) {
    %c0_i32 = arith.constant 0 : i32
    %c0_i32_0 = arith.constant 0 : i32
    %c0_i32_1 = arith.constant 0 : i32
    return %arg0, %c0_i32, %c0_i32_0 : i32, i32, i32
  }
  func.func @transform_2(%arg0: i32, %arg1: i32) -> (i32, i32, i32) {
    %c0_i32 = arith.constant 0 : i32
    %c0_i32_0 = arith.constant 0 : i32
    return %arg0, %arg1, %c0_i32 : i32, i32, i32
  }
}

module attributes {stable_mosaic.version = 11 : i64} {
  func.func @_edgeconv_kernel(%arg0: i32, %arg1: memref<4x32x6xbf16, #tpu.memory_space<vmem>>, %arg2: memref<6x64xbf16, #tpu.memory_space<vmem>>, %arg3: memref<1x64xf32, #tpu.memory_space<vmem>>, %arg4: memref<1x64xf32, #tpu.memory_space<vmem>>, %arg5: memref<32x64xf32, #tpu.memory_space<vmem>>) attributes {dimension_semantics = [#tpu.dimension_semantics<parallel>], iteration_bounds = array<i64: 1>, scalar_prefetch = 0 : i64, scratch_operands = 0 : i64, tpu.core_type = #tpu.core_type<tc>, window_params = [{transform_indices = @transform_0, window_bounds = array<i64: 4, 32, 6>}, {pipeline_mode = #tpu.pipeline_mode<synchronous>, transform_indices = @transform_1, window_bounds = array<i64: 6, 64>}, {pipeline_mode = #tpu.pipeline_mode<synchronous>, transform_indices = @transform_2, window_bounds = array<i64: 1, 64>}, {pipeline_mode = #tpu.pipeline_mode<synchronous>, transform_indices = @transform_3, window_bounds = array<i64: 1, 64>}, {transform_indices = @transform_4, window_bounds = array<i64: 32, 64>}]} {
    %c0 = arith.constant 0 : index
    %c0_0 = arith.constant 0 : index
    %0 = vector.load %arg2[%c0, %c0_0] : memref<6x64xbf16, #tpu.memory_space<vmem>>, vector<6x64xbf16>
    %c0_1 = arith.constant 0 : index
    %c0_2 = arith.constant 0 : index
    %1 = vector.load %arg3[%c0_1, %c0_2] : memref<1x64xf32, #tpu.memory_space<vmem>>, vector<1x64xf32>
    %2 = vector.shape_cast %1 : vector<1x64xf32> to vector<1x64xf32>
    %3 = vector.broadcast %2 : vector<1x64xf32> to vector<32x64xf32>
    %c0_3 = arith.constant 0 : index
    %c0_4 = arith.constant 0 : index
    %4 = vector.load %arg4[%c0_3, %c0_4] : memref<1x64xf32, #tpu.memory_space<vmem>>, vector<1x64xf32>
    %5 = vector.shape_cast %4 : vector<1x64xf32> to vector<1x64xf32>
    %6 = vector.broadcast %5 : vector<1x64xf32> to vector<32x64xf32>
    %c0_5 = arith.constant 0 : index
    %c0_6 = arith.constant 0 : index
    %c0_7 = arith.constant 0 : index
    %7 = vector.load %arg1[%c0_5, %c0_6, %c0_7] : memref<4x32x6xbf16, #tpu.memory_space<vmem>>, vector<1x32x6xbf16>
    %8 = vector.shape_cast %7 : vector<1x32x6xbf16> to vector<32x6xbf16>
    %cst = arith.constant dense<0.000000e+00> : vector<32x64xf32>
    %9 = tpu.matmul %8, %0, %cst {dimension_numbers = #tpu.dot_dimension_numbers<[1], [0], [0], [1], [0, 0, 1, 1], [], []>} : vector<32x6xbf16>, vector<6x64xbf16>, vector<32x64xf32> -> vector<32x64xf32>
    %10 = arith.mulf %9, %3 : vector<32x64xf32>
    %11 = arith.addf %10, %6 : vector<32x64xf32>
    %cst_8 = arith.constant 0.000000e+00 : f32
    %12 = vector.broadcast %cst_8 : f32 to vector<32x64xf32>
    %13 = arith.cmpf ogt, %11, %12 : vector<32x64xf32>
    %cst_9 = arith.constant 2.000000e-01 : f32
    %14 = vector.broadcast %cst_9 : f32 to vector<32x64xf32>
    %15 = arith.mulf %14, %11 : vector<32x64xf32>
    %16 = arith.select %13, %11, %15 : vector<32x64xi1>, vector<32x64xf32>
    %c1 = arith.constant 1 : index
    %c0_10 = arith.constant 0 : index
    %c0_11 = arith.constant 0 : index
    %17 = vector.load %arg1[%c1, %c0_10, %c0_11] : memref<4x32x6xbf16, #tpu.memory_space<vmem>>, vector<1x32x6xbf16>
    %18 = vector.shape_cast %17 : vector<1x32x6xbf16> to vector<32x6xbf16>
    %cst_12 = arith.constant dense<0.000000e+00> : vector<32x64xf32>
    %19 = tpu.matmul %18, %0, %cst_12 {dimension_numbers = #tpu.dot_dimension_numbers<[1], [0], [0], [1], [0, 0, 1, 1], [], []>} : vector<32x6xbf16>, vector<6x64xbf16>, vector<32x64xf32> -> vector<32x64xf32>
    %20 = arith.mulf %19, %3 : vector<32x64xf32>
    %21 = arith.addf %20, %6 : vector<32x64xf32>
    %cst_13 = arith.constant 0.000000e+00 : f32
    %22 = vector.broadcast %cst_13 : f32 to vector<32x64xf32>
    %23 = arith.cmpf ogt, %21, %22 : vector<32x64xf32>
    %cst_14 = arith.constant 2.000000e-01 : f32
    %24 = vector.broadcast %cst_14 : f32 to vector<32x64xf32>
    %25 = arith.mulf %24, %21 : vector<32x64xf32>
    %26 = arith.select %23, %21, %25 : vector<32x64xi1>, vector<32x64xf32>
    %27 = arith.maximumf %16, %26 : vector<32x64xf32>
    %c2 = arith.constant 2 : index
    %c0_15 = arith.constant 0 : index
    %c0_16 = arith.constant 0 : index
    %28 = vector.load %arg1[%c2, %c0_15, %c0_16] : memref<4x32x6xbf16, #tpu.memory_space<vmem>>, vector<1x32x6xbf16>
    %29 = vector.shape_cast %28 : vector<1x32x6xbf16> to vector<32x6xbf16>
    %cst_17 = arith.constant dense<0.000000e+00> : vector<32x64xf32>
    %30 = tpu.matmul %29, %0, %cst_17 {dimension_numbers = #tpu.dot_dimension_numbers<[1], [0], [0], [1], [0, 0, 1, 1], [], []>} : vector<32x6xbf16>, vector<6x64xbf16>, vector<32x64xf32> -> vector<32x64xf32>
    %31 = arith.mulf %30, %3 : vector<32x64xf32>
    %32 = arith.addf %31, %6 : vector<32x64xf32>
    %cst_18 = arith.constant 0.000000e+00 : f32
    %33 = vector.broadcast %cst_18 : f32 to vector<32x64xf32>
    %34 = arith.cmpf ogt, %32, %33 : vector<32x64xf32>
    %cst_19 = arith.constant 2.000000e-01 : f32
    %35 = vector.broadcast %cst_19 : f32 to vector<32x64xf32>
    %36 = arith.mulf %35, %32 : vector<32x64xf32>
    %37 = arith.select %34, %32, %36 : vector<32x64xi1>, vector<32x64xf32>
    %38 = arith.maximumf %27, %37 : vector<32x64xf32>
    %c3 = arith.constant 3 : index
    %c0_20 = arith.constant 0 : index
    %c0_21 = arith.constant 0 : index
    %39 = vector.load %arg1[%c3, %c0_20, %c0_21] : memref<4x32x6xbf16, #tpu.memory_space<vmem>>, vector<1x32x6xbf16>
    %40 = vector.shape_cast %39 : vector<1x32x6xbf16> to vector<32x6xbf16>
    %cst_22 = arith.constant dense<0.000000e+00> : vector<32x64xf32>
    %41 = tpu.matmul %40, %0, %cst_22 {dimension_numbers = #tpu.dot_dimension_numbers<[1], [0], [0], [1], [0, 0, 1, 1], [], []>} : vector<32x6xbf16>, vector<6x64xbf16>, vector<32x64xf32> -> vector<32x64xf32>
    %42 = arith.mulf %41, %3 : vector<32x64xf32>
    %43 = arith.addf %42, %6 : vector<32x64xf32>
    %cst_23 = arith.constant 0.000000e+00 : f32
    %44 = vector.broadcast %cst_23 : f32 to vector<32x64xf32>
    %45 = arith.cmpf ogt, %43, %44 : vector<32x64xf32>
    %cst_24 = arith.constant 2.000000e-01 : f32
    %46 = vector.broadcast %cst_24 : f32 to vector<32x64xf32>
    %47 = arith.mulf %46, %43 : vector<32x64xf32>
    %48 = arith.select %45, %43, %47 : vector<32x64xi1>, vector<32x64xf32>
    %49 = arith.maximumf %38, %48 : vector<32x64xf32>
    %c0_25 = arith.constant 0 : index
    %c0_26 = arith.constant 0 : index
    %50 = vector.load %arg5[%c0_25, %c0_26] : memref<32x64xf32, #tpu.memory_space<vmem>>, vector<32x64xf32>
    tpu.vector_store %arg5[%c0_25, %c0_26], %49 {strides = array<i32>} : memref<32x64xf32, #tpu.memory_space<vmem>>, vector<32x64xf32>,
    return
  }
  func.func @transform_0(%arg0: i32) -> (i32, i32, i32) {
    %c0_i32 = arith.constant 0 : i32
    %c0_i32_0 = arith.constant 0 : i32
    %c0_i32_1 = arith.constant 0 : i32
    return %c0_i32, %arg0, %c0_i32_0 : i32, i32, i32
  }
  func.func @transform_1(%arg0: i32) -> (i32, i32) {
    %c0_i32 = arith.constant 0 : i32
    %c0_i32_0 = arith.constant 0 : i32
    %c0_i32_1 = arith.constant 0 : i32
    return %c0_i32, %c0_i32_0 : i32, i32
  }
  func.func @transform_2(%arg0: i32) -> (i32, i32) {
    %c0_i32 = arith.constant 0 : i32
    %c0_i32_0 = arith.constant 0 : i32
    %c0_i32_1 = arith.constant 0 : i32
    return %c0_i32, %c0_i32_0 : i32, i32
  }
  func.func @transform_3(%arg0: i32) -> (i32, i32) {
    %c0_i32 = arith.constant 0 : i32
    %c0_i32_0 = arith.constant 0 : i32
    %c0_i32_1 = arith.constant 0 : i32
    return %c0_i32, %c0_i32_0 : i32, i32
  }
  func.func @transform_4(%arg0: i32) -> (i32, i32) {
    %c0_i32 = arith.constant 0 : i32
    %c0_i32_0 = arith.constant 0 : i32
    return %arg0, %c0_i32 : i32, i32
  }
}

module attributes {stable_mosaic.version = 11 : i64} {
  func.func @_edgeconv_kernel(%arg0: i32, %arg1: memref<4x32x128xbf16, #tpu.memory_space<vmem>>, %arg2: memref<128x64xbf16, #tpu.memory_space<vmem>>, %arg3: memref<1x64xf32, #tpu.memory_space<vmem>>, %arg4: memref<1x64xf32, #tpu.memory_space<vmem>>, %arg5: memref<32x64xf32, #tpu.memory_space<vmem>>) attributes {dimension_semantics = [#tpu.dimension_semantics<parallel>], iteration_bounds = array<i64: 1>, scalar_prefetch = 0 : i64, scratch_operands = 0 : i64, tpu.core_type = #tpu.core_type<tc>, window_params = [{transform_indices = @transform_0, window_bounds = array<i64: 4, 32, 128>}, {pipeline_mode = #tpu.pipeline_mode<synchronous>, transform_indices = @transform_1, window_bounds = array<i64: 128, 64>}, {pipeline_mode = #tpu.pipeline_mode<synchronous>, transform_indices = @transform_2, window_bounds = array<i64: 1, 64>}, {pipeline_mode = #tpu.pipeline_mode<synchronous>, transform_indices = @transform_3, window_bounds = array<i64: 1, 64>}, {transform_indices = @transform_4, window_bounds = array<i64: 32, 64>}]} {
    %c0 = arith.constant 0 : index
    %c0_0 = arith.constant 0 : index
    %0 = vector.load %arg2[%c0, %c0_0] : memref<128x64xbf16, #tpu.memory_space<vmem>>, vector<128x64xbf16>
    %c0_1 = arith.constant 0 : index
    %c0_2 = arith.constant 0 : index
    %1 = vector.load %arg3[%c0_1, %c0_2] : memref<1x64xf32, #tpu.memory_space<vmem>>, vector<1x64xf32>
    %2 = vector.shape_cast %1 : vector<1x64xf32> to vector<1x64xf32>
    %3 = vector.broadcast %2 : vector<1x64xf32> to vector<32x64xf32>
    %c0_3 = arith.constant 0 : index
    %c0_4 = arith.constant 0 : index
    %4 = vector.load %arg4[%c0_3, %c0_4] : memref<1x64xf32, #tpu.memory_space<vmem>>, vector<1x64xf32>
    %5 = vector.shape_cast %4 : vector<1x64xf32> to vector<1x64xf32>
    %6 = vector.broadcast %5 : vector<1x64xf32> to vector<32x64xf32>
    %c0_5 = arith.constant 0 : index
    %c0_6 = arith.constant 0 : index
    %c0_7 = arith.constant 0 : index
    %7 = vector.load %arg1[%c0_5, %c0_6, %c0_7] : memref<4x32x128xbf16, #tpu.memory_space<vmem>>, vector<1x32x128xbf16>
    %8 = vector.shape_cast %7 : vector<1x32x128xbf16> to vector<32x128xbf16>
    %cst = arith.constant dense<0.000000e+00> : vector<32x64xf32>
    %9 = tpu.matmul %8, %0, %cst {dimension_numbers = #tpu.dot_dimension_numbers<[1], [0], [0], [1], [0, 0, 1, 1], [], []>} : vector<32x128xbf16>, vector<128x64xbf16>, vector<32x64xf32> -> vector<32x64xf32>
    %10 = arith.mulf %9, %3 : vector<32x64xf32>
    %11 = arith.addf %10, %6 : vector<32x64xf32>
    %cst_8 = arith.constant 0.000000e+00 : f32
    %12 = vector.broadcast %cst_8 : f32 to vector<32x64xf32>
    %13 = arith.cmpf ogt, %11, %12 : vector<32x64xf32>
    %cst_9 = arith.constant 2.000000e-01 : f32
    %14 = vector.broadcast %cst_9 : f32 to vector<32x64xf32>
    %15 = arith.mulf %14, %11 : vector<32x64xf32>
    %16 = arith.select %13, %11, %15 : vector<32x64xi1>, vector<32x64xf32>
    %c1 = arith.constant 1 : index
    %c0_10 = arith.constant 0 : index
    %c0_11 = arith.constant 0 : index
    %17 = vector.load %arg1[%c1, %c0_10, %c0_11] : memref<4x32x128xbf16, #tpu.memory_space<vmem>>, vector<1x32x128xbf16>
    %18 = vector.shape_cast %17 : vector<1x32x128xbf16> to vector<32x128xbf16>
    %cst_12 = arith.constant dense<0.000000e+00> : vector<32x64xf32>
    %19 = tpu.matmul %18, %0, %cst_12 {dimension_numbers = #tpu.dot_dimension_numbers<[1], [0], [0], [1], [0, 0, 1, 1], [], []>} : vector<32x128xbf16>, vector<128x64xbf16>, vector<32x64xf32> -> vector<32x64xf32>
    %20 = arith.mulf %19, %3 : vector<32x64xf32>
    %21 = arith.addf %20, %6 : vector<32x64xf32>
    %cst_13 = arith.constant 0.000000e+00 : f32
    %22 = vector.broadcast %cst_13 : f32 to vector<32x64xf32>
    %23 = arith.cmpf ogt, %21, %22 : vector<32x64xf32>
    %cst_14 = arith.constant 2.000000e-01 : f32
    %24 = vector.broadcast %cst_14 : f32 to vector<32x64xf32>
    %25 = arith.mulf %24, %21 : vector<32x64xf32>
    %26 = arith.select %23, %21, %25 : vector<32x64xi1>, vector<32x64xf32>
    %27 = arith.maximumf %16, %26 : vector<32x64xf32>
    %c2 = arith.constant 2 : index
    %c0_15 = arith.constant 0 : index
    %c0_16 = arith.constant 0 : index
    %28 = vector.load %arg1[%c2, %c0_15, %c0_16] : memref<4x32x128xbf16, #tpu.memory_space<vmem>>, vector<1x32x128xbf16>
    %29 = vector.shape_cast %28 : vector<1x32x128xbf16> to vector<32x128xbf16>
    %cst_17 = arith.constant dense<0.000000e+00> : vector<32x64xf32>
    %30 = tpu.matmul %29, %0, %cst_17 {dimension_numbers = #tpu.dot_dimension_numbers<[1], [0], [0], [1], [0, 0, 1, 1], [], []>} : vector<32x128xbf16>, vector<128x64xbf16>, vector<32x64xf32> -> vector<32x64xf32>
    %31 = arith.mulf %30, %3 : vector<32x64xf32>
    %32 = arith.addf %31, %6 : vector<32x64xf32>
    %cst_18 = arith.constant 0.000000e+00 : f32
    %33 = vector.broadcast %cst_18 : f32 to vector<32x64xf32>
    %34 = arith.cmpf ogt, %32, %33 : vector<32x64xf32>
    %cst_19 = arith.constant 2.000000e-01 : f32
    %35 = vector.broadcast %cst_19 : f32 to vector<32x64xf32>
    %36 = arith.mulf %35, %32 : vector<32x64xf32>
    %37 = arith.select %34, %32, %36 : vector<32x64xi1>, vector<32x64xf32>
    %38 = arith.maximumf %27, %37 : vector<32x64xf32>
    %c3 = arith.constant 3 : index
    %c0_20 = arith.constant 0 : index
    %c0_21 = arith.constant 0 : index
    %39 = vector.load %arg1[%c3, %c0_20, %c0_21] : memref<4x32x128xbf16, #tpu.memory_space<vmem>>, vector<1x32x128xbf16>
    %40 = vector.shape_cast %39 : vector<1x32x128xbf16> to vector<32x128xbf16>
    %cst_22 = arith.constant dense<0.000000e+00> : vector<32x64xf32>
    %41 = tpu.matmul %40, %0, %cst_22 {dimension_numbers = #tpu.dot_dimension_numbers<[1], [0], [0], [1], [0, 0, 1, 1], [], []>} : vector<32x128xbf16>, vector<128x64xbf16>, vector<32x64xf32> -> vector<32x64xf32>
    %42 = arith.mulf %41, %3 : vector<32x64xf32>
    %43 = arith.addf %42, %6 : vector<32x64xf32>
    %cst_23 = arith.constant 0.000000e+00 : f32
    %44 = vector.broadcast %cst_23 : f32 to vector<32x64xf32>
    %45 = arith.cmpf ogt, %43, %44 : vector<32x64xf32>
    %cst_24 = arith.constant 2.000000e-01 : f32
    %46 = vector.broadcast %cst_24 : f32 to vector<32x64xf32>
    %47 = arith.mulf %46, %43 : vector<32x64xf32>
    %48 = arith.select %45, %43, %47 : vector<32x64xi1>, vector<32x64xf32>
    %49 = arith.maximumf %38, %48 : vector<32x64xf32>
    %c0_25 = arith.constant 0 : index
    %c0_26 = arith.constant 0 : index
    %50 = vector.load %arg5[%c0_25, %c0_26] : memref<32x64xf32, #tpu.memory_space<vmem>>, vector<32x64xf32>
    tpu.vector_store %arg5[%c0_25, %c0_26], %49 {strides = array<i32>} : memref<32x64xf32, #tpu.memory_space<vmem>>, vector<32x64xf32>,
    return
  }
  func.func @transform_0(%arg0: i32) -> (i32, i32, i32) {
    %c0_i32 = arith.constant 0 : i32
    %c0_i32_0 = arith.constant 0 : i32
    %c0_i32_1 = arith.constant 0 : i32
    return %c0_i32, %arg0, %c0_i32_0 : i32, i32, i32
  }
  func.func @transform_1(%arg0: i32) -> (i32, i32) {
    %c0_i32 = arith.constant 0 : i32
    %c0_i32_0 = arith.constant 0 : i32
    %c0_i32_1 = arith.constant 0 : i32
    return %c0_i32, %c0_i32_0 : i32, i32
  }
  func.func @transform_2(%arg0: i32) -> (i32, i32) {
    %c0_i32 = arith.constant 0 : i32
    %c0_i32_0 = arith.constant 0 : i32
    %c0_i32_1 = arith.constant 0 : i32
    return %c0_i32, %c0_i32_0 : i32, i32
  }
  func.func @transform_3(%arg0: i32) -> (i32, i32) {
    %c0_i32 = arith.constant 0 : i32
    %c0_i32_0 = arith.constant 0 : i32
    %c0_i32_1 = arith.constant 0 : i32
    return %c0_i32, %c0_i32_0 : i32, i32
  }
  func.func @transform_4(%arg0: i32) -> (i32, i32) {
    %c0_i32 = arith.constant 0 : i32
    %c0_i32_0 = arith.constant 0 : i32
    return %arg0, %c0_i32 : i32, i32
  }
}

module attributes {stable_mosaic.version = 11 : i64} {
  func.func @_edgeconv_kernel(%arg0: i32, %arg1: memref<4x32x128xbf16, #tpu.memory_space<vmem>>, %arg2: memref<128x128xbf16, #tpu.memory_space<vmem>>, %arg3: memref<1x128xf32, #tpu.memory_space<vmem>>, %arg4: memref<1x128xf32, #tpu.memory_space<vmem>>, %arg5: memref<32x128xf32, #tpu.memory_space<vmem>>) attributes {dimension_semantics = [#tpu.dimension_semantics<parallel>], iteration_bounds = array<i64: 1>, scalar_prefetch = 0 : i64, scratch_operands = 0 : i64, tpu.core_type = #tpu.core_type<tc>, window_params = [{transform_indices = @transform_0, window_bounds = array<i64: 4, 32, 128>}, {pipeline_mode = #tpu.pipeline_mode<synchronous>, transform_indices = @transform_1, window_bounds = array<i64: 128, 128>}, {pipeline_mode = #tpu.pipeline_mode<synchronous>, transform_indices = @transform_2, window_bounds = array<i64: 1, 128>}, {pipeline_mode = #tpu.pipeline_mode<synchronous>, transform_indices = @transform_3, window_bounds = array<i64: 1, 128>}, {transform_indices = @transform_4, window_bounds = array<i64: 32, 128>}]} {
    %c0 = arith.constant 0 : index
    %c0_0 = arith.constant 0 : index
    %0 = vector.load %arg2[%c0, %c0_0] : memref<128x128xbf16, #tpu.memory_space<vmem>>, vector<128x128xbf16>
    %c0_1 = arith.constant 0 : index
    %c0_2 = arith.constant 0 : index
    %1 = vector.load %arg3[%c0_1, %c0_2] : memref<1x128xf32, #tpu.memory_space<vmem>>, vector<1x128xf32>
    %2 = vector.shape_cast %1 : vector<1x128xf32> to vector<1x128xf32>
    %3 = vector.broadcast %2 : vector<1x128xf32> to vector<32x128xf32>
    %c0_3 = arith.constant 0 : index
    %c0_4 = arith.constant 0 : index
    %4 = vector.load %arg4[%c0_3, %c0_4] : memref<1x128xf32, #tpu.memory_space<vmem>>, vector<1x128xf32>
    %5 = vector.shape_cast %4 : vector<1x128xf32> to vector<1x128xf32>
    %6 = vector.broadcast %5 : vector<1x128xf32> to vector<32x128xf32>
    %c0_5 = arith.constant 0 : index
    %c0_6 = arith.constant 0 : index
    %c0_7 = arith.constant 0 : index
    %7 = vector.load %arg1[%c0_5, %c0_6, %c0_7] : memref<4x32x128xbf16, #tpu.memory_space<vmem>>, vector<1x32x128xbf16>
    %8 = vector.shape_cast %7 : vector<1x32x128xbf16> to vector<32x128xbf16>
    %cst = arith.constant dense<0.000000e+00> : vector<32x128xf32>
    %9 = tpu.matmul %8, %0, %cst {dimension_numbers = #tpu.dot_dimension_numbers<[1], [0], [0], [1], [0, 0, 1, 1], [], []>} : vector<32x128xbf16>, vector<128x128xbf16>, vector<32x128xf32> -> vector<32x128xf32>
    %10 = arith.mulf %9, %3 : vector<32x128xf32>
    %11 = arith.addf %10, %6 : vector<32x128xf32>
    %cst_8 = arith.constant 0.000000e+00 : f32
    %12 = vector.broadcast %cst_8 : f32 to vector<32x128xf32>
    %13 = arith.cmpf ogt, %11, %12 : vector<32x128xf32>
    %cst_9 = arith.constant 2.000000e-01 : f32
    %14 = vector.broadcast %cst_9 : f32 to vector<32x128xf32>
    %15 = arith.mulf %14, %11 : vector<32x128xf32>
    %16 = arith.select %13, %11, %15 : vector<32x128xi1>, vector<32x128xf32>
    %c1 = arith.constant 1 : index
    %c0_10 = arith.constant 0 : index
    %c0_11 = arith.constant 0 : index
    %17 = vector.load %arg1[%c1, %c0_10, %c0_11] : memref<4x32x128xbf16, #tpu.memory_space<vmem>>, vector<1x32x128xbf16>
    %18 = vector.shape_cast %17 : vector<1x32x128xbf16> to vector<32x128xbf16>
    %cst_12 = arith.constant dense<0.000000e+00> : vector<32x128xf32>
    %19 = tpu.matmul %18, %0, %cst_12 {dimension_numbers = #tpu.dot_dimension_numbers<[1], [0], [0], [1], [0, 0, 1, 1], [], []>} : vector<32x128xbf16>, vector<128x128xbf16>, vector<32x128xf32> -> vector<32x128xf32>
    %20 = arith.mulf %19, %3 : vector<32x128xf32>
    %21 = arith.addf %20, %6 : vector<32x128xf32>
    %cst_13 = arith.constant 0.000000e+00 : f32
    %22 = vector.broadcast %cst_13 : f32 to vector<32x128xf32>
    %23 = arith.cmpf ogt, %21, %22 : vector<32x128xf32>
    %cst_14 = arith.constant 2.000000e-01 : f32
    %24 = vector.broadcast %cst_14 : f32 to vector<32x128xf32>
    %25 = arith.mulf %24, %21 : vector<32x128xf32>
    %26 = arith.select %23, %21, %25 : vector<32x128xi1>, vector<32x128xf32>
    %27 = arith.maximumf %16, %26 : vector<32x128xf32>
    %c2 = arith.constant 2 : index
    %c0_15 = arith.constant 0 : index
    %c0_16 = arith.constant 0 : index
    %28 = vector.load %arg1[%c2, %c0_15, %c0_16] : memref<4x32x128xbf16, #tpu.memory_space<vmem>>, vector<1x32x128xbf16>
    %29 = vector.shape_cast %28 : vector<1x32x128xbf16> to vector<32x128xbf16>
    %cst_17 = arith.constant dense<0.000000e+00> : vector<32x128xf32>
    %30 = tpu.matmul %29, %0, %cst_17 {dimension_numbers = #tpu.dot_dimension_numbers<[1], [0], [0], [1], [0, 0, 1, 1], [], []>} : vector<32x128xbf16>, vector<128x128xbf16>, vector<32x128xf32> -> vector<32x128xf32>
    %31 = arith.mulf %30, %3 : vector<32x128xf32>
    %32 = arith.addf %31, %6 : vector<32x128xf32>
    %cst_18 = arith.constant 0.000000e+00 : f32
    %33 = vector.broadcast %cst_18 : f32 to vector<32x128xf32>
    %34 = arith.cmpf ogt, %32, %33 : vector<32x128xf32>
    %cst_19 = arith.constant 2.000000e-01 : f32
    %35 = vector.broadcast %cst_19 : f32 to vector<32x128xf32>
    %36 = arith.mulf %35, %32 : vector<32x128xf32>
    %37 = arith.select %34, %32, %36 : vector<32x128xi1>, vector<32x128xf32>
    %38 = arith.maximumf %27, %37 : vector<32x128xf32>
    %c3 = arith.constant 3 : index
    %c0_20 = arith.constant 0 : index
    %c0_21 = arith.constant 0 : index
    %39 = vector.load %arg1[%c3, %c0_20, %c0_21] : memref<4x32x128xbf16, #tpu.memory_space<vmem>>, vector<1x32x128xbf16>
    %40 = vector.shape_cast %39 : vector<1x32x128xbf16> to vector<32x128xbf16>
    %cst_22 = arith.constant dense<0.000000e+00> : vector<32x128xf32>
    %41 = tpu.matmul %40, %0, %cst_22 {dimension_numbers = #tpu.dot_dimension_numbers<[1], [0], [0], [1], [0, 0, 1, 1], [], []>} : vector<32x128xbf16>, vector<128x128xbf16>, vector<32x128xf32> -> vector<32x128xf32>
    %42 = arith.mulf %41, %3 : vector<32x128xf32>
    %43 = arith.addf %42, %6 : vector<32x128xf32>
    %cst_23 = arith.constant 0.000000e+00 : f32
    %44 = vector.broadcast %cst_23 : f32 to vector<32x128xf32>
    %45 = arith.cmpf ogt, %43, %44 : vector<32x128xf32>
    %cst_24 = arith.constant 2.000000e-01 : f32
    %46 = vector.broadcast %cst_24 : f32 to vector<32x128xf32>
    %47 = arith.mulf %46, %43 : vector<32x128xf32>
    %48 = arith.select %45, %43, %47 : vector<32x128xi1>, vector<32x128xf32>
    %49 = arith.maximumf %38, %48 : vector<32x128xf32>
    %c0_25 = arith.constant 0 : index
    %c0_26 = arith.constant 0 : index
    %50 = vector.load %arg5[%c0_25, %c0_26] : memref<32x128xf32, #tpu.memory_space<vmem>>, vector<32x128xf32>
    tpu.vector_store %arg5[%c0_25, %c0_26], %49 {strides = array<i32>} : memref<32x128xf32, #tpu.memory_space<vmem>>, vector<32x128xf32>,
    return
  }
  func.func @transform_0(%arg0: i32) -> (i32, i32, i32) {
    %c0_i32 = arith.constant 0 : i32
    %c0_i32_0 = arith.constant 0 : i32
    %c0_i32_1 = arith.constant 0 : i32
    return %c0_i32, %arg0, %c0_i32_0 : i32, i32, i32
  }
  func.func @transform_1(%arg0: i32) -> (i32, i32) {
    %c0_i32 = arith.constant 0 : i32
    %c0_i32_0 = arith.constant 0 : i32
    %c0_i32_1 = arith.constant 0 : i32
    return %c0_i32, %c0_i32_0 : i32, i32
  }
  func.func @transform_2(%arg0: i32) -> (i32, i32) {
    %c0_i32 = arith.constant 0 : i32
    %c0_i32_0 = arith.constant 0 : i32
    %c0_i32_1 = arith.constant 0 : i32
    return %c0_i32, %c0_i32_0 : i32, i32
  }
  func.func @transform_3(%arg0: i32) -> (i32, i32) {
    %c0_i32 = arith.constant 0 : i32
    %c0_i32_0 = arith.constant 0 : i32
    %c0_i32_1 = arith.constant 0 : i32
    return %c0_i32, %c0_i32_0 : i32, i32
  }
  func.func @transform_4(%arg0: i32) -> (i32, i32) {
    %c0_i32 = arith.constant 0 : i32
    %c0_i32_0 = arith.constant 0 : i32
    return %arg0, %c0_i32 : i32, i32
  }
}

module attributes {stable_mosaic.version = 11 : i64} {
  func.func @_pairwise_dist_kernel(%arg0: i32, %arg1: i32, %arg2: memref<1x16x128xf32, #tpu.memory_space<vmem>>, %arg3: memref<1x16x128xf32, #tpu.memory_space<vmem>>, %arg4: memref<1x16x16xf32, #tpu.memory_space<vmem>>) attributes {dimension_semantics = [#tpu.dimension_semantics<parallel>, #tpu.dimension_semantics<parallel>], iteration_bounds = array<i64: 2, 1>, scalar_prefetch = 0 : i64, scratch_operands = 0 : i64, tpu.core_type = #tpu.core_type<tc>, window_params = [{transform_indices = @transform_0, window_bounds = array<i64: 1, 16, 128>}, {transform_indices = @transform_1, window_bounds = array<i64: 1, 16, 128>}, {transform_indices = @transform_2, window_bounds = array<i64: 1, 16, 16>}]} {
    %c0 = arith.constant 0 : index
    %c0_0 = arith.constant 0 : index
    %c0_1 = arith.constant 0 : index
    %0 = vector.load %arg2[%c0, %c0_0, %c0_1] : memref<1x16x128xf32, #tpu.memory_space<vmem>>, vector<1x16x128xf32>
    %1 = vector.shape_cast %0 : vector<1x16x128xf32> to vector<16x128xf32>
    %c0_2 = arith.constant 0 : index
    %c0_3 = arith.constant 0 : index
    %c0_4 = arith.constant 0 : index
    %2 = vector.load %arg3[%c0_2, %c0_3, %c0_4] : memref<1x16x128xf32, #tpu.memory_space<vmem>>, vector<1x16x128xf32>
    %3 = vector.shape_cast %2 : vector<1x16x128xf32> to vector<16x128xf32>
    %cst = arith.constant dense<0.000000e+00> : vector<16x16xf32>
    %4 = tpu.matmul %1, %3, %cst {dimension_numbers = #tpu.dot_dimension_numbers<[1], [1], [0], [0], [0, 0, 1, 0], [], []>} : vector<16x128xf32>, vector<16x128xf32>, vector<16x16xf32> -> vector<16x16xf32>
    %5 = arith.mulf %1, %1 : vector<16x128xf32>
    %cst_5 = arith.constant dense<0.000000e+00> : vector<16xf32>
    %6 = vector.multi_reduction <add>, %5, %cst_5 [1] : vector<16x128xf32> to vector<16xf32>
    %7 = vector.shape_cast %6 : vector<16xf32> to vector<16x1xf32>
    %8 = arith.mulf %3, %3 : vector<16x128xf32>
    %cst_6 = arith.constant dense<0.000000e+00> : vector<16xf32>
    %9 = vector.multi_reduction <add>, %8, %cst_6 [1] : vector<16x128xf32> to vector<16xf32>
    %10 = vector.shape_cast %9 : vector<16xf32> to vector<16x1xf32>
    %cst_7 = arith.constant 2.000000e+00 : f32
    %11 = vector.broadcast %cst_7 : f32 to vector<16x16xf32>
    %12 = arith.mulf %11, %4 : vector<16x16xf32>
    %13 = vector.broadcast %7 : vector<16x1xf32> to vector<16x16xf32>
    %14 = arith.subf %12, %13 : vector<16x16xf32>
    %15 = tpu.transpose %10, [1, 0] : vector<16x1xf32> -> vector<1x16xf32>
    %16 = vector.broadcast %15 : vector<1x16xf32> to vector<16x16xf32>
    %17 = arith.subf %14, %16 : vector<16x16xf32>
    %c0_8 = arith.constant 0 : index
    %c0_9 = arith.constant 0 : index
    %c0_10 = arith.constant 0 : index
    %18 = vector.load %arg4[%c0_8, %c0_9, %c0_10] : memref<1x16x16xf32, #tpu.memory_space<vmem>>, vector<1x16x16xf32>
    %19 = vector.shape_cast %18 : vector<1x16x16xf32> to vector<16x16xf32>
    %20 = vector.shape_cast %17 : vector<16x16xf32> to vector<1x16x16xf32>
    tpu.vector_store %arg4[%c0_8, %c0_9, %c0_10], %20 {strides = array<i32>} : memref<1x16x16xf32, #tpu.memory_space<vmem>>, vector<1x16x16xf32>,
    return
  }
  func.func @transform_0(%arg0: i32, %arg1: i32) -> (i32, i32, i32) {
    %c0_i32 = arith.constant 0 : i32
    %c0_i32_0 = arith.constant 0 : i32
    return %arg0, %arg1, %c0_i32 : i32, i32, i32
  }
  func.func @transform_1(%arg0: i32, %arg1: i32) -> (i32, i32, i32) {
    %c0_i32 = arith.constant 0 : i32
    %c0_i32_0 = arith.constant 0 : i32
    %c0_i32_1 = arith.constant 0 : i32
    return %arg0, %c0_i32, %c0_i32_0 : i32, i32, i32
  }
  func.func @transform_2(%arg0: i32, %arg1: i32) -> (i32, i32, i32) {
    %c0_i32 = arith.constant 0 : i32
    %c0_i32_0 = arith.constant 0 : i32
    return %arg0, %arg1, %c0_i32 : i32, i32, i32
  }
}

module attributes {stable_mosaic.version = 11 : i64} {
  func.func @_edgeconv_kernel(%arg0: i32, %arg1: memref<4x32x256xbf16, #tpu.memory_space<vmem>>, %arg2: memref<256x256xbf16, #tpu.memory_space<vmem>>, %arg3: memref<1x256xf32, #tpu.memory_space<vmem>>, %arg4: memref<1x256xf32, #tpu.memory_space<vmem>>, %arg5: memref<32x256xf32, #tpu.memory_space<vmem>>) attributes {dimension_semantics = [#tpu.dimension_semantics<parallel>], iteration_bounds = array<i64: 1>, scalar_prefetch = 0 : i64, scratch_operands = 0 : i64, tpu.core_type = #tpu.core_type<tc>, window_params = [{transform_indices = @transform_0, window_bounds = array<i64: 4, 32, 256>}, {pipeline_mode = #tpu.pipeline_mode<synchronous>, transform_indices = @transform_1, window_bounds = array<i64: 256, 256>}, {pipeline_mode = #tpu.pipeline_mode<synchronous>, transform_indices = @transform_2, window_bounds = array<i64: 1, 256>}, {pipeline_mode = #tpu.pipeline_mode<synchronous>, transform_indices = @transform_3, window_bounds = array<i64: 1, 256>}, {transform_indices = @transform_4, window_bounds = array<i64: 32, 256>}]} {
    %c0 = arith.constant 0 : index
    %c0_0 = arith.constant 0 : index
    %0 = vector.load %arg2[%c0, %c0_0] : memref<256x256xbf16, #tpu.memory_space<vmem>>, vector<256x256xbf16>
    %c0_1 = arith.constant 0 : index
    %c0_2 = arith.constant 0 : index
    %1 = vector.load %arg3[%c0_1, %c0_2] : memref<1x256xf32, #tpu.memory_space<vmem>>, vector<1x256xf32>
    %2 = vector.shape_cast %1 : vector<1x256xf32> to vector<1x256xf32>
    %3 = vector.broadcast %2 : vector<1x256xf32> to vector<32x256xf32>
    %c0_3 = arith.constant 0 : index
    %c0_4 = arith.constant 0 : index
    %4 = vector.load %arg4[%c0_3, %c0_4] : memref<1x256xf32, #tpu.memory_space<vmem>>, vector<1x256xf32>
    %5 = vector.shape_cast %4 : vector<1x256xf32> to vector<1x256xf32>
    %6 = vector.broadcast %5 : vector<1x256xf32> to vector<32x256xf32>
    %c0_5 = arith.constant 0 : index
    %c0_6 = arith.constant 0 : index
    %c0_7 = arith.constant 0 : index
    %7 = vector.load %arg1[%c0_5, %c0_6, %c0_7] : memref<4x32x256xbf16, #tpu.memory_space<vmem>>, vector<1x32x256xbf16>
    %8 = vector.shape_cast %7 : vector<1x32x256xbf16> to vector<32x256xbf16>
    %cst = arith.constant dense<0.000000e+00> : vector<32x256xf32>
    %9 = tpu.matmul %8, %0, %cst {dimension_numbers = #tpu.dot_dimension_numbers<[1], [0], [0], [1], [0, 0, 1, 1], [], []>} : vector<32x256xbf16>, vector<256x256xbf16>, vector<32x256xf32> -> vector<32x256xf32>
    %10 = arith.mulf %9, %3 : vector<32x256xf32>
    %11 = arith.addf %10, %6 : vector<32x256xf32>
    %cst_8 = arith.constant 0.000000e+00 : f32
    %12 = vector.broadcast %cst_8 : f32 to vector<32x256xf32>
    %13 = arith.cmpf ogt, %11, %12 : vector<32x256xf32>
    %cst_9 = arith.constant 2.000000e-01 : f32
    %14 = vector.broadcast %cst_9 : f32 to vector<32x256xf32>
    %15 = arith.mulf %14, %11 : vector<32x256xf32>
    %16 = arith.select %13, %11, %15 : vector<32x256xi1>, vector<32x256xf32>
    %c1 = arith.constant 1 : index
    %c0_10 = arith.constant 0 : index
    %c0_11 = arith.constant 0 : index
    %17 = vector.load %arg1[%c1, %c0_10, %c0_11] : memref<4x32x256xbf16, #tpu.memory_space<vmem>>, vector<1x32x256xbf16>
    %18 = vector.shape_cast %17 : vector<1x32x256xbf16> to vector<32x256xbf16>
    %cst_12 = arith.constant dense<0.000000e+00> : vector<32x256xf32>
    %19 = tpu.matmul %18, %0, %cst_12 {dimension_numbers = #tpu.dot_dimension_numbers<[1], [0], [0], [1], [0, 0, 1, 1], [], []>} : vector<32x256xbf16>, vector<256x256xbf16>, vector<32x256xf32> -> vector<32x256xf32>
    %20 = arith.mulf %19, %3 : vector<32x256xf32>
    %21 = arith.addf %20, %6 : vector<32x256xf32>
    %cst_13 = arith.constant 0.000000e+00 : f32
    %22 = vector.broadcast %cst_13 : f32 to vector<32x256xf32>
    %23 = arith.cmpf ogt, %21, %22 : vector<32x256xf32>
    %cst_14 = arith.constant 2.000000e-01 : f32
    %24 = vector.broadcast %cst_14 : f32 to vector<32x256xf32>
    %25 = arith.mulf %24, %21 : vector<32x256xf32>
    %26 = arith.select %23, %21, %25 : vector<32x256xi1>, vector<32x256xf32>
    %27 = arith.maximumf %16, %26 : vector<32x256xf32>
    %c2 = arith.constant 2 : index
    %c0_15 = arith.constant 0 : index
    %c0_16 = arith.constant 0 : index
    %28 = vector.load %arg1[%c2, %c0_15, %c0_16] : memref<4x32x256xbf16, #tpu.memory_space<vmem>>, vector<1x32x256xbf16>
    %29 = vector.shape_cast %28 : vector<1x32x256xbf16> to vector<32x256xbf16>
    %cst_17 = arith.constant dense<0.000000e+00> : vector<32x256xf32>
    %30 = tpu.matmul %29, %0, %cst_17 {dimension_numbers = #tpu.dot_dimension_numbers<[1], [0], [0], [1], [0, 0, 1, 1], [], []>} : vector<32x256xbf16>, vector<256x256xbf16>, vector<32x256xf32> -> vector<32x256xf32>
    %31 = arith.mulf %30, %3 : vector<32x256xf32>
    %32 = arith.addf %31, %6 : vector<32x256xf32>
    %cst_18 = arith.constant 0.000000e+00 : f32
    %33 = vector.broadcast %cst_18 : f32 to vector<32x256xf32>
    %34 = arith.cmpf ogt, %32, %33 : vector<32x256xf32>
    %cst_19 = arith.constant 2.000000e-01 : f32
    %35 = vector.broadcast %cst_19 : f32 to vector<32x256xf32>
    %36 = arith.mulf %35, %32 : vector<32x256xf32>
    %37 = arith.select %34, %32, %36 : vector<32x256xi1>, vector<32x256xf32>
    %38 = arith.maximumf %27, %37 : vector<32x256xf32>
    %c3 = arith.constant 3 : index
    %c0_20 = arith.constant 0 : index
    %c0_21 = arith.constant 0 : index
    %39 = vector.load %arg1[%c3, %c0_20, %c0_21] : memref<4x32x256xbf16, #tpu.memory_space<vmem>>, vector<1x32x256xbf16>
    %40 = vector.shape_cast %39 : vector<1x32x256xbf16> to vector<32x256xbf16>
    %cst_22 = arith.constant dense<0.000000e+00> : vector<32x256xf32>
    %41 = tpu.matmul %40, %0, %cst_22 {dimension_numbers = #tpu.dot_dimension_numbers<[1], [0], [0], [1], [0, 0, 1, 1], [], []>} : vector<32x256xbf16>, vector<256x256xbf16>, vector<32x256xf32> -> vector<32x256xf32>
    %42 = arith.mulf %41, %3 : vector<32x256xf32>
    %43 = arith.addf %42, %6 : vector<32x256xf32>
    %cst_23 = arith.constant 0.000000e+00 : f32
    %44 = vector.broadcast %cst_23 : f32 to vector<32x256xf32>
    %45 = arith.cmpf ogt, %43, %44 : vector<32x256xf32>
    %cst_24 = arith.constant 2.000000e-01 : f32
    %46 = vector.broadcast %cst_24 : f32 to vector<32x256xf32>
    %47 = arith.mulf %46, %43 : vector<32x256xf32>
    %48 = arith.select %45, %43, %47 : vector<32x256xi1>, vector<32x256xf32>
    %49 = arith.maximumf %38, %48 : vector<32x256xf32>
    %c0_25 = arith.constant 0 : index
    %c0_26 = arith.constant 0 : index
    %50 = vector.load %arg5[%c0_25, %c0_26] : memref<32x256xf32, #tpu.memory_space<vmem>>, vector<32x256xf32>
    tpu.vector_store %arg5[%c0_25, %c0_26], %49 {strides = array<i32>} : memref<32x256xf32, #tpu.memory_space<vmem>>, vector<32x256xf32>,
    return
  }
  func.func @transform_0(%arg0: i32) -> (i32, i32, i32) {
    %c0_i32 = arith.constant 0 : i32
    %c0_i32_0 = arith.constant 0 : i32
    %c0_i32_1 = arith.constant 0 : i32
    return %c0_i32, %arg0, %c0_i32_0 : i32, i32, i32
  }
  func.func @transform_1(%arg0: i32) -> (i32, i32) {
    %c0_i32 = arith.constant 0 : i32
    %c0_i32_0 = arith.constant 0 : i32
    %c0_i32_1 = arith.constant 0 : i32
    return %c0_i32, %c0_i32_0 : i32, i32
  }
  func.func @transform_2(%arg0: i32) -> (i32, i32) {
    %c0_i32 = arith.constant 0 : i32
    %c0_i32_0 = arith.constant 0 : i32
    %c0_i32_1 = arith.constant 0 : i32
    return %c0_i32, %c0_i32_0 : i32, i32
  }
  func.func @transform_3(%arg0: i32) -> (i32, i32) {
    %c0_i32 = arith.constant 0 : i32
    %c0_i32_0 = arith.constant 0 : i32
    %c0_i32_1 = arith.constant 0 : i32
    return %c0_i32, %c0_i32_0 : i32, i32
  }
  func.func @transform_4(%arg0: i32) -> (i32, i32) {
    %c0_i32 = arith.constant 0 : i32
    %c0_i32_0 = arith.constant 0 : i32
    return %arg0, %c0_i32 : i32, i32
  }
}

module attributes {stable_mosaic.version = 11 : i64} {
  func.func @_conv5_head_kernel(%arg0: i32, %arg1: memref<1x16x512xf32, #tpu.memory_space<vmem>>, %arg2: memref<512x64xf32, #tpu.memory_space<vmem>>, %arg3: memref<1x64xf32, #tpu.memory_space<vmem>>, %arg4: memref<1x64xf32, #tpu.memory_space<vmem>>, %arg5: memref<128x512xf32, #tpu.memory_space<vmem>>, %arg6: memref<1x512xf32, #tpu.memory_space<vmem>>, %arg7: memref<1x512xf32, #tpu.memory_space<vmem>>, %arg8: memref<512x256xf32, #tpu.memory_space<vmem>>, %arg9: memref<1x256xf32, #tpu.memory_space<vmem>>, %arg10: memref<1x256xf32, #tpu.memory_space<vmem>>, %arg11: memref<1x256xf32, #tpu.memory_space<vmem>>, %arg12: memref<256x40xf32, #tpu.memory_space<vmem>>, %arg13: memref<1x40xf32, #tpu.memory_space<vmem>>, %arg14: memref<1x1x40xf32, #tpu.memory_space<vmem>>) attributes {dimension_semantics = [#tpu.dimension_semantics<parallel>], iteration_bounds = array<i64: 2>, scalar_prefetch = 0 : i64, scratch_operands = 0 : i64, tpu.core_type = #tpu.core_type<tc>, window_params = [{transform_indices = @transform_0, window_bounds = array<i64: 1, 16, 512>}, {pipeline_mode = #tpu.pipeline_mode<synchronous>, transform_indices = @transform_1, window_bounds = array<i64: 512, 64>}, {pipeline_mode = #tpu.pipeline_mode<synchronous>, transform_indices = @transform_2, window_bounds = array<i64: 1, 64>}, {pipeline_mode = #tpu.pipeline_mode<synchronous>, transform_indices = @transform_3, window_bounds = array<i64: 1, 64>}, {pipeline_mode = #tpu.pipeline_mode<synchronous>, transform_indices = @transform_4, window_bounds = array<i64: 128, 512>}, {pipeline_mode = #tpu.pipeline_mode<synchronous>, transform_indices = @transform_5, window_bounds = array<i64: 1, 512>}, {pipeline_mode = #tpu.pipeline_mode<synchronous>, transform_indices = @transform_6, window_bounds = array<i64: 1, 512>}, {pipeline_mode = #tpu.pipeline_mode<synchronous>, transform_indices = @transform_7, window_bounds = array<i64: 512, 256>}, {pipeline_mode = #tpu.pipeline_mode<synchronous>, transform_indices = @transform_8, window_bounds = array<i64: 1, 256>}, {pipeline_mode = #tpu.pipeline_mode<synchronous>, transform_indices = @transform_9, window_bounds = array<i64: 1, 256>}, {pipeline_mode = #tpu.pipeline_mode<synchronous>, transform_indices = @transform_10, window_bounds = array<i64: 1, 256>}, {pipeline_mode = #tpu.pipeline_mode<synchronous>, transform_indices = @transform_11, window_bounds = array<i64: 256, 40>}, {pipeline_mode = #tpu.pipeline_mode<synchronous>, transform_indices = @transform_12, window_bounds = array<i64: 1, 40>}, {transform_indices = @transform_13, window_bounds = array<i64: 1, 1, 40>}]} {
    %c0 = arith.constant 0 : index
    %c0_0 = arith.constant 0 : index
    %c0_1 = arith.constant 0 : index
    %0 = vector.load %arg1[%c0, %c0_0, %c0_1] : memref<1x16x512xf32, #tpu.memory_space<vmem>>, vector<1x16x512xf32>
    %1 = vector.shape_cast %0 : vector<1x16x512xf32> to vector<16x512xf32>
    %c0_2 = arith.constant 0 : index
    %c0_3 = arith.constant 0 : index
    %2 = vector.load %arg2[%c0_2, %c0_3] : memref<512x64xf32, #tpu.memory_space<vmem>>, vector<512x64xf32>
    %cst = arith.constant dense<0.000000e+00> : vector<16x64xf32>
    %3 = tpu.matmul %1, %2, %cst {dimension_numbers = #tpu.dot_dimension_numbers<[1], [0], [0], [1], [0, 0, 1, 1], [], []>} : vector<16x512xf32>, vector<512x64xf32>, vector<16x64xf32> -> vector<16x64xf32>
    %c0_4 = arith.constant 0 : index
    %c0_5 = arith.constant 0 : index
    %4 = vector.load %arg3[%c0_4, %c0_5] : memref<1x64xf32, #tpu.memory_space<vmem>>, vector<1x64xf32>
    %5 = vector.broadcast %4 : vector<1x64xf32> to vector<16x64xf32>
    %6 = arith.mulf %3, %5 : vector<16x64xf32>
    %c0_6 = arith.constant 0 : index
    %c0_7 = arith.constant 0 : index
    %7 = vector.load %arg4[%c0_6, %c0_7] : memref<1x64xf32, #tpu.memory_space<vmem>>, vector<1x64xf32>
    %8 = vector.broadcast %7 : vector<1x64xf32> to vector<16x64xf32>
    %9 = arith.addf %6, %8 : vector<16x64xf32>
    %cst_8 = arith.constant 0.000000e+00 : f32
    %10 = vector.broadcast %cst_8 : f32 to vector<16x64xf32>
    %11 = arith.cmpf ogt, %9, %10 : vector<16x64xf32>
    %cst_9 = arith.constant 2.000000e-01 : f32
    %12 = vector.broadcast %cst_9 : f32 to vector<16x64xf32>
    %13 = arith.mulf %12, %9 : vector<16x64xf32>
    %14 = arith.select %11, %9, %13 : vector<16x64xi1>, vector<16x64xf32>
    %cst_10 = arith.constant dense<0xFF800000> : vector<64xf32>
    %15 = vector.multi_reduction <maximumf>, %14, %cst_10 [0] : vector<16x64xf32> to vector<64xf32>
    %16 = vector.shape_cast %15 : vector<64xf32> to vector<1x64xf32>
    %cst_11 = arith.constant dense<0.000000e+00> : vector<64xf32>
    %17 = vector.multi_reduction <add>, %14, %cst_11 [0] : vector<16x64xf32> to vector<64xf32>
    %18 = vector.shape_cast %17 : vector<64xf32> to vector<1x64xf32>
    %cst_12 = arith.constant 1.600000e+01 : f32
    %19 = vector.broadcast %cst_12 : f32 to vector<1x64xf32>
    %20 = arith.divf %18, %19 : vector<1x64xf32>
    %21 = tpu.concatenate %16, %20 in 1 : vector<1x64xf32>, vector<1x64xf32> -> vector<1x128xf32>
    %c0_13 = arith.constant 0 : index
    %c0_14 = arith.constant 0 : index
    %22 = vector.load %arg5[%c0_13, %c0_14] : memref<128x512xf32, #tpu.memory_space<vmem>>, vector<128x512xf32>
    %cst_15 = arith.constant dense<0.000000e+00> : vector<1x512xf32>
    %23 = tpu.matmul %21, %22, %cst_15 {dimension_numbers = #tpu.dot_dimension_numbers<[1], [0], [0], [1], [0, 0, 1, 1], [], []>} : vector<1x128xf32>, vector<128x512xf32>, vector<1x512xf32> -> vector<1x512xf32>
    %c0_16 = arith.constant 0 : index
    %c0_17 = arith.constant 0 : index
    %24 = vector.load %arg6[%c0_16, %c0_17] : memref<1x512xf32, #tpu.memory_space<vmem>>, vector<1x512xf32>
    %25 = arith.mulf %23, %24 : vector<1x512xf32>
    %c0_18 = arith.constant 0 : index
    %c0_19 = arith.constant 0 : index
    %26 = vector.load %arg7[%c0_18, %c0_19] : memref<1x512xf32, #tpu.memory_space<vmem>>, vector<1x512xf32>
    %27 = arith.addf %25, %26 : vector<1x512xf32>
    %cst_20 = arith.constant 0.000000e+00 : f32
    %28 = vector.broadcast %cst_20 : f32 to vector<1x512xf32>
    %29 = arith.cmpf ogt, %27, %28 : vector<1x512xf32>
    %cst_21 = arith.constant 2.000000e-01 : f32
    %30 = vector.broadcast %cst_21 : f32 to vector<1x512xf32>
    %31 = arith.mulf %30, %27 : vector<1x512xf32>
    %32 = arith.select %29, %27, %31 : vector<1x512xi1>, vector<1x512xf32>
    %c0_22 = arith.constant 0 : index
    %c0_23 = arith.constant 0 : index
    %33 = vector.load %arg8[%c0_22, %c0_23] : memref<512x256xf32, #tpu.memory_space<vmem>>, vector<512x256xf32>
    %cst_24 = arith.constant dense<0.000000e+00> : vector<1x256xf32>
    %34 = tpu.matmul %32, %33, %cst_24 {dimension_numbers = #tpu.dot_dimension_numbers<[1], [0], [0], [1], [0, 0, 1, 1], [], []>} : vector<1x512xf32>, vector<512x256xf32>, vector<1x256xf32> -> vector<1x256xf32>
    %c0_25 = arith.constant 0 : index
    %c0_26 = arith.constant 0 : index
    %35 = vector.load %arg9[%c0_25, %c0_26] : memref<1x256xf32, #tpu.memory_space<vmem>>, vector<1x256xf32>
    %36 = arith.addf %34, %35 : vector<1x256xf32>
    %c0_27 = arith.constant 0 : index
    %c0_28 = arith.constant 0 : index
    %37 = vector.load %arg10[%c0_27, %c0_28] : memref<1x256xf32, #tpu.memory_space<vmem>>, vector<1x256xf32>
    %38 = arith.mulf %36, %37 : vector<1x256xf32>
    %c0_29 = arith.constant 0 : index
    %c0_30 = arith.constant 0 : index
    %39 = vector.load %arg11[%c0_29, %c0_30] : memref<1x256xf32, #tpu.memory_space<vmem>>, vector<1x256xf32>
    %40 = arith.addf %38, %39 : vector<1x256xf32>
    %cst_31 = arith.constant 0.000000e+00 : f32
    %41 = vector.broadcast %cst_31 : f32 to vector<1x256xf32>
    %42 = arith.cmpf ogt, %40, %41 : vector<1x256xf32>
    %cst_32 = arith.constant 2.000000e-01 : f32
    %43 = vector.broadcast %cst_32 : f32 to vector<1x256xf32>
    %44 = arith.mulf %43, %40 : vector<1x256xf32>
    %45 = arith.select %42, %40, %44 : vector<1x256xi1>, vector<1x256xf32>
    %c0_33 = arith.constant 0 : index
    %c0_34 = arith.constant 0 : index
    %46 = vector.load %arg12[%c0_33, %c0_34] : memref<256x40xf32, #tpu.memory_space<vmem>>, vector<256x40xf32>
    %cst_35 = arith.constant dense<0.000000e+00> : vector<1x40xf32>
    %47 = tpu.matmul %45, %46, %cst_35 {dimension_numbers = #tpu.dot_dimension_numbers<[1], [0], [0], [1], [0, 0, 1, 1], [], []>} : vector<1x256xf32>, vector<256x40xf32>, vector<1x40xf32> -> vector<1x40xf32>
    %c0_36 = arith.constant 0 : index
    %c0_37 = arith.constant 0 : index
    %48 = vector.load %arg13[%c0_36, %c0_37] : memref<1x40xf32, #tpu.memory_space<vmem>>, vector<1x40xf32>
    %49 = arith.addf %47, %48 : vector<1x40xf32>
    %c0_38 = arith.constant 0 : index
    %c0_39 = arith.constant 0 : index
    %c0_40 = arith.constant 0 : index
    %50 = vector.load %arg14[%c0_38, %c0_39, %c0_40] : memref<1x1x40xf32, #tpu.memory_space<vmem>>, vector<1x1x40xf32>
    %51 = vector.shape_cast %50 : vector<1x1x40xf32> to vector<1x40xf32>
    %52 = vector.shape_cast %49 : vector<1x40xf32> to vector<1x1x40xf32>
    tpu.vector_store %arg14[%c0_38, %c0_39, %c0_40], %52 {strides = array<i32>} : memref<1x1x40xf32, #tpu.memory_space<vmem>>, vector<1x1x40xf32>,
    return
  }
  func.func @transform_0(%arg0: i32) -> (i32, i32, i32) {
    %c0_i32 = arith.constant 0 : i32
    %c0_i32_0 = arith.constant 0 : i32
    %c0_i32_1 = arith.constant 0 : i32
    return %arg0, %c0_i32, %c0_i32_0 : i32, i32, i32
  }
  func.func @transform_1(%arg0: i32) -> (i32, i32) {
    %c0_i32 = arith.constant 0 : i32
    %c0_i32_0 = arith.constant 0 : i32
    %c0_i32_1 = arith.constant 0 : i32
    return %c0_i32, %c0_i32_0 : i32, i32
  }
  func.func @transform_2(%arg0: i32) -> (i32, i32) {
    %c0_i32 = arith.constant 0 : i32
    %c0_i32_0 = arith.constant 0 : i32
    %c0_i32_1 = arith.constant 0 : i32
    return %c0_i32, %c0_i32_0 : i32, i32
  }
  func.func @transform_3(%arg0: i32) -> (i32, i32) {
    %c0_i32 = arith.constant 0 : i32
    %c0_i32_0 = arith.constant 0 : i32
    %c0_i32_1 = arith.constant 0 : i32
    return %c0_i32, %c0_i32_0 : i32, i32
  }
  func.func @transform_4(%arg0: i32) -> (i32, i32) {
    %c0_i32 = arith.constant 0 : i32
    %c0_i32_0 = arith.constant 0 : i32
    %c0_i32_1 = arith.constant 0 : i32
    return %c0_i32, %c0_i32_0 : i32, i32
  }
  func.func @transform_5(%arg0: i32) -> (i32, i32) {
    %c0_i32 = arith.constant 0 : i32
    %c0_i32_0 = arith.constant 0 : i32
    %c0_i32_1 = arith.constant 0 : i32
    return %c0_i32, %c0_i32_0 : i32, i32
  }
  func.func @transform_6(%arg0: i32) -> (i32, i32) {
    %c0_i32 = arith.constant 0 : i32
    %c0_i32_0 = arith.constant 0 : i32
    %c0_i32_1 = arith.constant 0 : i32
    return %c0_i32, %c0_i32_0 : i32, i32
  }
  func.func @transform_7(%arg0: i32) -> (i32, i32) {
    %c0_i32 = arith.constant 0 : i32
    %c0_i32_0 = arith.constant 0 : i32
    %c0_i32_1 = arith.constant 0 : i32
    return %c0_i32, %c0_i32_0 : i32, i32
  }
  func.func @transform_8(%arg0: i32) -> (i32, i32) {
    %c0_i32 = arith.constant 0 : i32
    %c0_i32_0 = arith.constant 0 : i32
    %c0_i32_1 = arith.constant 0 : i32
    return %c0_i32, %c0_i32_0 : i32, i32
  }
  func.func @transform_9(%arg0: i32) -> (i32, i32) {
    %c0_i32 = arith.constant 0 : i32
    %c0_i32_0 = arith.constant 0 : i32
    %c0_i32_1 = arith.constant 0 : i32
    return %c0_i32, %c0_i32_0 : i32, i32
  }
  func.func @transform_10(%arg0: i32) -> (i32, i32) {
    %c0_i32 = arith.constant 0 : i32
    %c0_i32_0 = arith.constant 0 : i32
    %c0_i32_1 = arith.constant 0 : i32
    return %c0_i32, %c0_i32_0 : i32, i32
  }
  func.func @transform_11(%arg0: i32) -> (i32, i32) {
    %c0_i32 = arith.constant 0 : i32
    %c0_i32_0 = arith.constant 0 : i32
    %c0_i32_1 = arith.constant 0 : i32
    return %c0_i32, %c0_i32_0 : i32, i32
  }
  func.func @transform_12(%arg0: i32) -> (i32, i32) {
    %c0_i32 = arith.constant 0 : i32
    %c0_i32_0 = arith.constant 0 : i32
    %c0_i32_1 = arith.constant 0 : i32
    return %c0_i32, %c0_i32_0 : i32, i32
  }
  func.func @transform_13(%arg0: i32) -> (i32, i32, i32) {
    %c0_i32 = arith.constant 0 : i32
    %c0_i32_0 = arith.constant 0 : i32
    %c0_i32_1 = arith.constant 0 : i32
    return %arg0, %c0_i32, %c0_i32_0 : i32, i32, i32
  }
}

</mosaic_0001>

<bundles_post_ra>
// kernel: forward.9
= control target key start
LH: loop header
LB: loop body
LE: loop exit
PB: predicated region body
PF: predicated region fallthrough
CT: control target
= control target key end

     0   :  { %s556_s9 = smov 0   ;;  %s558_s10 = smov 0   ;;  %s605_s0 = inlined_call_operand.vmem [shape: f32[2,16,3], index: 0, kind: input, shape index: {}, may-alias: {0,1}]   ;;  %s606_s1 = inlined_call_operand.vmem [shape: f32[2,16,3], index: 1, kind: input, shape index: {}, may-alias: {0,1}]   ;;  %s607_s2 = inlined_call_operand.vmem [shape: f32[2,16,16], index: 2, kind: output, shape index: {}]  }
   0x1   :  { %s560_s11 = smov 0  }
   0x2 LB: > { %s24_s12 = sadd.s32 1, %s535_s10  ;;  %p459_p0 = scmp.ge.s32.totalorder %s539_s11, 1  ;;  %s539_s11 = sphi %s560_s11, %s12_s11   ;;  %s535_s10 = sphi %s558_s10, %s609_s10   ;;  %s531_s9 = sphi %s556_s9, %s608_s9  }
   0x3   : > { %p26_p1 = scmp.ge.s32.totalorder %s24_s12, 2  ;;  %p143_p2 = scmp.lt.s32.totalorder %s539_s11, 3 }
   0x5   : > { %s611_s12 = smov (%p26_p1, %s24_s12), 0  ;;  %p144_p3 = pnand %p459_p0, %p143_p2 }
   0x6   : > { %p179_p4 = scmp.lt.s32.totalorder (!%p144_p3), %s531_s9, 1  ;;  %vm207_vm0 = vcmask (!%p144_p3), 23552   ;;  %v347_v17 = vlaneseq (!%p144_p3)  ;;  %vm353_vm2 = vcmask (!%p144_p3), 130048  }
   0x7   : > { %147 = sbr.rel (%p144_p3) target bundleno = 297 (0x129), region = 28  ;;  %vm487_vm1 = vmpackc.low (!%p144_p3), %vm207_vm0, %vm207_vm0 }
   0x8   : > { %v348_v19 = vshrl.u32 (!%p144_p3), %v347_v17, 7 }
   0xa   : > { %v349_v23 = vsub.s32 (!%p144_p3), 0, %v348_v19 }
   0xe   : > { %s613_s9 = smov (!%p179_p4, %s531_s9), 1 }
   0xf   : > { %s574_s13 = sshll.u32 %s613_s9, 4 }
  0x10   : > { %s192_s16 = scalar_lea.vmem %s606_s1, %s574_s13  ;;  %s186_s19 = scalar_lea.vmem %s605_s0, %s574_s13 }
  0x11   : > { %v205_v0 = vld [vmem:[%s192_s16] sm:$0xff]  ;;  %v206_v1 = vld [vmem:[%s192_s16 + $0x8] sm:$0xff]  ;;  %s201_s22 = scalar_lea.vmem %s607_s2, %s574_s13 }
  0x12   : > { %v303_v2 = vmul.f32 %v205_v0, %v205_v0  ;;  %v304_v3 = vmul.f32 %v206_v1, %v206_v1  ;;  %v486_v4 = vpack.c.bf16 %v206_v1, %v205_v0  ;;  %v203_v5 = vld [vmem:[%s186_s19] sm:$0xff]  ;;  %v204_v6 = vld [vmem:[%s186_s19 + $0x8] sm:$0xff] }
  0x13   : > { %483 = vmatprep.mubr.msk.f32.mxu0 %vm207_vm0, %v203_v5  ;;  %v295_v7 = vmul.f32 %v203_v5, %v203_v5  ;;  %v296_v8 = vmul.f32 %v204_v6, %v204_v6 }
  0x14   : > { %v305_v9 = vsel %vm207_vm0, %v303_v2, 0.0  ;;  %488 = vmatprep.subr.msk.bf16.mxu0 %vm487_vm1, %v486_v4  ;;  %v308_v11 = vsel %vm207_vm0, %v304_v3, 0.0 }
  0x15   : > { %306 = vadd.xlane.f32.xlu0 %v305_v9  ;;  %491 = vmatpush3.bf16.xpose.msk.msra.mxu0 %vm487_vm1, %v486_v4  ;;  %v297_v10 = vsel %vm207_vm0, %v295_v7, 0.0  ;;  %v300_v12 = vsel %vm207_vm0, %v296_v8, 0.0 }
  0x16   : > { %298 = vadd.xlane.f32.xlu1 %v297_v10 }
  0x19   : > { %309 = vadd.xlane.f32.xlu0 %v308_v11 }
  0x1a   : > { %301 = vadd.xlane.f32.xlu1 %v300_v12 }
  0x1c   : > { %484 = vmatmul.mubr.msk.f32.vlgmr.msra.gmra.mrb[0].mxu0 %vm207_vm0, %v204_v6 }
  0xa2   : > { %v307_v13 = vpop.xlane.xlu0 %306 }
  0xa3   : > { %315 = vxpose.xlu0.b32.start [1/2] (short) (narrow) %v307_v13, 8  ;;  %v299_v18 = vpop.xlane.xlu1 %298 }
  0xa6   : > { %v310_v14 = vpop.xlane.xlu0 %309 }
  0xa7   : > { %316 = vxpose.xlu0.b32.end [2/2] (short) (narrow) %v310_v14, 8  ;;  %v302_v21 = vpop.xlane.xlu1 %301 }
  0xef   : > { %v485_v15 = vpop.f32.mrb[0].mxu0 }
  0xf0   : > { %v286_v16 = vpop.f32.mrb[1].mxu0  ;;  %v312_v20 = vmul.f32 2.0, %v485_v15 }
  0xf1   : > { %v311_v22 = vmul.f32 2.0, %v286_v16 }
  0xf2   : > { %v314_v24 = vsub.f32 %v312_v20, %v302_v21 }
  0xf3   : > { %v313_v26 = vsub.f32 %v311_v22, %v299_v18 }
 0x123   : > { %v331_v25 = vpop.trf.xlu0 }
 0x124   : > { %v350_v27 = vrot.slane %v331_v25, %v349_v23 }
 0x126   : > { %v351_v28 = vsub.f32 %v313_v26, %v350_v27  ;;  %v352_v29 = vsub.f32 %v314_v24, %v350_v27 }
 0x128   : > { %354 = vst.msk [vmem:[%s201_s22] sm:$0xff] %vm353_vm2, %v351_v28  ;;  %355 = vst.msk [vmem:[%s201_s22 + $0x8] sm:$0xff] %vm353_vm2, %v352_v29 }
 0x129 PF: > { %s12_s11 = sadd.s32 1, %s539_s11   ;;  %s608_s9 = smov %s535_s10 }
 0x12a   : > { %p9_p5 = scmp.ge.s32.totalorder %s12_s11, 4   ;;  %s609_s10 = smov %s611_s12 }
 0x12c   :  { %11 = sbr.rel (!%p9_p5) target bundleno = 2 (0x2), region = 61 }

// kernel: forward.11
= control target key start
LH: loop header
LB: loop body
LE: loop exit
PB: predicated region body
PF: predicated region fallthrough
CT: control target
= control target key end

     0   :  { %s556_s9 = smov 0   ;;  %s558_s10 = smov 0   ;;  %s605_s0 = inlined_call_operand.vmem [shape: f32[2,16,64], index: 0, kind: input, shape index: {}, may-alias: {0,1}]   ;;  %s606_s1 = inlined_call_operand.vmem [shape: f32[2,16,64], index: 1, kind: input, shape index: {}, may-alias: {0,1}]   ;;  %s607_s2 = inlined_call_operand.vmem [shape: f32[2,16,16], index: 2, kind: output, shape index: {}]  }
   0x1   :  { %s560_s11 = smov 0  }
   0x2 LB: > { %s24_s12 = sadd.s32 1, %s535_s10  ;;  %p459_p0 = scmp.ge.s32.totalorder %s539_s11, 1  ;;  %s539_s11 = sphi %s560_s11, %s12_s11   ;;  %s535_s10 = sphi %s558_s10, %s609_s10   ;;  %s531_s9 = sphi %s556_s9, %s608_s9  }
   0x3   : > { %p26_p1 = scmp.ge.s32.totalorder %s24_s12, 2  ;;  %p143_p2 = scmp.lt.s32.totalorder %s539_s11, 3 }
   0x5   : > { %s611_s12 = smov (%p26_p1, %s24_s12), 0  ;;  %p144_p3 = pnand %p459_p0, %p143_p2 }
   0x6   : > { %p179_p4 = scmp.lt.s32.totalorder (!%p144_p3), %s531_s9, 1  ;;  %vm207_vm0 = vcmask (!%p144_p3), 523264   ;;  %v347_v17 = vlaneseq (!%p144_p3)  ;;  %vm353_vm2 = vcmask (!%p144_p3), 130048  }
   0x7   : > { %147 = sbr.rel (%p144_p3) target bundleno = 297 (0x129), region = 28  ;;  %vm487_vm1 = vmpackc.low (!%p144_p3), %vm207_vm0, %vm207_vm0 }
   0x8   : > { %v348_v19 = vshrl.u32 (!%p144_p3), %v347_v17, 7 }
   0xa   : > { %v349_v23 = vsub.s32 (!%p144_p3), 0, %v348_v19 }
   0xe   : > { %s613_s9 = smov (!%p179_p4, %s531_s9), 1 }
   0xf   : > { %s574_s13 = sshll.u32 %s613_s9, 4 }
  0x10   : > { %s192_s16 = scalar_lea.vmem %s606_s1, %s574_s13  ;;  %s186_s19 = scalar_lea.vmem %s605_s0, %s574_s13 }
  0x11   : > { %v205_v0 = vld [vmem:[%s192_s16] sm:$0xff]  ;;  %v206_v1 = vld [vmem:[%s192_s16 + $0x8] sm:$0xff]  ;;  %s201_s22 = scalar_lea.vmem %s607_s2, %s574_s13 }
  0x12   : > { %v303_v2 = vmul.f32 %v205_v0, %v205_v0  ;;  %v304_v3 = vmul.f32 %v206_v1, %v206_v1  ;;  %v486_v4 = vpack.c.bf16 %v206_v1, %v205_v0  ;;  %v203_v5 = vld [vmem:[%s186_s19] sm:$0xff]  ;;  %v204_v6 = vld [vmem:[%s186_s19 + $0x8] sm:$0xff] }
  0x13   : > { %483 = vmatprep.mubr.msk.f32.mxu0 %vm207_vm0, %v203_v5  ;;  %v295_v7 = vmul.f32 %v203_v5, %v203_v5  ;;  %v296_v8 = vmul.f32 %v204_v6, %v204_v6 }
  0x14   : > { %v305_v9 = vsel %vm207_vm0, %v303_v2, 0.0  ;;  %488 = vmatprep.subr.msk.bf16.mxu0 %vm487_vm1, %v486_v4  ;;  %v308_v11 = vsel %vm207_vm0, %v304_v3, 0.0 }
  0x15   : > { %306 = vadd.xlane.f32.xlu0 %v305_v9  ;;  %491 = vmatpush3.bf16.xpose.msk.msra.mxu0 %vm487_vm1, %v486_v4  ;;  %v297_v10 = vsel %vm207_vm0, %v295_v7, 0.0  ;;  %v300_v12 = vsel %vm207_vm0, %v296_v8, 0.0 }
  0x16   : > { %298 = vadd.xlane.f32.xlu1 %v297_v10 }
  0x19   : > { %309 = vadd.xlane.f32.xlu0 %v308_v11 }
  0x1a   : > { %301 = vadd.xlane.f32.xlu1 %v300_v12 }
  0x1c   : > { %484 = vmatmul.mubr.msk.f32.vlgmr.msra.gmra.mrb[0].mxu0 %vm207_vm0, %v204_v6 }
  0xa2   : > { %v307_v13 = vpop.xlane.xlu0 %306 }
  0xa3   : > { %315 = vxpose.xlu0.b32.start [1/2] (short) (narrow) %v307_v13, 8  ;;  %v299_v18 = vpop.xlane.xlu1 %298 }
  0xa6   : > { %v310_v14 = vpop.xlane.xlu0 %309 }
  0xa7   : > { %316 = vxpose.xlu0.b32.end [2/2] (short) (narrow) %v310_v14, 8  ;;  %v302_v21 = vpop.xlane.xlu1 %301 }
  0xef   : > { %v485_v15 = vpop.f32.mrb[0].mxu0 }
  0xf0   : > { %v286_v16 = vpop.f32.mrb[1].mxu0  ;;  %v312_v20 = vmul.f32 2.0, %v485_v15 }
  0xf1   : > { %v311_v22 = vmul.f32 2.0, %v286_v16 }
  0xf2   : > { %v314_v24 = vsub.f32 %v312_v20, %v302_v21 }
  0xf3   : > { %v313_v26 = vsub.f32 %v311_v22, %v299_v18 }
 0x123   : > { %v331_v25 = vpop.trf.xlu0 }
 0x124   : > { %v350_v27 = vrot.slane %v331_v25, %v349_v23 }
 0x126   : > { %v351_v28 = vsub.f32 %v313_v26, %v350_v27  ;;  %v352_v29 = vsub.f32 %v314_v24, %v350_v27 }
 0x128   : > { %354 = vst.msk [vmem:[%s201_s22] sm:$0xff] %vm353_vm2, %v351_v28  ;;  %355 = vst.msk [vmem:[%s201_s22 + $0x8] sm:$0xff] %vm353_vm2, %v352_v29 }
 0x129 PF: > { %s12_s11 = sadd.s32 1, %s539_s11   ;;  %s608_s9 = smov %s535_s10 }
 0x12a   : > { %p9_p5 = scmp.ge.s32.totalorder %s12_s11, 4   ;;  %s609_s10 = smov %s611_s12 }
 0x12c   :  { %11 = sbr.rel (!%p9_p5) target bundleno = 2 (0x2), region = 61 }

// kernel: forward.10
= control target key start
LH: loop header
LB: loop body
LE: loop exit
PB: predicated region body
PF: predicated region fallthrough
CT: control target
= control target key end

     0   :  { %vm54_vm0 = vcmask 1042432   ;;  %vm47_vm1 = vcmask 48128   ;;  %vm409_vm9 = vcmask 523264   ;;  %s619_s1 = inlined_call_operand.vmem [shape: bf16[6,64], index: 1, kind: input, shape index: {}]   ;;  %s620_s0 = inlined_call_operand.vmem [shape: bf16[4,32,6], index: 0, kind: input, shape index: {}]   ;;  %s621_s2 = inlined_call_operand.vmem [shape: f32[1,64], index: 2, kind: input, shape index: {}]   ;;  %s622_s3 = inlined_call_operand.vmem [shape: f32[1,64], index: 3, kind: input, shape index: {}]   ;;  %s623_s4 = inlined_call_operand.vmem [shape: f32[32,64], index: 4, kind: output, shape index: {}]  }
   0x1   :  { %v18_v0 = vld [vmem:[%s619_s1] sm:$0x7]  ;;  %v489_v3 = vld [vmem:[%s620_s0 + $0x10] sm:$0xff]   ;;  %v490_v4 = vld [vmem:[%s620_s0 + $0x8] sm:$0xff]  }
   0x2   :  { %484 = vmatprep.subr.msk.bf16.mxu0 %vm54_vm0, %v18_v0  ;;  %485 = vmatprep.subr.msk.bf16.mxu1 %vm54_vm0, %v18_v0  ;;  %v56_v1 = vsel %vm54_vm0, %v18_v0, 0  ;;  %v488_v2 = vld [vmem:[%s620_s0] sm:$0xff]   ;;  %v491_v5 = vld [vmem:[%s620_s0 + $0x18] sm:$0xff]   ;;  %v493_v7 = vld [vmem:[%s620_s0 + $0x30] sm:$0xff]  }
   0x3   :  { %461 = vmatpush3.bf16.msra.mxu0 %v56_v1  ;;  %467 = vmatpush3.bf16.msra.mxu1 %v56_v1  ;;  %v492_v6 = vld [vmem:[%s620_s0 + $0x20] sm:$0xff]   ;;  %v494_v8 = vld [vmem:[%s620_s0 + $0x28] sm:$0xff]   ;;  %v495_v9 = vld [vmem:[%s620_s0 + $0x38] sm:$0xff]  }
   0x4   :  { %462 = vmatprep.mubr.msk.bf16.mxu0 %vm47_vm1, %v488_v2  ;;  %486 = vmatprep.subr.msk.bf16.mxu0 %vm54_vm0, %v18_v0  ;;  %v564_v10 = vld [vmem:[%s621_s2] ss:$0 sm:$0xff] }
   0x5   :  { %468 = vmatprep.mubr.msk.bf16.mxu1 %vm47_vm1, %v489_v3  ;;  %487 = vmatprep.subr.msk.bf16.mxu1 %vm54_vm0, %v18_v0  ;;  %v569_v11 = vld [vmem:[%s622_s3] ss:$0 sm:$0xff] }
   0x6   :  { %463 = vmatmul.mubr.msk.bf16.vlgmr.msra.gmra.mrb[0].mxu0 %vm47_vm1, %v490_v4  ;;  %469 = vmatmul.mubr.msk.bf16.vlgmr.msra.gmra.mrb[0].mxu1 %vm47_vm1, %v491_v5 }
   0x7   :  { %473 = vmatpush3.bf16.msra.mxu0 %v56_v1  ;;  %479 = vmatpush3.bf16.msra.mxu1 %v56_v1 }
   0x8   :  { %474 = vmatprep.mubr.msk.bf16.mxu0 %vm47_vm1, %v492_v6  ;;  %480 = vmatprep.mubr.msk.bf16.mxu1 %vm47_vm1, %v493_v7 }
   0xe   :  { %475 = vmatmul.mubr.msk.bf16.vlgmr.msra.gmra.mrb[4].mxu0 %vm47_vm1, %v494_v8  ;;  %481 = vmatmul.mubr.msk.bf16.vlgmr.msra.gmra.mrb[4].mxu1 %vm47_vm1, %v495_v9 }
  0xd9   :  { %v464_v12 = vpop.f32.mrb[0].mxu0  ;;  %v470_v14 = vpop.f32.mrb[0].mxu1 }
  0xda   :  { %v109_v13 = vmul.f32 %v464_v12, %v564_v10  ;;  %v92_v15 = vpop.f32.mrb[1].mxu0  ;;  %v199_v16 = vmul.f32 %v470_v14, %v564_v10  ;;  %v182_v18 = vpop.f32.mrb[1].mxu1 }
  0xdb   :  { %v107_v17 = vmul.f32 %v564_v10, %v92_v15  ;;  %v465_v19 = vpop.f32.mrb[2].mxu0  ;;  %v197_v21 = vmul.f32 %v564_v10, %v182_v18  ;;  %v471_v23 = vpop.f32.mrb[2].mxu1 }
  0xdc   :  { %v113_v20 = vadd.f32 %v569_v11, %v109_v13  ;;  %v110_v22 = vmul.f32 %v465_v19, %v564_v10  ;;  %v95_v24 = vpop.f32.mrb[3].mxu0  ;;  %v203_v25 = vadd.f32 %v569_v11, %v199_v16  ;;  %v200_v27 = vmul.f32 %v471_v23, %v564_v10  ;;  %v185_v29 = vpop.f32.mrb[3].mxu1 }
  0xdd   :  { %v111_v26 = vadd.f32 %v569_v11, %v107_v17  ;;  %v108_v28 = vmul.f32 %v564_v10, %v95_v24  ;;  %v201_v31 = vadd.f32 %v569_v11, %v197_v21  ;;  %v198_v45 = vmul.f32 %v564_v10, %v185_v29 }
  0xde   :  { %vm117_vm2 = vcmp.gt.f32.partialorder %v113_v20, 0.0  ;;  %v121_v30 = vmul.f32 0.2, %v113_v20  ;;  %v114_v32 = vadd.f32 %v569_v11, %v110_v22  ;;  %vm207_vm3 = vcmp.gt.f32.partialorder %v203_v25, 0.0 }
  0xdf   :  { %v211_v33 = vmul.f32 0.2, %v203_v25  ;;  %vm115_vm4 = vcmp.gt.f32.partialorder %v111_v26, 0.0  ;;  %v119_v34 = vmul.f32 0.2, %v111_v26  ;;  %vm205_vm5 = vcmp.gt.f32.partialorder %v201_v31, 0.0 }
  0xe0   :  { %v125_v35 = vsel %vm117_vm2, %v113_v20, %v121_v30  ;;  %v209_v36 = vmul.f32 0.2, %v201_v31  ;;  %vm118_vm6 = vcmp.gt.f32.partialorder %v114_v32, 0.0  ;;  %v122_v39 = vmul.f32 0.2, %v114_v32 }
  0xe1   :  { %v215_v37 = vsel %vm207_vm3, %v203_v25, %v211_v33  ;;  %v123_v38 = vsel %vm115_vm4, %v111_v26, %v119_v34  ;;  %v204_v40 = vadd.f32 %v569_v11, %v200_v27  ;;  %v476_v41 = vpop.f32.mrb[4].mxu0  ;;  %v112_v44 = vadd.f32 %v569_v11, %v108_v28  ;;  %v482_v46 = vpop.f32.mrb[4].mxu1 }
  0xe2   :  { %v219_v42 = vmax.f32 %v125_v35, %v215_v37  ;;  %v213_v43 = vsel %vm205_vm5, %v201_v31, %v209_v36  ;;  %v276_v47 = vpop.f32.mrb[5].mxu0  ;;  %v126_v49 = vsel %vm118_vm6, %v114_v32, %v122_v39  ;;  %v370_v51 = vpop.f32.mrb[5].mxu1  ;;  %v202_v54 = vadd.f32 %v569_v11, %v198_v45 }
  0xe3   :  { %v217_v48 = vmax.f32 %v123_v38, %v213_v43  ;;  %vm208_vm7 = vcmp.gt.f32.partialorder %v204_v40, 0.0  ;;  %v212_v50 = vmul.f32 0.2, %v204_v40  ;;  %v477_v52 = vpop.f32.mrb[6].mxu0  ;;  %vm116_vm8 = vcmp.gt.f32.partialorder %v112_v44, 0.0  ;;  %v483_v56 = vpop.f32.mrb[6].mxu1 }
  0xe4   :  { %v120_v53 = vmul.f32 0.2, %v112_v44  ;;  %v293_v55 = vmul.f32 %v476_v41, %v564_v10  ;;  %v279_v57 = vpop.f32.mrb[7].mxu0  ;;  %v387_v59 = vmul.f32 %v482_v46, %v564_v10  ;;  %v291_v60 = vmul.f32 %v564_v10, %v276_v47  ;;  %v373_v62 = vpop.f32.mrb[7].mxu1 }
  0xe5   :  { %v216_v58 = vsel %vm208_vm7, %v204_v40, %v212_v50  ;;  %v385_v61 = vmul.f32 %v564_v10, %v370_v51  ;;  %vm206_vm10 = vcmp.gt.f32.partialorder %v202_v54, 0.0  ;;  %v210_v1 = vmul.f32 0.2, %v202_v54 }
  0xe6   :  { %v220_v63 = vmax.f32 %v126_v49, %v216_v58  ;;  %v124_v0 = vsel %vm116_vm8, %v112_v44, %v120_v53  ;;  %v297_v2 = vadd.f32 %v569_v11, %v293_v55  ;;  %v391_v3 = vadd.f32 %v569_v11, %v387_v59 }
  0xe7   :  { %v295_v4 = vadd.f32 %v569_v11, %v291_v60  ;;  %v389_v5 = vadd.f32 %v569_v11, %v385_v61  ;;  %v214_v6 = vsel %vm206_vm10, %v202_v54, %v210_v1  ;;  %v294_v7 = vmul.f32 %v477_v52, %v564_v10 }
  0xe8   :  { %v388_v8 = vmul.f32 %v483_v56, %v564_v10  ;;  %v292_v9 = vmul.f32 %v564_v10, %v279_v57  ;;  %v218_v12 = vmax.f32 %v124_v0, %v214_v6  ;;  %vm301_vm11 = vcmp.gt.f32.partialorder %v297_v2, 0.0 }
  0xe9   :  { %v305_v13 = vmul.f32 0.2, %v297_v2  ;;  %vm395_vm12 = vcmp.gt.f32.partialorder %v391_v3, 0.0  ;;  %v399_v14 = vmul.f32 0.2, %v391_v3  ;;  %vm299_vm13 = vcmp.gt.f32.partialorder %v295_v4, 0.0 }
  0xea   :  { %v303_v15 = vmul.f32 0.2, %v295_v4  ;;  %vm393_vm14 = vcmp.gt.f32.partialorder %v389_v5, 0.0  ;;  %v397_v17 = vmul.f32 0.2, %v389_v5  ;;  %v298_v18 = vadd.f32 %v569_v11, %v294_v7 }
  0xeb   :  { %v309_v16 = vsel %vm301_vm11, %v297_v2, %v305_v13  ;;  %v392_v19 = vadd.f32 %v569_v11, %v388_v8  ;;  %v403_v21 = vsel %vm395_vm12, %v391_v3, %v399_v14  ;;  %v296_v23 = vadd.f32 %v569_v11, %v292_v9 }
  0xec   :  { %v313_v20 = vmax.f32 %v219_v42, %v309_v16  ;;  %v307_v22 = vsel %vm299_vm13, %v295_v4, %v303_v15  ;;  %v401_v25 = vsel %vm393_vm14, %v389_v5, %v397_v17  ;;  %vm302_vm15 = vcmp.gt.f32.partialorder %v298_v18, 0.0 }
  0xed   :  { %v311_v24 = vmax.f32 %v217_v48, %v307_v22  ;;  %v306_v26 = vmul.f32 0.2, %v298_v18  ;;  %vm396_vm0 = vcmp.gt.f32.partialorder %v392_v19, 0.0  ;;  %v400_v28 = vmul.f32 0.2, %v392_v19 }
  0xee   :  { %v407_v27 = vmax.f32 %v313_v20, %v403_v21  ;;  %vm300_vm1 = vcmp.gt.f32.partialorder %v296_v23, 0.0  ;;  %v304_v31 = vmul.f32 0.2, %v296_v23  ;;  %v386_v32 = vmul.f32 %v564_v10, %v373_v62 }
  0xef   :  { %v405_v29 = vmax.f32 %v311_v24, %v401_v25  ;;  %v310_v30 = vsel %vm302_vm15, %v298_v18, %v306_v26  ;;  %v404_v34 = vsel %vm396_vm0, %v392_v19, %v400_v28 }
  0xf0   :  { %412 = vst.msk [vmem:[%s623_s4 + $0x10] sm:$0xff] %vm409_vm9, %v407_v27  ;;  %v314_v33 = vmax.f32 %v220_v63, %v310_v30  ;;  %v308_v35 = vsel %vm300_vm1, %v296_v23, %v304_v31  ;;  %v390_v36 = vadd.f32 %v569_v11, %v386_v32 }
  0xf1   :  { %410 = vst.msk [vmem:[%s623_s4] sm:$0xff] %vm409_vm9, %v405_v29  ;;  %v312_v38 = vmax.f32 %v218_v12, %v308_v35 }
  0xf2   :  { %v408_v37 = vmax.f32 %v314_v33, %v404_v34  ;;  %vm394_vm2 = vcmp.gt.f32.partialorder %v390_v36, 0.0  ;;  %v398_v39 = vmul.f32 0.2, %v390_v36 }
  0xf4   :  { %413 = vst.msk [vmem:[%s623_s4 + $0x18] sm:$0xff] %vm409_vm9, %v408_v37  ;;  %v402_v10 = vsel %vm394_vm2, %v390_v36, %v398_v39 }
  0xf5   :  { %v406_v40 = vmax.f32 %v312_v38, %v402_v10 }
  0xf7   :  { %411 = vst.msk [vmem:[%s623_s4 + $0x8] sm:$0xff] %vm409_vm9, %v406_v40 }

// kernel: forward.15
= control target key start
LH: loop header
LB: loop body
LE: loop exit
PB: predicated region body
PF: predicated region fallthrough
CT: control target
= control target key end

     0   :  { %s533_s9 = smov 0   ;;  %s535_s10 = smov 0   ;;  %s574_s0 = inlined_call_operand.vmem [shape: f32[2,16,128], index: 0, kind: input, shape index: {}, may-alias: {0,1}]   ;;  %s575_s1 = inlined_call_operand.vmem [shape: f32[2,16,128], index: 1, kind: input, shape index: {}, may-alias: {0,1}]   ;;  %s576_s2 = inlined_call_operand.vmem [shape: f32[2,16,16], index: 2, kind: output, shape index: {}]  }
   0x1   :  { %s537_s11 = smov 0  }
   0x2 LB: > { %s24_s12 = sadd.s32 1, %s512_s10  ;;  %p442_p0 = scmp.ge.s32.totalorder %s516_s11, 1  ;;  %s516_s11 = sphi %s537_s11, %s12_s11   ;;  %s512_s10 = sphi %s535_s10, %s578_s10   ;;  %s508_s9 = sphi %s533_s9, %s577_s9  }
   0x3   : > { %p26_p1 = scmp.ge.s32.totalorder %s24_s12, 2  ;;  %p143_p2 = scmp.lt.s32.totalorder %s516_s11, 3 }
   0x5   : > { %s580_s12 = smov (%p26_p1, %s24_s12), 0  ;;  %p144_p3 = pnand %p442_p0, %p143_p2 }
   0x6   : > { %p179_p4 = scmp.lt.s32.totalorder (!%p144_p3), %s508_s9, 1  ;;  %v330_v13 = vlaneseq (!%p144_p3)  ;;  %vm336_vm0 = vcmask (!%p144_p3), 130048  }
   0x7   : > { %147 = sbr.rel (%p144_p3) target bundleno = 296 (0x128), region = 28 }
   0x8   : > { %v331_v15 = vshrl.u32 (!%p144_p3), %v330_v13, 7 }
   0xa   : > { %v332_v19 = vsub.s32 (!%p144_p3), 0, %v331_v15 }
   0xe   : > { %s582_s9 = smov (!%p179_p4, %s508_s9), 1 }
   0xf   : > { %s551_s13 = sshll.u32 %s582_s9, 4 }
  0x10   : > { %s192_s16 = scalar_lea.vmem %s575_s1, %s551_s13  ;;  %s186_s19 = scalar_lea.vmem %s574_s0, %s551_s13 }
  0x11   : > { %v205_v0 = vld [vmem:[%s192_s16] sm:$0xff]  ;;  %v206_v1 = vld [vmem:[%s192_s16 + $0x8] sm:$0xff]  ;;  %s201_s22 = scalar_lea.vmem %s576_s2, %s551_s13 }
  0x12   : > { %v288_v2 = vmul.f32 %v205_v0, %v205_v0  ;;  %v465_v3 = vpack.c.bf16 %v206_v1, %v205_v0  ;;  %v203_v4 = vld [vmem:[%s186_s19] sm:$0xff]  ;;  %v289_v6 = vmul.f32 %v206_v1, %v206_v1  ;;  %v204_v7 = vld [vmem:[%s186_s19 + $0x8] sm:$0xff] }
  0x13   : > { %462 = vmatprep.mubr.f32.mxu0 %v203_v4  ;;  %v282_v5 = vmul.f32 %v203_v4, %v203_v4  ;;  %v283_v8 = vmul.f32 %v204_v7, %v204_v7 }
  0x14   : > { %290 = vadd.xlane.f32.xlu0 %v288_v2  ;;  %466 = vmatprep.subr.bf16.mxu0 %v465_v3 }
  0x15   : > { %468 = vmatpush3.bf16.xpose.msra.mxu0 %v465_v3  ;;  %284 = vadd.xlane.f32.xlu1 %v282_v5 }
  0x18   : > { %292 = vadd.xlane.f32.xlu0 %v289_v6 }
  0x19   : > { %286 = vadd.xlane.f32.xlu1 %v283_v8 }
  0x1c   : > { %463 = vmatmul.mubr.f32.vlgmr.msra.gmra.mrb[0].mxu0 %v204_v7 }
  0xa1   : > { %v291_v9 = vpop.xlane.xlu0 %290 }
  0xa2   : > { %298 = vxpose.xlu0.b32.start [1/2] (short) (narrow) %v291_v9, 8  ;;  %v285_v14 = vpop.xlane.xlu1 %284 }
  0xa5   : > { %v293_v10 = vpop.xlane.xlu0 %292 }
  0xa6   : > { %299 = vxpose.xlu0.b32.end [2/2] (short) (narrow) %v293_v10, 8  ;;  %v287_v17 = vpop.xlane.xlu1 %286 }
  0xef   : > { %v464_v11 = vpop.f32.mrb[0].mxu0 }
  0xf0   : > { %v273_v12 = vpop.f32.mrb[1].mxu0  ;;  %v295_v16 = vmul.f32 2.0, %v464_v11 }
  0xf1   : > { %v294_v18 = vmul.f32 2.0, %v273_v12 }
  0xf2   : > { %v297_v20 = vsub.f32 %v295_v16, %v287_v17 }
  0xf3   : > { %v296_v22 = vsub.f32 %v294_v18, %v285_v14 }
 0x122   : > { %v314_v21 = vpop.trf.xlu0 }
 0x123   : > { %v333_v23 = vrot.slane %v314_v21, %v332_v19 }
 0x125   : > { %v334_v24 = vsub.f32 %v296_v22, %v333_v23  ;;  %v335_v25 = vsub.f32 %v297_v20, %v333_v23 }
 0x127   : > { %337 = vst.msk [vmem:[%s201_s22] sm:$0xff] %vm336_vm0, %v334_v24  ;;  %338 = vst.msk [vmem:[%s201_s22 + $0x8] sm:$0xff] %vm336_vm0, %v335_v25 }
 0x128 PF: > { %s12_s11 = sadd.s32 1, %s516_s11   ;;  %s577_s9 = smov %s512_s10 }
 0x129   : > { %p9_p5 = scmp.ge.s32.totalorder %s12_s11, 4   ;;  %s578_s10 = smov %s580_s12 }
 0x12b   :  { %11 = sbr.rel (!%p9_p5) target bundleno = 2 (0x2), region = 61 }

// kernel: forward.12
= control target key start
LH: loop header
LB: loop body
LE: loop exit
PB: predicated region body
PF: predicated region fallthrough
CT: control target
= control target key end

     0   :  { %vm451_vm8 = vcmask 523264   ;;  %s757_s1 = inlined_call_operand.vmem [shape: bf16[128,64], index: 1, kind: input, shape index: {}]   ;;  %s758_s0 = inlined_call_operand.vmem [shape: bf16[4,32,128], index: 0, kind: input, shape index: {}]   ;;  %s759_s2 = inlined_call_operand.vmem [shape: f32[1,64], index: 2, kind: input, shape index: {}]   ;;  %s760_s3 = inlined_call_operand.vmem [shape: f32[1,64], index: 3, kind: input, shape index: {}]   ;;  %s761_s4 = inlined_call_operand.vmem [shape: f32[32,64], index: 4, kind: output, shape index: {}]  }
   0x1   :  { %v610_v0 = vld [vmem:[%s757_s1] sm:$0xff]   ;;  %v611_v1 = vld [vmem:[%s757_s1 + $0x8] sm:$0xff]   ;;  %v612_v2 = vld [vmem:[%s757_s1 + $0x10] sm:$0xff]  }
   0x2   :  { %530 = vmatprep.subr.bf16.mxu0 %v610_v0  ;;  %550 = vmatprep.subr.bf16.mxu1 %v610_v0  ;;  %v613_v3 = vld [vmem:[%s757_s1 + $0x18] sm:$0xff]   ;;  %v618_v4 = vld [vmem:[%s758_s0] sm:$0xff]   ;;  %v619_v5 = vld [vmem:[%s758_s0 + $0x10] sm:$0xff]  }
   0x3   :  { %531 = vmatpush3.bf16.msra.mxu0 %v610_v0  ;;  %551 = vmatpush3.bf16.msra.mxu1 %v610_v0  ;;  %v614_v6 = vld [vmem:[%s757_s1 + $0x20] sm:$0xff]   ;;  %v615_v7 = vld [vmem:[%s757_s1 + $0x28] sm:$0xff]   ;;  %v616_v8 = vld [vmem:[%s757_s1 + $0x30] sm:$0xff]  }
   0x4   :  { %532 = vmatprep.subr.bf16.mxu0 %v611_v1  ;;  %552 = vmatprep.subr.bf16.mxu1 %v611_v1  ;;  %v617_v9 = vld [vmem:[%s757_s1 + $0x38] sm:$0xff]   ;;  %v620_v10 = vld [vmem:[%s758_s0 + $0x8] sm:$0xff]   ;;  %v622_v12 = vld [vmem:[%s758_s0 + $0x20] sm:$0xff]  }
   0x5   :  { %546 = vmatprep.mubr.bf16.mxu0 %v618_v4  ;;  %566 = vmatprep.mubr.bf16.mxu1 %v619_v5  ;;  %v621_v11 = vld [vmem:[%s758_s0 + $0x18] sm:$0xff]   ;;  %v623_v13 = vld [vmem:[%s758_s0 + $0x30] sm:$0xff]   ;;  %v624_v14 = vld [vmem:[%s758_s0 + $0x28] sm:$0xff]  }
   0x6   :  { %v625_v15 = vld [vmem:[%s758_s0 + $0x38] sm:$0xff]   ;;  %v702_v16 = vld [vmem:[%s759_s2] ss:$0 sm:$0xff] }
   0x7   :  { %533 = vmatpush3.bf16.msra.mxu0 %v611_v1  ;;  %553 = vmatpush3.bf16.msra.mxu1 %v611_v1  ;;  %v707_v17 = vld [vmem:[%s760_s3] ss:$0 sm:$0xff] }
   0x8   :  { %534 = vmatprep.subr.bf16.mxu0 %v612_v2  ;;  %554 = vmatprep.subr.bf16.mxu1 %v612_v2 }
   0xb   :  { %535 = vmatpush3.bf16.msra.mxu0 %v612_v2  ;;  %555 = vmatpush3.bf16.msra.mxu1 %v612_v2 }
   0xc   :  { %536 = vmatprep.subr.bf16.mxu0 %v613_v3  ;;  %556 = vmatprep.subr.bf16.mxu1 %v613_v3 }
   0xf   :  { %537 = vmatpush3.bf16.msra.mxu0 %v613_v3  ;;  %557 = vmatpush3.bf16.msra.mxu1 %v613_v3 }
  0x10   :  { %538 = vmatprep.subr.bf16.mxu0 %v614_v6  ;;  %558 = vmatprep.subr.bf16.mxu1 %v614_v6 }
  0x13   :  { %539 = vmatpush3.bf16.msra.mxu0 %v614_v6  ;;  %559 = vmatpush3.bf16.msra.mxu1 %v614_v6 }
  0x14   :  { %540 = vmatprep.subr.bf16.mxu0 %v615_v7  ;;  %560 = vmatprep.subr.bf16.mxu1 %v615_v7 }
  0x17   :  { %541 = vmatpush3.bf16.msra.mxu0 %v615_v7  ;;  %561 = vmatpush3.bf16.msra.mxu1 %v615_v7 }
  0x18   :  { %542 = vmatprep.subr.bf16.mxu0 %v616_v8  ;;  %562 = vmatprep.subr.bf16.mxu1 %v616_v8 }
  0x1b   :  { %543 = vmatpush3.bf16.msra.mxu0 %v616_v8  ;;  %563 = vmatpush3.bf16.msra.mxu1 %v616_v8 }
  0x1c   :  { %544 = vmatprep.subr.bf16.mxu0 %v617_v9  ;;  %564 = vmatprep.subr.bf16.mxu1 %v617_v9 }
  0x1f   :  { %545 = vmatpush3.bf16.msra.mxu0 %v617_v9  ;;  %565 = vmatpush3.bf16.msra.mxu1 %v617_v9 }
  0x20   :  { %570 = vmatprep.subr.bf16.mxu0 %v610_v0  ;;  %590 = vmatprep.subr.bf16.mxu1 %v610_v0 }
  0x22   :  { %547 = vmatmul.mubr.bf16.vlgmr.msra.gmra.mrb[0].mxu0 %v620_v10  ;;  %567 = vmatmul.mubr.bf16.vlgmr.msra.gmra.mrb[0].mxu1 %v621_v11 }
  0x23   :  { %571 = vmatpush3.bf16.msra.mxu0 %v610_v0  ;;  %591 = vmatpush3.bf16.msra.mxu1 %v610_v0 }
  0x24   :  { %572 = vmatprep.subr.bf16.mxu0 %v611_v1  ;;  %592 = vmatprep.subr.bf16.mxu1 %v611_v1 }
  0x25   :  { %586 = vmatprep.mubr.bf16.mxu0 %v622_v12  ;;  %606 = vmatprep.mubr.bf16.mxu1 %v623_v13 }
  0x27   :  { %573 = vmatpush3.bf16.msra.mxu0 %v611_v1  ;;  %593 = vmatpush3.bf16.msra.mxu1 %v611_v1 }
  0x28   :  { %574 = vmatprep.subr.bf16.mxu0 %v612_v2  ;;  %594 = vmatprep.subr.bf16.mxu1 %v612_v2 }
  0x2b   :  { %575 = vmatpush3.bf16.msra.mxu0 %v612_v2  ;;  %595 = vmatpush3.bf16.msra.mxu1 %v612_v2 }
  0x2c   :  { %576 = vmatprep.subr.bf16.mxu0 %v613_v3  ;;  %596 = vmatprep.subr.bf16.mxu1 %v613_v3 }
  0x2f   :  { %577 = vmatpush3.bf16.msra.mxu0 %v613_v3  ;;  %597 = vmatpush3.bf16.msra.mxu1 %v613_v3 }
  0x30   :  { %578 = vmatprep.subr.bf16.mxu0 %v614_v6  ;;  %598 = vmatprep.subr.bf16.mxu1 %v614_v6 }
  0x33   :  { %579 = vmatpush3.bf16.msra.mxu0 %v614_v6  ;;  %599 = vmatpush3.bf16.msra.mxu1 %v614_v6 }
  0x34   :  { %580 = vmatprep.subr.bf16.mxu0 %v615_v7  ;;  %600 = vmatprep.subr.bf16.mxu1 %v615_v7 }
  0x37   :  { %581 = vmatpush3.bf16.msra.mxu0 %v615_v7  ;;  %601 = vmatpush3.bf16.msra.mxu1 %v615_v7 }
  0x38   :  { %582 = vmatprep.subr.bf16.mxu0 %v616_v8  ;;  %602 = vmatprep.subr.bf16.mxu1 %v616_v8 }
  0x3b   :  { %583 = vmatpush3.bf16.msra.mxu0 %v616_v8  ;;  %603 = vmatpush3.bf16.msra.mxu1 %v616_v8 }
  0x3c   :  { %584 = vmatprep.subr.bf16.mxu0 %v617_v9  ;;  %604 = vmatprep.subr.bf16.mxu1 %v617_v9 }
  0x3f   :  { %585 = vmatpush3.bf16.msra.mxu0 %v617_v9  ;;  %605 = vmatpush3.bf16.msra.mxu1 %v617_v9 }
  0x42   :  { %587 = vmatmul.mubr.bf16.vlgmr.msra.gmra.mrb[4].mxu0 %v624_v14  ;;  %607 = vmatmul.mubr.bf16.vlgmr.msra.gmra.mrb[4].mxu1 %v625_v15 }
  0xf5   :  { %v548_v18 = vpop.f32.mrb[0].mxu0  ;;  %v568_v19 = vpop.f32.mrb[0].mxu1 }
  0xf6   :  { %v163_v20 = vmul.f32 %v548_v18, %v702_v16  ;;  %v249_v21 = vmul.f32 %v568_v19, %v702_v16  ;;  %v146_v22 = vpop.f32.mrb[1].mxu0  ;;  %v232_v23 = vpop.f32.mrb[1].mxu1 }
  0xf7   :  { %v161_v24 = vmul.f32 %v702_v16, %v146_v22  ;;  %v247_v25 = vmul.f32 %v702_v16, %v232_v23  ;;  %v549_v26 = vpop.f32.mrb[2].mxu0  ;;  %v569_v27 = vpop.f32.mrb[2].mxu1 }
  0xf8   :  { %v167_v28 = vadd.f32 %v707_v17, %v163_v20  ;;  %v253_v29 = vadd.f32 %v707_v17, %v249_v21  ;;  %v164_v30 = vmul.f32 %v549_v26, %v702_v16  ;;  %v250_v31 = vmul.f32 %v569_v27, %v702_v16  ;;  %v149_v32 = vpop.f32.mrb[3].mxu0  ;;  %v235_v33 = vpop.f32.mrb[3].mxu1 }
  0xf9   :  { %v165_v34 = vadd.f32 %v707_v17, %v161_v24  ;;  %v251_v35 = vadd.f32 %v707_v17, %v247_v25  ;;  %v162_v36 = vmul.f32 %v702_v16, %v149_v32  ;;  %v248_v37 = vmul.f32 %v702_v16, %v235_v33 }
  0xfa   :  { %vm171_vm0 = vcmp.gt.f32.partialorder %v167_v28, 0.0  ;;  %v175_v38 = vmul.f32 0.2, %v167_v28  ;;  %vm257_vm1 = vcmp.gt.f32.partialorder %v253_v29, 0.0  ;;  %v261_v39 = vmul.f32 0.2, %v253_v29 }
  0xfb   :  { %vm169_vm2 = vcmp.gt.f32.partialorder %v165_v34, 0.0  ;;  %v173_v40 = vmul.f32 0.2, %v165_v34  ;;  %vm255_vm3 = vcmp.gt.f32.partialorder %v251_v35, 0.0  ;;  %v259_v41 = vmul.f32 0.2, %v251_v35 }
  0xfc   :  { %v179_v42 = vsel %vm171_vm0, %v167_v28, %v175_v38  ;;  %v265_v43 = vsel %vm257_vm1, %v253_v29, %v261_v39  ;;  %v168_v44 = vadd.f32 %v707_v17, %v164_v30  ;;  %v254_v45 = vadd.f32 %v707_v17, %v250_v31 }
  0xfd   :  { %v269_v46 = vmax.f32 %v179_v42, %v265_v43  ;;  %v177_v47 = vsel %vm169_vm2, %v165_v34, %v173_v40  ;;  %v263_v48 = vsel %vm255_vm3, %v251_v35, %v259_v41  ;;  %v166_v49 = vadd.f32 %v707_v17, %v162_v36 }
  0xfe   :  { %v267_v50 = vmax.f32 %v177_v47, %v263_v48  ;;  %vm172_vm4 = vcmp.gt.f32.partialorder %v168_v44, 0.0  ;;  %v176_v51 = vmul.f32 0.2, %v168_v44  ;;  %vm258_vm5 = vcmp.gt.f32.partialorder %v254_v45, 0.0 }
  0xff   :  { %v262_v52 = vmul.f32 0.2, %v254_v45  ;;  %vm170_vm6 = vcmp.gt.f32.partialorder %v166_v49, 0.0  ;;  %v174_v53 = vmul.f32 0.2, %v166_v49  ;;  %v252_v54 = vadd.f32 %v707_v17, %v248_v37 }
 0x100   :  { %v180_v55 = vsel %vm172_vm4, %v168_v44, %v176_v51 }
 0x101   :  { %v266_v56 = vsel %vm258_vm5, %v254_v45, %v262_v52  ;;  %v178_v57 = vsel %vm170_vm6, %v166_v49, %v174_v53  ;;  %vm256_vm7 = vcmp.gt.f32.partialorder %v252_v54, 0.0  ;;  %v260_v58 = vmul.f32 0.2, %v252_v54 }
 0x102   :  { %v270_v59 = vmax.f32 %v180_v55, %v266_v56 }
 0x103   :  { %v264_v60 = vsel %vm256_vm7, %v252_v54, %v260_v58 }
 0x104   :  { %v268_v61 = vmax.f32 %v178_v57, %v264_v60 }
 0x115   :  { %v588_v62 = vpop.f32.mrb[4].mxu0  ;;  %v608_v63 = vpop.f32.mrb[4].mxu1 }
 0x116   :  { %v339_v0 = vmul.f32 %v588_v62, %v702_v16  ;;  %v429_v1 = vmul.f32 %v608_v63, %v702_v16  ;;  %v322_v2 = vpop.f32.mrb[5].mxu0  ;;  %v412_v3 = vpop.f32.mrb[5].mxu1 }
 0x117   :  { %v337_v4 = vmul.f32 %v702_v16, %v322_v2  ;;  %v427_v5 = vmul.f32 %v702_v16, %v412_v3  ;;  %v589_v6 = vpop.f32.mrb[6].mxu0  ;;  %v609_v7 = vpop.f32.mrb[6].mxu1 }
 0x118   :  { %v343_v8 = vadd.f32 %v707_v17, %v339_v0  ;;  %v433_v9 = vadd.f32 %v707_v17, %v429_v1  ;;  %v340_v10 = vmul.f32 %v589_v6, %v702_v16  ;;  %v430_v11 = vmul.f32 %v609_v7, %v702_v16  ;;  %v325_v12 = vpop.f32.mrb[7].mxu0  ;;  %v415_v13 = vpop.f32.mrb[7].mxu1 }
 0x119   :  { %v341_v14 = vadd.f32 %v707_v17, %v337_v4  ;;  %v431_v15 = vadd.f32 %v707_v17, %v427_v5  ;;  %v338_v18 = vmul.f32 %v702_v16, %v325_v12  ;;  %v428_v19 = vmul.f32 %v702_v16, %v415_v13 }
 0x11a   :  { %vm347_vm9 = vcmp.gt.f32.partialorder %v343_v8, 0.0  ;;  %v351_v20 = vmul.f32 0.2, %v343_v8  ;;  %vm437_vm10 = vcmp.gt.f32.partialorder %v433_v9, 0.0  ;;  %v441_v21 = vmul.f32 0.2, %v433_v9 }
 0x11b   :  { %vm345_vm11 = vcmp.gt.f32.partialorder %v341_v14, 0.0  ;;  %v349_v22 = vmul.f32 0.2, %v341_v14  ;;  %vm435_vm12 = vcmp.gt.f32.partialorder %v431_v15, 0.0  ;;  %v439_v23 = vmul.f32 0.2, %v431_v15 }
 0x11c   :  { %v355_v24 = vsel %vm347_vm9, %v343_v8, %v351_v20  ;;  %v445_v25 = vsel %vm437_vm10, %v433_v9, %v441_v21  ;;  %v344_v26 = vadd.f32 %v707_v17, %v340_v10  ;;  %v434_v27 = vadd.f32 %v707_v17, %v430_v11 }
 0x11d   :  { %v359_v28 = vmax.f32 %v269_v46, %v355_v24  ;;  %v353_v29 = vsel %vm345_vm11, %v341_v14, %v349_v22  ;;  %v443_v30 = vsel %vm435_vm12, %v431_v15, %v439_v23  ;;  %v342_v31 = vadd.f32 %v707_v17, %v338_v18 }
 0x11e   :  { %v357_v16 = vmax.f32 %v267_v50, %v353_v29  ;;  %vm348_vm13 = vcmp.gt.f32.partialorder %v344_v26, 0.0  ;;  %v352_v32 = vmul.f32 0.2, %v344_v26  ;;  %vm438_vm14 = vcmp.gt.f32.partialorder %v434_v27, 0.0 }
 0x11f   :  { %v449_v33 = vmax.f32 %v359_v28, %v445_v25  ;;  %v442_v34 = vmul.f32 0.2, %v434_v27  ;;  %vm346_vm15 = vcmp.gt.f32.partialorder %v342_v31, 0.0  ;;  %v350_v35 = vmul.f32 0.2, %v342_v31 }
 0x120   :  { %v447_v36 = vmax.f32 %v357_v16, %v443_v30  ;;  %v356_v37 = vsel %vm348_vm13, %v344_v26, %v352_v32  ;;  %v432_v38 = vadd.f32 %v707_v17, %v428_v19 }
 0x121   :  { %454 = vst.msk [vmem:[%s761_s4 + $0x10] sm:$0xff] %vm451_vm8, %v449_v33  ;;  %v360_v39 = vmax.f32 %v270_v59, %v356_v37  ;;  %v354_v40 = vsel %vm346_vm15, %v342_v31, %v350_v35  ;;  %v446_v41 = vsel %vm438_vm14, %v434_v27, %v442_v34 }
 0x122   :  { %452 = vst.msk [vmem:[%s761_s4] sm:$0xff] %vm451_vm8, %v447_v36  ;;  %v358_v42 = vmax.f32 %v268_v61, %v354_v40  ;;  %vm436_vm0 = vcmp.gt.f32.partialorder %v432_v38, 0.0  ;;  %v440_v43 = vmul.f32 0.2, %v432_v38 }
 0x123   :  { %v450_v44 = vmax.f32 %v360_v39, %v446_v41 }
 0x124   :  { %v444_v45 = vsel %vm436_vm0, %v432_v38, %v440_v43 }
 0x125   :  { %455 = vst.msk [vmem:[%s761_s4 + $0x18] sm:$0xff] %vm451_vm8, %v450_v44  ;;  %v448_v17 = vmax.f32 %v358_v42, %v444_v45 }
 0x127   :  { %453 = vst.msk [vmem:[%s761_s4 + $0x8] sm:$0xff] %vm451_vm8, %v448_v17 }

// kernel: forward.14
= control target key start
LH: loop header
LB: loop body
LE: loop exit
PB: predicated region body
PF: predicated region fallthrough
CT: control target
= control target key end

     0   :  { %s752_s1 = inlined_call_operand.vmem [shape: bf16[128,128], index: 1, kind: input, shape index: {}]   ;;  %s753_s0 = inlined_call_operand.vmem [shape: bf16[4,32,128], index: 0, kind: input, shape index: {}]   ;;  %s754_s2 = inlined_call_operand.vmem [shape: f32[1,128], index: 2, kind: input, shape index: {}]   ;;  %s755_s3 = inlined_call_operand.vmem [shape: f32[1,128], index: 3, kind: input, shape index: {}]   ;;  %s756_s4 = inlined_call_operand.vmem [shape: f32[32,128], index: 4, kind: output, shape index: {}]  }
   0x1   :  { %v609_v0 = vld [vmem:[%s752_s1] sm:$0xff]   ;;  %v610_v1 = vld [vmem:[%s752_s1 + $0x8] sm:$0xff]   ;;  %v611_v2 = vld [vmem:[%s752_s1 + $0x10] sm:$0xff]  }
   0x2   :  { %529 = vmatprep.subr.bf16.mxu0 %v609_v0  ;;  %549 = vmatprep.subr.bf16.mxu1 %v609_v0  ;;  %v612_v3 = vld [vmem:[%s752_s1 + $0x18] sm:$0xff]   ;;  %v617_v4 = vld [vmem:[%s753_s0] sm:$0xff]   ;;  %v618_v5 = vld [vmem:[%s753_s0 + $0x10] sm:$0xff]  }
   0x3   :  { %530 = vmatpush3.bf16.msra.mxu0 %v609_v0  ;;  %550 = vmatpush3.bf16.msra.mxu1 %v609_v0  ;;  %v613_v6 = vld [vmem:[%s752_s1 + $0x20] sm:$0xff]   ;;  %v614_v7 = vld [vmem:[%s752_s1 + $0x28] sm:$0xff]   ;;  %v615_v8 = vld [vmem:[%s752_s1 + $0x30] sm:$0xff]  }
   0x4   :  { %531 = vmatprep.subr.bf16.mxu0 %v610_v1  ;;  %551 = vmatprep.subr.bf16.mxu1 %v610_v1  ;;  %v616_v9 = vld [vmem:[%s752_s1 + $0x38] sm:$0xff]   ;;  %v619_v10 = vld [vmem:[%s753_s0 + $0x8] sm:$0xff]   ;;  %v621_v12 = vld [vmem:[%s753_s0 + $0x20] sm:$0xff]  }
   0x5   :  { %545 = vmatprep.mubr.bf16.mxu0 %v617_v4  ;;  %565 = vmatprep.mubr.bf16.mxu1 %v618_v5  ;;  %v620_v11 = vld [vmem:[%s753_s0 + $0x18] sm:$0xff]   ;;  %v622_v13 = vld [vmem:[%s753_s0 + $0x30] sm:$0xff]   ;;  %v623_v14 = vld [vmem:[%s753_s0 + $0x28] sm:$0xff]  }
   0x6   :  { %v624_v15 = vld [vmem:[%s753_s0 + $0x38] sm:$0xff]   ;;  %v701_v16 = vld [vmem:[%s754_s2] ss:$0 sm:$0xff] }
   0x7   :  { %532 = vmatpush3.bf16.msra.mxu0 %v610_v1  ;;  %552 = vmatpush3.bf16.msra.mxu1 %v610_v1  ;;  %v706_v17 = vld [vmem:[%s755_s3] ss:$0 sm:$0xff] }
   0x8   :  { %533 = vmatprep.subr.bf16.mxu0 %v611_v2  ;;  %553 = vmatprep.subr.bf16.mxu1 %v611_v2 }
   0xb   :  { %534 = vmatpush3.bf16.msra.mxu0 %v611_v2  ;;  %554 = vmatpush3.bf16.msra.mxu1 %v611_v2 }
   0xc   :  { %535 = vmatprep.subr.bf16.mxu0 %v612_v3  ;;  %555 = vmatprep.subr.bf16.mxu1 %v612_v3 }
   0xf   :  { %536 = vmatpush3.bf16.msra.mxu0 %v612_v3  ;;  %556 = vmatpush3.bf16.msra.mxu1 %v612_v3 }
  0x10   :  { %537 = vmatprep.subr.bf16.mxu0 %v613_v6  ;;  %557 = vmatprep.subr.bf16.mxu1 %v613_v6 }
  0x13   :  { %538 = vmatpush3.bf16.msra.mxu0 %v613_v6  ;;  %558 = vmatpush3.bf16.msra.mxu1 %v613_v6 }
  0x14   :  { %539 = vmatprep.subr.bf16.mxu0 %v614_v7  ;;  %559 = vmatprep.subr.bf16.mxu1 %v614_v7 }
  0x17   :  { %540 = vmatpush3.bf16.msra.mxu0 %v614_v7  ;;  %560 = vmatpush3.bf16.msra.mxu1 %v614_v7 }
  0x18   :  { %541 = vmatprep.subr.bf16.mxu0 %v615_v8  ;;  %561 = vmatprep.subr.bf16.mxu1 %v615_v8 }
  0x1b   :  { %542 = vmatpush3.bf16.msra.mxu0 %v615_v8  ;;  %562 = vmatpush3.bf16.msra.mxu1 %v615_v8 }
  0x1c   :  { %543 = vmatprep.subr.bf16.mxu0 %v616_v9  ;;  %563 = vmatprep.subr.bf16.mxu1 %v616_v9 }
  0x1f   :  { %544 = vmatpush3.bf16.msra.mxu0 %v616_v9  ;;  %564 = vmatpush3.bf16.msra.mxu1 %v616_v9 }
  0x20   :  { %569 = vmatprep.subr.bf16.mxu0 %v609_v0  ;;  %589 = vmatprep.subr.bf16.mxu1 %v609_v0 }
  0x22   :  { %546 = vmatmul.mubr.bf16.vlgmr.msra.gmra.mrb[0].mxu0 %v619_v10  ;;  %566 = vmatmul.mubr.bf16.vlgmr.msra.gmra.mrb[0].mxu1 %v620_v11 }
  0x23   :  { %570 = vmatpush3.bf16.msra.mxu0 %v609_v0  ;;  %590 = vmatpush3.bf16.msra.mxu1 %v609_v0 }
  0x24   :  { %571 = vmatprep.subr.bf16.mxu0 %v610_v1  ;;  %591 = vmatprep.subr.bf16.mxu1 %v610_v1 }
  0x25   :  { %585 = vmatprep.mubr.bf16.mxu0 %v621_v12  ;;  %605 = vmatprep.mubr.bf16.mxu1 %v622_v13 }
  0x27   :  { %572 = vmatpush3.bf16.msra.mxu0 %v610_v1  ;;  %592 = vmatpush3.bf16.msra.mxu1 %v610_v1 }
  0x28   :  { %573 = vmatprep.subr.bf16.mxu0 %v611_v2  ;;  %593 = vmatprep.subr.bf16.mxu1 %v611_v2 }
  0x2b   :  { %574 = vmatpush3.bf16.msra.mxu0 %v611_v2  ;;  %594 = vmatpush3.bf16.msra.mxu1 %v611_v2 }
  0x2c   :  { %575 = vmatprep.subr.bf16.mxu0 %v612_v3  ;;  %595 = vmatprep.subr.bf16.mxu1 %v612_v3 }
  0x2f   :  { %576 = vmatpush3.bf16.msra.mxu0 %v612_v3  ;;  %596 = vmatpush3.bf16.msra.mxu1 %v612_v3 }
  0x30   :  { %577 = vmatprep.subr.bf16.mxu0 %v613_v6  ;;  %597 = vmatprep.subr.bf16.mxu1 %v613_v6 }
  0x33   :  { %578 = vmatpush3.bf16.msra.mxu0 %v613_v6  ;;  %598 = vmatpush3.bf16.msra.mxu1 %v613_v6 }
  0x34   :  { %579 = vmatprep.subr.bf16.mxu0 %v614_v7  ;;  %599 = vmatprep.subr.bf16.mxu1 %v614_v7 }
  0x37   :  { %580 = vmatpush3.bf16.msra.mxu0 %v614_v7  ;;  %600 = vmatpush3.bf16.msra.mxu1 %v614_v7 }
  0x38   :  { %581 = vmatprep.subr.bf16.mxu0 %v615_v8  ;;  %601 = vmatprep.subr.bf16.mxu1 %v615_v8 }
  0x3b   :  { %582 = vmatpush3.bf16.msra.mxu0 %v615_v8  ;;  %602 = vmatpush3.bf16.msra.mxu1 %v615_v8 }
  0x3c   :  { %583 = vmatprep.subr.bf16.mxu0 %v616_v9  ;;  %603 = vmatprep.subr.bf16.mxu1 %v616_v9 }
  0x3f   :  { %584 = vmatpush3.bf16.msra.mxu0 %v616_v9  ;;  %604 = vmatpush3.bf16.msra.mxu1 %v616_v9 }
  0x42   :  { %586 = vmatmul.mubr.bf16.vlgmr.msra.gmra.mrb[4].mxu0 %v623_v14  ;;  %606 = vmatmul.mubr.bf16.vlgmr.msra.gmra.mrb[4].mxu1 %v624_v15 }
  0xf5   :  { %v547_v18 = vpop.f32.mrb[0].mxu0  ;;  %v567_v19 = vpop.f32.mrb[0].mxu1 }
  0xf6   :  { %v163_v20 = vmul.f32 %v547_v18, %v701_v16  ;;  %v249_v21 = vmul.f32 %v567_v19, %v701_v16  ;;  %v146_v22 = vpop.f32.mrb[1].mxu0  ;;  %v232_v23 = vpop.f32.mrb[1].mxu1 }
  0xf7   :  { %v161_v24 = vmul.f32 %v701_v16, %v146_v22  ;;  %v247_v25 = vmul.f32 %v701_v16, %v232_v23  ;;  %v548_v26 = vpop.f32.mrb[2].mxu0  ;;  %v568_v27 = vpop.f32.mrb[2].mxu1 }
  0xf8   :  { %v167_v28 = vadd.f32 %v706_v17, %v163_v20  ;;  %v253_v29 = vadd.f32 %v706_v17, %v249_v21  ;;  %v164_v30 = vmul.f32 %v548_v26, %v701_v16  ;;  %v250_v31 = vmul.f32 %v568_v27, %v701_v16  ;;  %v149_v32 = vpop.f32.mrb[3].mxu0  ;;  %v235_v33 = vpop.f32.mrb[3].mxu1 }
  0xf9   :  { %v165_v34 = vadd.f32 %v706_v17, %v161_v24  ;;  %v251_v35 = vadd.f32 %v706_v17, %v247_v25  ;;  %v162_v36 = vmul.f32 %v701_v16, %v149_v32  ;;  %v248_v37 = vmul.f32 %v701_v16, %v235_v33 }
  0xfa   :  { %vm171_vm0 = vcmp.gt.f32.partialorder %v167_v28, 0.0  ;;  %v175_v38 = vmul.f32 0.2, %v167_v28  ;;  %vm257_vm1 = vcmp.gt.f32.partialorder %v253_v29, 0.0  ;;  %v261_v39 = vmul.f32 0.2, %v253_v29 }
  0xfb   :  { %vm169_vm2 = vcmp.gt.f32.partialorder %v165_v34, 0.0  ;;  %v173_v40 = vmul.f32 0.2, %v165_v34  ;;  %vm255_vm3 = vcmp.gt.f32.partialorder %v251_v35, 0.0  ;;  %v259_v41 = vmul.f32 0.2, %v251_v35 }
  0xfc   :  { %v179_v42 = vsel %vm171_vm0, %v167_v28, %v175_v38  ;;  %v265_v43 = vsel %vm257_vm1, %v253_v29, %v261_v39  ;;  %v168_v44 = vadd.f32 %v706_v17, %v164_v30  ;;  %v254_v45 = vadd.f32 %v706_v17, %v250_v31 }
  0xfd   :  { %v269_v46 = vmax.f32 %v179_v42, %v265_v43  ;;  %v177_v47 = vsel %vm169_vm2, %v165_v34, %v173_v40  ;;  %v263_v48 = vsel %vm255_vm3, %v251_v35, %v259_v41  ;;  %v166_v49 = vadd.f32 %v706_v17, %v162_v36 }
  0xfe   :  { %v267_v50 = vmax.f32 %v177_v47, %v263_v48  ;;  %vm172_vm4 = vcmp.gt.f32.partialorder %v168_v44, 0.0  ;;  %v176_v51 = vmul.f32 0.2, %v168_v44  ;;  %vm258_vm5 = vcmp.gt.f32.partialorder %v254_v45, 0.0 }
  0xff   :  { %v262_v52 = vmul.f32 0.2, %v254_v45  ;;  %vm170_vm6 = vcmp.gt.f32.partialorder %v166_v49, 0.0  ;;  %v174_v53 = vmul.f32 0.2, %v166_v49  ;;  %v252_v54 = vadd.f32 %v706_v17, %v248_v37 }
 0x100   :  { %v180_v55 = vsel %vm172_vm4, %v168_v44, %v176_v51 }
 0x101   :  { %v266_v56 = vsel %vm258_vm5, %v254_v45, %v262_v52  ;;  %v178_v57 = vsel %vm170_vm6, %v166_v49, %v174_v53  ;;  %vm256_vm7 = vcmp.gt.f32.partialorder %v252_v54, 0.0  ;;  %v260_v58 = vmul.f32 0.2, %v252_v54 }
 0x102   :  { %v270_v59 = vmax.f32 %v180_v55, %v266_v56 }
 0x103   :  { %v264_v60 = vsel %vm256_vm7, %v252_v54, %v260_v58 }
 0x104   :  { %v268_v61 = vmax.f32 %v178_v57, %v264_v60 }
 0x115   :  { %v587_v62 = vpop.f32.mrb[4].mxu0  ;;  %v607_v63 = vpop.f32.mrb[4].mxu1 }
 0x116   :  { %v339_v0 = vmul.f32 %v587_v62, %v701_v16  ;;  %v429_v1 = vmul.f32 %v607_v63, %v701_v16  ;;  %v322_v2 = vpop.f32.mrb[5].mxu0  ;;  %v412_v3 = vpop.f32.mrb[5].mxu1 }
 0x117   :  { %v337_v4 = vmul.f32 %v701_v16, %v322_v2  ;;  %v427_v5 = vmul.f32 %v701_v16, %v412_v3  ;;  %v588_v6 = vpop.f32.mrb[6].mxu0  ;;  %v608_v7 = vpop.f32.mrb[6].mxu1 }
 0x118   :  { %v343_v8 = vadd.f32 %v706_v17, %v339_v0  ;;  %v433_v9 = vadd.f32 %v706_v17, %v429_v1  ;;  %v340_v10 = vmul.f32 %v588_v6, %v701_v16  ;;  %v430_v11 = vmul.f32 %v608_v7, %v701_v16  ;;  %v325_v12 = vpop.f32.mrb[7].mxu0  ;;  %v415_v13 = vpop.f32.mrb[7].mxu1 }
 0x119   :  { %v341_v14 = vadd.f32 %v706_v17, %v337_v4  ;;  %v431_v15 = vadd.f32 %v706_v17, %v427_v5  ;;  %v338_v18 = vmul.f32 %v701_v16, %v325_v12  ;;  %v428_v19 = vmul.f32 %v701_v16, %v415_v13 }
 0x11a   :  { %vm347_vm8 = vcmp.gt.f32.partialorder %v343_v8, 0.0  ;;  %v351_v20 = vmul.f32 0.2, %v343_v8  ;;  %vm437_vm9 = vcmp.gt.f32.partialorder %v433_v9, 0.0  ;;  %v441_v21 = vmul.f32 0.2, %v433_v9 }
 0x11b   :  { %vm345_vm10 = vcmp.gt.f32.partialorder %v341_v14, 0.0  ;;  %v349_v22 = vmul.f32 0.2, %v341_v14  ;;  %vm435_vm11 = vcmp.gt.f32.partialorder %v431_v15, 0.0  ;;  %v439_v23 = vmul.f32 0.2, %v431_v15 }
 0x11c   :  { %v355_v24 = vsel %vm347_vm8, %v343_v8, %v351_v20  ;;  %v445_v25 = vsel %vm437_vm9, %v433_v9, %v441_v21  ;;  %v344_v26 = vadd.f32 %v706_v17, %v340_v10  ;;  %v434_v27 = vadd.f32 %v706_v17, %v430_v11 }
 0x11d   :  { %v359_v28 = vmax.f32 %v269_v46, %v355_v24  ;;  %v353_v29 = vsel %vm345_vm10, %v341_v14, %v349_v22  ;;  %v443_v30 = vsel %vm435_vm11, %v431_v15, %v439_v23  ;;  %v342_v31 = vadd.f32 %v706_v17, %v338_v18 }
 0x11e   :  { %v357_v16 = vmax.f32 %v267_v50, %v353_v29  ;;  %vm348_vm12 = vcmp.gt.f32.partialorder %v344_v26, 0.0  ;;  %v352_v32 = vmul.f32 0.2, %v344_v26  ;;  %vm438_vm13 = vcmp.gt.f32.partialorder %v434_v27, 0.0 }
 0x11f   :  { %v449_v33 = vmax.f32 %v359_v28, %v445_v25  ;;  %v442_v34 = vmul.f32 0.2, %v434_v27  ;;  %vm346_vm14 = vcmp.gt.f32.partialorder %v342_v31, 0.0  ;;  %v350_v35 = vmul.f32 0.2, %v342_v31 }
 0x120   :  { %v447_v36 = vmax.f32 %v357_v16, %v443_v30  ;;  %v356_v37 = vsel %vm348_vm12, %v344_v26, %v352_v32  ;;  %v432_v38 = vadd.f32 %v706_v17, %v428_v19 }
 0x121   :  { %453 = vst [vmem:[%s756_s4 + $0x10] sm:$0xff] %v449_v33  ;;  %v360_v39 = vmax.f32 %v270_v59, %v356_v37  ;;  %v354_v40 = vsel %vm346_vm14, %v342_v31, %v350_v35  ;;  %v446_v41 = vsel %vm438_vm13, %v434_v27, %v442_v34 }
 0x122   :  { %451 = vst [vmem:[%s756_s4] sm:$0xff] %v447_v36  ;;  %v358_v42 = vmax.f32 %v268_v61, %v354_v40  ;;  %vm436_vm15 = vcmp.gt.f32.partialorder %v432_v38, 0.0  ;;  %v440_v43 = vmul.f32 0.2, %v432_v38 }
 0x123   :  { %v450_v44 = vmax.f32 %v360_v39, %v446_v41 }
 0x124   :  { %v444_v45 = vsel %vm436_vm15, %v432_v38, %v440_v43 }
 0x125   :  { %454 = vst [vmem:[%s756_s4 + $0x18] sm:$0xff] %v450_v44  ;;  %v448_v17 = vmax.f32 %v358_v42, %v444_v45 }
 0x127   :  { %452 = vst [vmem:[%s756_s4 + $0x8] sm:$0xff] %v448_v17 }

// kernel: forward.16
= control target key start
LH: loop header
LB: loop body
LE: loop exit
PB: predicated region body
PF: predicated region fallthrough
CT: control target
= control target key end

     0   :  { %v51_v48 = vlaneseq  ;;  %s1408_s1 = inlined_call_operand.vmem [shape: bf16[256,256], index: 1, kind: input, shape index: {}]   ;;  %s1409_s0 = inlined_call_operand.vmem [shape: bf16[4,32,256], index: 0, kind: input, shape index: {}]   ;;  %s1410_s2 = inlined_call_operand.vmem [shape: f32[1,256], index: 2, kind: input, shape index: {}]   ;;  %s1411_s3 = inlined_call_operand.vmem [shape: f32[1,256], index: 3, kind: input, shape index: {}]   ;;  %s1412_s4 = inlined_call_operand.vmem [shape: f32[32,256], index: 4, kind: output, shape index: {}]  }
   0x1   :  { %v900_v0 = vld [vmem:[%s1408_s1 + $0x4] ss:$8 sps:$4 sm:$0xff]   ;;  %v905_v1 = vld [vmem:[%s1408_s1] ss:$8 sps:$4 sm:$0xff]   ;;  %v912_v2 = vld [vmem:[%s1408_s1 + $0x14] ss:$8 sps:$4 sm:$0xff]  }
   0x2   :  { %257 = vmatprep.subr.bf16.mxu0 %v900_v0  ;;  %375 = vmatprep.subr.bf16.mxu1 %v900_v0  ;;  %v919_v3 = vld [vmem:[%s1408_s1 + $0x10] ss:$8 sps:$4 sm:$0xff]   ;;  %v926_v4 = vld [vmem:[%s1408_s1 + $0x24] ss:$8 sps:$4 sm:$0xff]   ;;  %v933_v5 = vld [vmem:[%s1408_s1 + $0x20] ss:$8 sps:$4 sm:$0xff]  }
   0x3   :  { %258 = vmatpush1.bf16.msra.mxu0 %v905_v1  ;;  %376 = vmatpush1.bf16.msra.mxu1 %v905_v1  ;;  %v940_v6 = vld [vmem:[%s1408_s1 + $0x34] ss:$8 sps:$4 sm:$0xff]   ;;  %v947_v7 = vld [vmem:[%s1408_s1 + $0x30] ss:$8 sps:$4 sm:$0xff]   ;;  %v954_v8 = vld [vmem:[%s1408_s1 + $0x44] ss:$8 sps:$4 sm:$0xff]  }
   0x4   :  { %259 = vmatprep.subr.bf16.mxu0 %v912_v2  ;;  %377 = vmatprep.subr.bf16.mxu1 %v912_v2  ;;  %v961_v9 = vld [vmem:[%s1408_s1 + $0x40] ss:$8 sps:$4 sm:$0xff]   ;;  %v968_v10 = vld [vmem:[%s1408_s1 + $0x54] ss:$8 sps:$4 sm:$0xff]   ;;  %v975_v11 = vld [vmem:[%s1408_s1 + $0x50] ss:$8 sps:$4 sm:$0xff]  }
   0x5   :  { %v982_v12 = vld [vmem:[%s1408_s1 + $0x64] ss:$8 sps:$4 sm:$0xff]   ;;  %v992_v14 = vld [vmem:[%s1408_s1 + $0x60] ss:$8 sps:$4 sm:$0xff]   ;;  %v1002_v16 = vld [vmem:[%s1408_s1 + $0x74] ss:$8 sps:$4 sm:$0xff]  }
   0x6   :  { %v850_v13 = vld [vmem:[%s1409_s0 + $0x4] ss:$8 sps:$4 sm:$0xff]   ;;  %v1009_v17 = vld [vmem:[%s1408_s1 + $0x70] ss:$8 sps:$4 sm:$0xff]   ;;  %v1023_v19 = vld [vmem:[%s1408_s1 + $0x80] ss:$8 sps:$4 sm:$0xff]  }
   0x7   :  { %260 = vmatpush1.bf16.msra.mxu0 %v919_v3  ;;  %378 = vmatpush1.bf16.msra.mxu1 %v919_v3  ;;  %v853_v15 = vld [vmem:[%s1409_s0 + $0x24] ss:$8 sps:$4 sm:$0xff]   ;;  %v1030_v20 = vld [vmem:[%s1408_s1 + $0x94] ss:$8 sps:$4 sm:$0xff]   ;;  %v1037_v21 = vld [vmem:[%s1408_s1 + $0x90] ss:$8 sps:$4 sm:$0xff]  }
   0x8   :  { %261 = vmatprep.subr.bf16.mxu0 %v926_v4  ;;  %379 = vmatprep.subr.bf16.mxu1 %v926_v4  ;;  %v1016_v18 = vld [vmem:[%s1408_s1 + $0x84] ss:$8 sps:$4 sm:$0xff]   ;;  %v1051_v23 = vld [vmem:[%s1408_s1 + $0xa0] ss:$8 sps:$4 sm:$0xff]   ;;  %v1058_v24 = vld [vmem:[%s1408_s1 + $0xb4] ss:$8 sps:$4 sm:$0xff]  }
   0x9   :  { %289 = vmatprep.mubr.bf16.mxu0 %v850_v13  ;;  %407 = vmatprep.mubr.bf16.mxu1 %v853_v15  ;;  %v1044_v22 = vld [vmem:[%s1408_s1 + $0xa4] ss:$8 sps:$4 sm:$0xff]   ;;  %v1065_v25 = vld [vmem:[%s1408_s1 + $0xb0] ss:$8 sps:$4 sm:$0xff]   ;;  %v1079_v27 = vld [vmem:[%s1408_s1 + $0xc0] ss:$8 sps:$4 sm:$0xff]  }
   0xa   :  { %v1072_v26 = vld [vmem:[%s1408_s1 + $0xc4] ss:$8 sps:$4 sm:$0xff]   ;;  %v1086_v28 = vld [vmem:[%s1408_s1 + $0xd4] ss:$8 sps:$4 sm:$0xff]   ;;  %v1093_v29 = vld [vmem:[%s1408_s1 + $0xd0] ss:$8 sps:$4 sm:$0xff]  }
   0xb   :  { %262 = vmatpush1.bf16.msra.mxu0 %v933_v5  ;;  %380 = vmatpush1.bf16.msra.mxu1 %v933_v5  ;;  %v1100_v30 = vld [vmem:[%s1408_s1 + $0xe4] ss:$8 sps:$4 sm:$0xff]   ;;  %v1107_v31 = vld [vmem:[%s1408_s1 + $0xe0] ss:$8 sps:$4 sm:$0xff]   ;;  %v1114_v32 = vld [vmem:[%s1408_s1 + $0xf4] ss:$8 sps:$4 sm:$0xff]  }
   0xc   :  { %263 = vmatprep.subr.bf16.mxu0 %v940_v6  ;;  %381 = vmatprep.subr.bf16.mxu1 %v940_v6  ;;  %v1121_v33 = vld [vmem:[%s1408_s1 + $0xf0] ss:$8 sps:$4 sm:$0xff]   ;;  %v848_v34 = vld [vmem:[%s1409_s0] ss:$8 sps:$4 sm:$0xff]   ;;  %v854_v36 = vld [vmem:[%s1409_s0 + $0x14] ss:$8 sps:$4 sm:$0xff]  }
   0xd   :  { %v851_v35 = vld [vmem:[%s1409_s0 + $0x20] ss:$8 sps:$4 sm:$0xff]   ;;  %v856_v37 = vld [vmem:[%s1409_s0 + $0x34] ss:$8 sps:$4 sm:$0xff]   ;;  %v858_v38 = vld [vmem:[%s1409_s0 + $0x10] ss:$8 sps:$4 sm:$0xff]  }
   0xe   :  { %v859_v39 = vld [vmem:[%s1409_s0 + $0x30] ss:$8 sps:$4 sm:$0xff]   ;;  %v862_v40 = vld [vmem:[%s1409_s0 + $0x44] ss:$8 sps:$4 sm:$0xff]   ;;  %v860_v42 = vld [vmem:[%s1409_s0 + $0x40] ss:$8 sps:$4 sm:$0xff]  }
   0xf   :  { %264 = vmatpush1.bf16.msra.mxu0 %v947_v7  ;;  %382 = vmatpush1.bf16.msra.mxu1 %v947_v7  ;;  %v865_v41 = vld [vmem:[%s1409_s0 + $0x64] ss:$8 sps:$4 sm:$0xff]   ;;  %v863_v43 = vld [vmem:[%s1409_s0 + $0x60] ss:$8 sps:$4 sm:$0xff]   ;;  %v866_v44 = vld [vmem:[%s1409_s0 + $0x54] ss:$8 sps:$4 sm:$0xff]  }
  0x10   :  { %265 = vmatprep.subr.bf16.mxu0 %v954_v8  ;;  %383 = vmatprep.subr.bf16.mxu1 %v954_v8  ;;  %v868_v45 = vld [vmem:[%s1409_s0 + $0x74] ss:$8 sps:$4 sm:$0xff]   ;;  %v870_v46 = vld [vmem:[%s1409_s0 + $0x50] ss:$8 sps:$4 sm:$0xff]   ;;  %v52_v49 = vshrl.u32 %v51_v48, 7 }
  0x11   :  { %v871_v47 = vld [vmem:[%s1409_s0 + $0x70] ss:$8 sps:$4 sm:$0xff]   ;;  %v49_v51 = vld [vmem:[%s1410_s2] sm:$0x3] }
  0x12   :  { %v53_v50 = vsub.s32 0, %v52_v49  ;;  %v57_v52 = vsub.s32 1, %v52_v49  ;;  %v61_v53 = vld [vmem:[%s1411_s3] sm:$0x3] }
  0x13   :  { %266 = vmatpush1.bf16.msra.mxu0 %v961_v9  ;;  %384 = vmatpush1.bf16.msra.mxu1 %v961_v9 }
  0x14   :  { %267 = vmatprep.subr.bf16.mxu0 %v968_v10  ;;  %385 = vmatprep.subr.bf16.mxu1 %v968_v10  ;;  %v1239_v54 = vrot.slane %v49_v51, %v53_v50  ;;  %v1241_v55 = vrot.slane %v49_v51, %v57_v52  ;;  %v1243_v56 = vrot.slane %v61_v53, %v53_v50 }
  0x15   :  { %v1245_v59 = vrot.slane %v61_v53, %v57_v52 }
  0x17   :  { %268 = vmatpush1.bf16.msra.mxu0 %v975_v11  ;;  %386 = vmatpush1.bf16.msra.mxu1 %v975_v11 }
  0x18   :  { %269 = vmatprep.subr.bf16.mxu0 %v982_v12  ;;  %387 = vmatprep.subr.bf16.mxu1 %v982_v12 }
  0x1b   :  { %270 = vmatpush1.bf16.msra.mxu0 %v992_v14  ;;  %388 = vmatpush1.bf16.msra.mxu1 %v992_v14 }
  0x1c   :  { %271 = vmatprep.subr.bf16.mxu0 %v1002_v16  ;;  %389 = vmatprep.subr.bf16.mxu1 %v1002_v16 }
  0x1f   :  { %272 = vmatpush1.bf16.msra.mxu0 %v1009_v17  ;;  %390 = vmatpush1.bf16.msra.mxu1 %v1009_v17 }
  0x20   :  { %273 = vmatprep.subr.bf16.mxu0 %v1016_v18  ;;  %391 = vmatprep.subr.bf16.mxu1 %v1016_v18 }
  0x23   :  { %274 = vmatpush1.bf16.msra.mxu0 %v1023_v19  ;;  %392 = vmatpush1.bf16.msra.mxu1 %v1023_v19 }
  0x24   :  { %275 = vmatprep.subr.bf16.mxu0 %v1030_v20  ;;  %393 = vmatprep.subr.bf16.mxu1 %v1030_v20 }
  0x27   :  { %276 = vmatpush1.bf16.msra.mxu0 %v1037_v21  ;;  %394 = vmatpush1.bf16.msra.mxu1 %v1037_v21 }
  0x28   :  { %277 = vmatprep.subr.bf16.mxu0 %v1044_v22  ;;  %395 = vmatprep.subr.bf16.mxu1 %v1044_v22 }
  0x2b   :  { %278 = vmatpush1.bf16.msra.mxu0 %v1051_v23  ;;  %396 = vmatpush1.bf16.msra.mxu1 %v1051_v23 }
  0x2c   :  { %279 = vmatprep.subr.bf16.mxu0 %v1058_v24  ;;  %397 = vmatprep.subr.bf16.mxu1 %v1058_v24 }
  0x2f   :  { %280 = vmatpush1.bf16.msra.mxu0 %v1065_v25  ;;  %398 = vmatpush1.bf16.msra.mxu1 %v1065_v25 }
  0x30   :  { %281 = vmatprep.subr.bf16.mxu0 %v1072_v26  ;;  %399 = vmatprep.subr.bf16.mxu1 %v1072_v26 }
  0x33   :  { %282 = vmatpush1.bf16.msra.mxu0 %v1079_v27  ;;  %400 = vmatpush1.bf16.msra.mxu1 %v1079_v27 }
  0x34   :  { %283 = vmatprep.subr.bf16.mxu0 %v1086_v28  ;;  %401 = vmatprep.subr.bf16.mxu1 %v1086_v28 }
  0x37   :  { %284 = vmatpush1.bf16.msra.mxu0 %v1093_v29  ;;  %402 = vmatpush1.bf16.msra.mxu1 %v1093_v29 }
  0x38   :  { %285 = vmatprep.subr.bf16.mxu0 %v1100_v30  ;;  %403 = vmatprep.subr.bf16.mxu1 %v1100_v30 }
  0x3b   :  { %286 = vmatpush1.bf16.msra.mxu0 %v1107_v31  ;;  %404 = vmatpush1.bf16.msra.mxu1 %v1107_v31 }
  0x3c   :  { %287 = vmatprep.subr.bf16.mxu0 %v1114_v32  ;;  %405 = vmatprep.subr.bf16.mxu1 %v1114_v32 }
  0x3f   :  { %288 = vmatpush1.bf16.msra.mxu0 %v1121_v33  ;;  %406 = vmatpush1.bf16.msra.mxu1 %v1121_v33 }
  0x40   :  { %501 = vmatprep.subr.bf16.mxu0 %v900_v0  ;;  %627 = vmatprep.subr.bf16.mxu1 %v900_v0 }
  0x42   :  { %290 = vmatmul.mubr.bf16.vlgmr.msra.gmra.mrb[0].mxu0 %v848_v34  ;;  %408 = vmatmul.mubr.bf16.vlgmr.msra.gmra.mrb[0].mxu1 %v851_v35 }
  0x43   :  { %502 = vmatpush1.bf16.msra.mxu0 %v905_v1  ;;  %628 = vmatpush1.bf16.msra.mxu1 %v905_v1 }
  0x44   :  { %503 = vmatprep.subr.bf16.mxu0 %v912_v2  ;;  %629 = vmatprep.subr.bf16.mxu1 %v912_v2 }
  0x45   :  { %299 = vmatprep.mubr.bf16.mxu0 %v854_v36  ;;  %417 = vmatprep.mubr.bf16.mxu1 %v856_v37 }
  0x47   :  { %504 = vmatpush1.bf16.msra.mxu0 %v919_v3  ;;  %630 = vmatpush1.bf16.msra.mxu1 %v919_v3 }
  0x48   :  { %505 = vmatprep.subr.bf16.mxu0 %v926_v4  ;;  %631 = vmatprep.subr.bf16.mxu1 %v926_v4 }
  0x4a   :  { %300 = vmatmul.mubr.bf16.gmra.mrb[4].mxu0 %v858_v38  ;;  %418 = vmatmul.mubr.bf16.gmra.mrb[4].mxu1 %v859_v39 }
  0x4b   :  { %506 = vmatpush1.bf16.msra.mxu0 %v933_v5  ;;  %632 = vmatpush1.bf16.msra.mxu1 %v933_v5 }
  0x4c   :  { %507 = vmatprep.subr.bf16.mxu0 %v940_v6  ;;  %633 = vmatprep.subr.bf16.mxu1 %v940_v6 }
  0x4d   :  { %533 = vmatprep.mubr.bf16.mxu0 %v862_v40  ;;  %659 = vmatprep.mubr.bf16.mxu1 %v865_v41 }
  0x4f   :  { %508 = vmatpush1.bf16.msra.mxu0 %v947_v7  ;;  %634 = vmatpush1.bf16.msra.mxu1 %v947_v7 }
  0x50   :  { %509 = vmatprep.subr.bf16.mxu0 %v954_v8  ;;  %635 = vmatprep.subr.bf16.mxu1 %v954_v8 }
  0x53   :  { %510 = vmatpush1.bf16.msra.mxu0 %v961_v9  ;;  %636 = vmatpush1.bf16.msra.mxu1 %v961_v9 }
  0x54   :  { %511 = vmatprep.subr.bf16.mxu0 %v968_v10  ;;  %637 = vmatprep.subr.bf16.mxu1 %v968_v10 }
  0x57   :  { %512 = vmatpush1.bf16.msra.mxu0 %v975_v11  ;;  %638 = vmatpush1.bf16.msra.mxu1 %v975_v11 }
  0x58   :  { %513 = vmatprep.subr.bf16.mxu0 %v982_v12  ;;  %639 = vmatprep.subr.bf16.mxu1 %v982_v12 }
  0x5b   :  { %514 = vmatpush1.bf16.msra.mxu0 %v992_v14  ;;  %640 = vmatpush1.bf16.msra.mxu1 %v992_v14 }
  0x5c   :  { %515 = vmatprep.subr.bf16.mxu0 %v1002_v16  ;;  %641 = vmatprep.subr.bf16.mxu1 %v1002_v16 }
  0x5f   :  { %516 = vmatpush1.bf16.msra.mxu0 %v1009_v17  ;;  %642 = vmatpush1.bf16.msra.mxu1 %v1009_v17 }
  0x60   :  { %517 = vmatprep.subr.bf16.mxu0 %v1016_v18  ;;  %643 = vmatprep.subr.bf16.mxu1 %v1016_v18 }
  0x63   :  { %518 = vmatpush1.bf16.msra.mxu0 %v1023_v19  ;;  %644 = vmatpush1.bf16.msra.mxu1 %v1023_v19 }
  0x64   :  { %519 = vmatprep.subr.bf16.mxu0 %v1030_v20  ;;  %645 = vmatprep.subr.bf16.mxu1 %v1030_v20 }
  0x67   :  { %520 = vmatpush1.bf16.msra.mxu0 %v1037_v21  ;;  %646 = vmatpush1.bf16.msra.mxu1 %v1037_v21 }
  0x68   :  { %521 = vmatprep.subr.bf16.mxu0 %v1044_v22  ;;  %647 = vmatprep.subr.bf16.mxu1 %v1044_v22 }
  0x6b   :  { %522 = vmatpush1.bf16.msra.mxu0 %v1051_v23  ;;  %648 = vmatpush1.bf16.msra.mxu1 %v1051_v23 }
  0x6c   :  { %523 = vmatprep.subr.bf16.mxu0 %v1058_v24  ;;  %649 = vmatprep.subr.bf16.mxu1 %v1058_v24 }
  0x6f   :  { %524 = vmatpush1.bf16.msra.mxu0 %v1065_v25  ;;  %650 = vmatpush1.bf16.msra.mxu1 %v1065_v25 }
  0x70   :  { %525 = vmatprep.subr.bf16.mxu0 %v1072_v26  ;;  %651 = vmatprep.subr.bf16.mxu1 %v1072_v26 }
  0x73   :  { %526 = vmatpush1.bf16.msra.mxu0 %v1079_v27  ;;  %652 = vmatpush1.bf16.msra.mxu1 %v1079_v27 }
  0x74   :  { %527 = vmatprep.subr.bf16.mxu0 %v1086_v28  ;;  %653 = vmatprep.subr.bf16.mxu1 %v1086_v28 }
  0x77   :  { %528 = vmatpush1.bf16.msra.mxu0 %v1093_v29  ;;  %654 = vmatpush1.bf16.msra.mxu1 %v1093_v29 }
  0x78   :  { %529 = vmatprep.subr.bf16.mxu0 %v1100_v30  ;;  %655 = vmatprep.subr.bf16.mxu1 %v1100_v30 }
  0x7b   :  { %530 = vmatpush1.bf16.msra.mxu0 %v1107_v31  ;;  %656 = vmatpush1.bf16.msra.mxu1 %v1107_v31 }
  0x7c   :  { %531 = vmatprep.subr.bf16.mxu0 %v1114_v32  ;;  %657 = vmatprep.subr.bf16.mxu1 %v1114_v32 }
  0x7f   :  { %532 = vmatpush1.bf16.msra.mxu0 %v1121_v33  ;;  %658 = vmatpush1.bf16.msra.mxu1 %v1121_v33 }
  0x82   :  { %534 = vmatmul.mubr.bf16.vlgmr.msra.gmra.mrb[8].mxu0 %v860_v42  ;;  %660 = vmatmul.mubr.bf16.vlgmr.msra.gmra.mrb[8].mxu1 %v863_v43 }
  0x83   :  { %543 = vmatprep.mubr.bf16.mxu0 %v866_v44  ;;  %669 = vmatprep.mubr.bf16.mxu1 %v868_v45 }
  0x8a   :  { %544 = vmatmul.mubr.bf16.gmra.mrb[12].mxu0 %v870_v46  ;;  %670 = vmatmul.mubr.bf16.gmra.mrb[12].mxu1 %v871_v47 }
 0x115   :  { %v291_v57 = vpop.f32.mrb[0].mxu0  ;;  %v409_v58 = vpop.f32.mrb[0].mxu1 }
 0x116   :  { %v310_v60 = vmul.f32 %v291_v57, %v1239_v54  ;;  %v428_v61 = vmul.f32 %v409_v58, %v1239_v54  ;;  %v293_v62 = vpop.f32.mrb[1].mxu0  ;;  %v411_v63 = vpop.f32.mrb[1].mxu1 }
 0x117   :  { %v311_v0 = vmul.f32 %v293_v62, %v1241_v55  ;;  %v429_v1 = vmul.f32 %v411_v63, %v1241_v55  ;;  %v295_v2 = vpop.f32.mrb[2].mxu0  ;;  %v413_v3 = vpop.f32.mrb[2].mxu1 }
 0x118   :  { %v318_v4 = vadd.f32 %v310_v60, %v1243_v56  ;;  %v436_v5 = vadd.f32 %v428_v61, %v1243_v56  ;;  %v312_v6 = vmul.f32 %v295_v2, %v1239_v54  ;;  %v430_v7 = vmul.f32 %v413_v3, %v1239_v54  ;;  %v297_v8 = vpop.f32.mrb[3].mxu0  ;;  %v415_v9 = vpop.f32.mrb[3].mxu1 }
 0x119   :  { %v319_v10 = vadd.f32 %v311_v0, %v1245_v59  ;;  %v437_v11 = vadd.f32 %v429_v1, %v1245_v59  ;;  %v313_v12 = vmul.f32 %v297_v8, %v1241_v55  ;;  %v431_v13 = vmul.f32 %v415_v9, %v1241_v55 }
 0x11a   :  { %vm326_vm0 = vcmp.gt.f32.partialorder %v318_v4, 0.0  ;;  %v334_v14 = vmul.f32 0.2, %v318_v4  ;;  %vm444_vm1 = vcmp.gt.f32.partialorder %v436_v5, 0.0  ;;  %v452_v15 = vmul.f32 0.2, %v436_v5 }
 0x11b   :  { %vm327_vm2 = vcmp.gt.f32.partialorder %v319_v10, 0.0  ;;  %v335_v16 = vmul.f32 0.2, %v319_v10  ;;  %vm445_vm3 = vcmp.gt.f32.partialorder %v437_v11, 0.0  ;;  %v453_v17 = vmul.f32 0.2, %v437_v11 }
 0x11c   :  { %v1259_v18 = vsel %vm326_vm0, %v318_v4, %v334_v14  ;;  %v1261_v19 = vsel %vm444_vm1, %v436_v5, %v452_v15  ;;  %v320_v20 = vadd.f32 %v312_v6, %v1243_v56  ;;  %v438_v21 = vadd.f32 %v430_v7, %v1243_v56 }
 0x11d   :  { %v468_v22 = vmax.f32 %v1259_v18, %v1261_v19  ;;  %v1267_v23 = vsel %vm327_vm2, %v319_v10, %v335_v16  ;;  %v1269_v24 = vsel %vm445_vm3, %v437_v11, %v453_v17  ;;  %v321_v25 = vadd.f32 %v313_v12, %v1245_v59  ;;  %v301_v26 = vpop.f32.mrb[4].mxu0  ;;  %v419_v27 = vpop.f32.mrb[4].mxu1 }
 0x11e   :  { %v469_v28 = vmax.f32 %v1267_v23, %v1269_v24  ;;  %vm328_vm4 = vcmp.gt.f32.partialorder %v320_v20, 0.0  ;;  %v336_v29 = vmul.f32 0.2, %v320_v20  ;;  %vm446_vm5 = vcmp.gt.f32.partialorder %v438_v21, 0.0  ;;  %v303_v30 = vpop.f32.mrb[5].mxu0  ;;  %v421_v31 = vpop.f32.mrb[5].mxu1 }
 0x11f   :  { %v454_v32 = vmul.f32 0.2, %v438_v21  ;;  %vm329_vm6 = vcmp.gt.f32.partialorder %v321_v25, 0.0  ;;  %v337_v33 = vmul.f32 0.2, %v321_v25  ;;  %v439_v34 = vadd.f32 %v431_v13, %v1245_v59  ;;  %v305_v35 = vpop.f32.mrb[6].mxu0 }
 0x120   :  { %v1275_v36 = vsel %vm328_vm4, %v320_v20, %v336_v29  ;;  %v314_v37 = vmul.f32 %v301_v26, %v1239_v54  ;;  %v432_v38 = vmul.f32 %v419_v27, %v1239_v54  ;;  %v315_v39 = vmul.f32 %v303_v30, %v1241_v55  ;;  %v423_v40 = vpop.f32.mrb[6].mxu1  ;;  %v307_v41 = vpop.f32.mrb[7].mxu0 }
 0x121   :  { %v1280_v42 = vsel %vm446_vm5, %v438_v21, %v454_v32  ;;  %v1282_v43 = vsel %vm329_vm6, %v321_v25, %v337_v33  ;;  %vm447_vm7 = vcmp.gt.f32.partialorder %v439_v34, 0.0  ;;  %v455_v44 = vmul.f32 0.2, %v439_v34  ;;  %v425_v45 = vpop.f32.mrb[7].mxu1 }
 0x122   :  { %v470_v46 = vmax.f32 %v1275_v36, %v1280_v42  ;;  %v322_v47 = vadd.f32 %v314_v37, %v1243_v56  ;;  %v440_v48 = vadd.f32 %v432_v38, %v1243_v56  ;;  %v323_v49 = vadd.f32 %v315_v39, %v1245_v59 }
 0x123   :  { %v1289_v50 = vsel %vm447_vm7, %v439_v34, %v455_v44  ;;  %v433_v51 = vmul.f32 %v421_v31, %v1241_v55  ;;  %v316_v52 = vmul.f32 %v305_v35, %v1239_v54  ;;  %v434_v53 = vmul.f32 %v423_v40, %v1239_v54 }
 0x124   :  { %v471_v57 = vmax.f32 %v1282_v43, %v1289_v50  ;;  %vm330_vm8 = vcmp.gt.f32.partialorder %v322_v47, 0.0  ;;  %v338_v58 = vmul.f32 0.2, %v322_v47  ;;  %vm448_vm9 = vcmp.gt.f32.partialorder %v440_v48, 0.0 }
 0x125   :  { %v456_v60 = vmul.f32 0.2, %v440_v48  ;;  %vm331_vm10 = vcmp.gt.f32.partialorder %v323_v49, 0.0  ;;  %v339_v61 = vmul.f32 0.2, %v323_v49  ;;  %v441_v62 = vadd.f32 %v433_v51, %v1245_v59 }
 0x126   :  { %v1297_v63 = vsel %vm330_vm8, %v322_v47, %v338_v58  ;;  %v324_v0 = vadd.f32 %v316_v52, %v1243_v56  ;;  %v442_v1 = vadd.f32 %v434_v53, %v1243_v56  ;;  %v317_v2 = vmul.f32 %v307_v41, %v1241_v55 }
 0x127   :  { %v1302_v3 = vsel %vm448_vm9, %v440_v48, %v456_v60  ;;  %v1304_v4 = vsel %vm331_vm10, %v323_v49, %v339_v61  ;;  %vm449_vm11 = vcmp.gt.f32.partialorder %v441_v62, 0.0  ;;  %v457_v5 = vmul.f32 0.2, %v441_v62 }
 0x128   :  { %v472_v6 = vmax.f32 %v1297_v63, %v1302_v3  ;;  %vm332_vm12 = vcmp.gt.f32.partialorder %v324_v0, 0.0  ;;  %v340_v7 = vmul.f32 0.2, %v324_v0  ;;  %vm450_vm13 = vcmp.gt.f32.partialorder %v442_v1, 0.0 }
 0x129   :  { %v1308_v8 = vsel %vm449_vm11, %v441_v62, %v457_v5  ;;  %v458_v9 = vmul.f32 0.2, %v442_v1  ;;  %v325_v10 = vadd.f32 %v317_v2, %v1245_v59  ;;  %v435_v11 = vmul.f32 %v425_v45, %v1241_v55 }
 0x12a   :  { %v473_v12 = vmax.f32 %v1304_v4, %v1308_v8  ;;  %v1314_v13 = vsel %vm332_vm12, %v324_v0, %v340_v7 }
 0x12b   :  { %v1316_v14 = vsel %vm450_vm13, %v442_v1, %v458_v9  ;;  %vm333_vm14 = vcmp.gt.f32.partialorder %v325_v10, 0.0  ;;  %v341_v15 = vmul.f32 0.2, %v325_v10  ;;  %v443_v16 = vadd.f32 %v435_v11, %v1245_v59 }
 0x12c   :  { %v474_v17 = vmax.f32 %v1314_v13, %v1316_v14 }
 0x12d   :  { %v1321_v20 = vsel %vm333_vm14, %v325_v10, %v341_v15  ;;  %vm451_vm15 = vcmp.gt.f32.partialorder %v443_v16, 0.0  ;;  %v459_v21 = vmul.f32 0.2, %v443_v16 }
 0x12f   :  { %v1323_v25 = vsel %vm451_vm15, %v443_v16, %v459_v21 }
 0x130   :  { %v475_v26 = vmax.f32 %v1321_v20, %v1323_v25 }
 0x155   :  { %v535_v27 = vpop.f32.mrb[8].mxu0  ;;  %v661_v29 = vpop.f32.mrb[8].mxu1 }
 0x156   :  { %v554_v30 = vmul.f32 %v535_v27, %v1239_v54  ;;  %v680_v31 = vmul.f32 %v661_v29, %v1239_v54  ;;  %v537_v32 = vpop.f32.mrb[9].mxu0  ;;  %v663_v33 = vpop.f32.mrb[9].mxu1 }
 0x157   :  { %v555_v34 = vmul.f32 %v537_v32, %v1241_v55  ;;  %v681_v35 = vmul.f32 %v663_v33, %v1241_v55  ;;  %v539_v37 = vpop.f32.mrb[10].mxu0  ;;  %v665_v38 = vpop.f32.mrb[10].mxu1 }
 0x158   :  { %v562_v39 = vadd.f32 %v554_v30, %v1243_v56  ;;  %v688_v40 = vadd.f32 %v680_v31, %v1243_v56  ;;  %v556_v41 = vmul.f32 %v539_v37, %v1239_v54  ;;  %v682_v44 = vmul.f32 %v665_v38, %v1239_v54  ;;  %v541_v45 = vpop.f32.mrb[11].mxu0  ;;  %v667_v47 = vpop.f32.mrb[11].mxu1 }
 0x159   :  { %v563_v48 = vadd.f32 %v555_v34, %v1245_v59  ;;  %v689_v49 = vadd.f32 %v681_v35, %v1245_v59  ;;  %v557_v51 = vmul.f32 %v541_v45, %v1241_v55  ;;  %v683_v52 = vmul.f32 %v667_v47, %v1241_v55 }
 0x15a   :  { %vm570_vm0 = vcmp.gt.f32.partialorder %v562_v39, 0.0  ;;  %v578_v53 = vmul.f32 0.2, %v562_v39  ;;  %vm696_vm1 = vcmp.gt.f32.partialorder %v688_v40, 0.0  ;;  %v704_v58 = vmul.f32 0.2, %v688_v40 }
 0x15b   :  { %vm571_vm2 = vcmp.gt.f32.partialorder %v563_v48, 0.0  ;;  %v579_v60 = vmul.f32 0.2, %v563_v48  ;;  %vm697_vm3 = vcmp.gt.f32.partialorder %v689_v49, 0.0  ;;  %v705_v61 = vmul.f32 0.2, %v689_v49 }
 0x15c   :  { %v586_v62 = vsel %vm570_vm0, %v562_v39, %v578_v53  ;;  %v712_v0 = vsel %vm696_vm1, %v688_v40, %v704_v58  ;;  %v564_v1 = vadd.f32 %v556_v41, %v1243_v56  ;;  %v690_v2 = vadd.f32 %v682_v44, %v1243_v56 }
 0x15d   :  { %v594_v5 = vmax.f32 %v468_v22, %v586_v62  ;;  %v587_v7 = vsel %vm571_vm2, %v563_v48, %v579_v60  ;;  %v713_v9 = vsel %vm697_vm3, %v689_v49, %v705_v61  ;;  %v565_v10 = vadd.f32 %v557_v51, %v1245_v59  ;;  %v545_v11 = vpop.f32.mrb[12].mxu0  ;;  %v671_v15 = vpop.f32.mrb[12].mxu1 }
 0x15e   :  { %v595_v16 = vmax.f32 %v469_v28, %v587_v7  ;;  %vm572_vm4 = vcmp.gt.f32.partialorder %v564_v1, 0.0  ;;  %v580_v21 = vmul.f32 0.2, %v564_v1  ;;  %vm698_vm5 = vcmp.gt.f32.partialorder %v690_v2, 0.0  ;;  %v547_v27 = vpop.f32.mrb[13].mxu0  ;;  %v673_v29 = vpop.f32.mrb[13].mxu1 }
 0x15f   :  { %v720_v30 = vmax.f32 %v594_v5, %v712_v0  ;;  %v706_v31 = vmul.f32 0.2, %v690_v2  ;;  %vm573_vm6 = vcmp.gt.f32.partialorder %v565_v10, 0.0  ;;  %v581_v18 = vmul.f32 0.2, %v565_v10  ;;  %v549_v19 = vpop.f32.mrb[14].mxu0 }
 0x160   :  { %v721_v22 = vmax.f32 %v595_v16, %v713_v9  ;;  %v588_v32 = vsel %vm572_vm4, %v564_v1, %v580_v21  ;;  %v691_v33 = vadd.f32 %v683_v52, %v1245_v59  ;;  %v558_v34 = vmul.f32 %v545_v11, %v1239_v54  ;;  %v675_v35 = vpop.f32.mrb[14].mxu1  ;;  %v551_v37 = vpop.f32.mrb[15].mxu0 }
 0x161   :  { %728 = vst [vmem:[%s1412_s4] sm:$0xff] %v720_v30  ;;  %v596_v23 = vmax.f32 %v470_v46, %v588_v32  ;;  %v714_v24 = vsel %vm698_vm5, %v690_v2, %v706_v31  ;;  %v589_v28 = vsel %vm573_vm6, %v565_v10, %v581_v18  ;;  %v684_v38 = vmul.f32 %v671_v15, %v1239_v54  ;;  %v677_v39 = vpop.f32.mrb[15].mxu1 }
 0x162   :  { %729 = vst [vmem:[%s1412_s4 + $0x8] sm:$0xff] %v721_v22  ;;  %v597_v40 = vmax.f32 %v471_v57, %v589_v28  ;;  %vm699_vm7 = vcmp.gt.f32.partialorder %v691_v33, 0.0  ;;  %v707_v41 = vmul.f32 0.2, %v691_v33  ;;  %v566_v44 = vadd.f32 %v558_v34, %v1243_v56 }
 0x163   :  { %v722_v36 = vmax.f32 %v596_v23, %v714_v24  ;;  %v692_v42 = vadd.f32 %v684_v38, %v1243_v56  ;;  %v559_v46 = vmul.f32 %v547_v27, %v1241_v55  ;;  %v685_v45 = vmul.f32 %v673_v29, %v1241_v55 }
 0x164   :  { %v715_v47 = vsel %vm699_vm7, %v691_v33, %v707_v41  ;;  %vm574_vm8 = vcmp.gt.f32.partialorder %v566_v44, 0.0  ;;  %v582_v48 = vmul.f32 0.2, %v566_v44  ;;  %v560_v49 = vmul.f32 %v549_v19, %v1239_v54 }
 0x165   :  { %730 = vst [vmem:[%s1412_s4 + $0x10] sm:$0xff] %v722_v36  ;;  %v723_v43 = vmax.f32 %v597_v40, %v715_v47  ;;  %vm700_vm9 = vcmp.gt.f32.partialorder %v692_v42, 0.0  ;;  %v708_v50 = vmul.f32 0.2, %v692_v42  ;;  %v567_v57 = vadd.f32 %v559_v46, %v1245_v59 }
 0x166   :  { %v590_v51 = vsel %vm574_vm8, %v566_v44, %v582_v48  ;;  %v693_v52 = vadd.f32 %v685_v45, %v1245_v59  ;;  %v568_v53 = vadd.f32 %v560_v49, %v1243_v56  ;;  %v686_v58 = vmul.f32 %v675_v35, %v1239_v54 }
 0x167   :  { %731 = vst [vmem:[%s1412_s4 + $0x18] sm:$0xff] %v723_v43  ;;  %v598_v60 = vmax.f32 %v472_v6, %v590_v51  ;;  %v716_v61 = vsel %vm700_vm9, %v692_v42, %v708_v50  ;;  %vm575_vm10 = vcmp.gt.f32.partialorder %v567_v57, 0.0  ;;  %v583_v62 = vmul.f32 0.2, %v567_v57 }
 0x168   :  { %vm701_vm11 = vcmp.gt.f32.partialorder %v693_v52, 0.0  ;;  %v709_v0 = vmul.f32 0.2, %v693_v52  ;;  %vm576_vm12 = vcmp.gt.f32.partialorder %v568_v53, 0.0  ;;  %v584_v1 = vmul.f32 0.2, %v568_v53 }
 0x169   :  { %v724_v2 = vmax.f32 %v598_v60, %v716_v61  ;;  %v591_v5 = vsel %vm575_vm10, %v567_v57, %v583_v62  ;;  %v694_v7 = vadd.f32 %v686_v58, %v1243_v56  ;;  %v561_v54 = vmul.f32 %v551_v37, %v1241_v55 }
 0x16a   :  { %v599_v9 = vmax.f32 %v473_v12, %v591_v5  ;;  %v717_v10 = vsel %vm701_vm11, %v693_v52, %v709_v0  ;;  %v592_v63 = vsel %vm576_vm12, %v568_v53, %v584_v1  ;;  %v687_v3 = vmul.f32 %v677_v39, %v1241_v55 }
 0x16b   :  { %732 = vst [vmem:[%s1412_s4 + $0x20] sm:$0xff] %v724_v2  ;;  %v600_v6 = vmax.f32 %v474_v17, %v592_v63  ;;  %vm702_vm13 = vcmp.gt.f32.partialorder %v694_v7, 0.0  ;;  %v710_v56 = vmul.f32 0.2, %v694_v7  ;;  %v569_v11 = vadd.f32 %v561_v54, %v1245_v59 }
 0x16c   :  { %v725_v15 = vmax.f32 %v599_v9, %v717_v10  ;;  %v695_v4 = vadd.f32 %v687_v3, %v1245_v59 }
 0x16d   :  { %v718_v8 = vsel %vm702_vm13, %v694_v7, %v710_v56  ;;  %vm577_vm14 = vcmp.gt.f32.partialorder %v569_v11, 0.0  ;;  %v585_v12 = vmul.f32 0.2, %v569_v11 }
 0x16e   :  { %733 = vst [vmem:[%s1412_s4 + $0x28] sm:$0xff] %v725_v15  ;;  %v726_v55 = vmax.f32 %v600_v6, %v718_v8  ;;  %vm703_vm15 = vcmp.gt.f32.partialorder %v695_v4, 0.0  ;;  %v711_v16 = vmul.f32 0.2, %v695_v4 }
 0x16f   :  { %v593_v21 = vsel %vm577_vm14, %v569_v11, %v585_v12 }
 0x170   :  { %734 = vst [vmem:[%s1412_s4 + $0x30] sm:$0xff] %v726_v55  ;;  %v601_v13 = vmax.f32 %v475_v26, %v593_v21  ;;  %v719_v59 = vsel %vm703_vm15, %v695_v4, %v711_v16 }
 0x172   :  { %v727_v14 = vmax.f32 %v601_v13, %v719_v59 }
 0x174   :  { %735 = vst [vmem:[%s1412_s4 + $0x38] sm:$0xff] %v727_v14 }

// kernel: forward.17
= control target key start
LH: loop header
LB: loop body
LE: loop exit
PB: predicated region body
PF: predicated region fallthrough
CT: control target
= control target key end

     0   :  { %18 = vsyncpa [#allocation3], 0  ;;  %s3108_s0 = inlined_call_operand.vmem [shape: f32[2,16,512], index: 0, kind: input, shape index: {}]   ;;  %s3109_s1 = inlined_call_operand.vmem [shape: f32[512,64], index: 1, kind: input, shape index: {}]   ;;  %s3110_s2 = inlined_call_operand.vmem [shape: f32[1,64], index: 2, kind: input, shape index: {}]   ;;  %s3111_s3 = inlined_call_operand.vmem [shape: f32[1,64], index: 3, kind: input, shape index: {}]   ;;  %s3112_s4 = inlined_call_operand.vmem [shape: f32[128,512], index: 4, kind: input, shape index: {}]   ;;  %s3113_s5 = inlined_call_operand.vmem [shape: f32[1,512], index: 5, kind: input, shape index: {}]   ;;  %s3114_s6 = inlined_call_operand.vmem [shape: f32[1,512], index: 6, kind: input, shape index: {}]   ;;  %s3115_s7 = inlined_call_operand.vmem [shape: f32[512,256], index: 7, kind: input, shape index: {}]   ;;  %s3116_s8 = inlined_call_operand.vmem [shape: f32[1,256], index: 8, kind: input, shape index: {}]   ;;  %s3117_s9 = inlined_call_operand.vmem [shape: f32[1,256], index: 9, kind: input, shape index: {}]   ;;  %s3118_s10 = inlined_call_operand.vmem [shape: f32[1,256], index: 10, kind: input, shape index: {}]   ;;  %s3119_s11 = inlined_call_operand.vmem [shape: f32[256,40], index: 11, kind: input, shape index: {}]   ;;  %s3120_s12 = inlined_call_operand.vmem [shape: f32[1,40], index: 12, kind: input, shape index: {}]   ;;  %s3121_s13 = inlined_call_operand.hbm [shape: f32[2,1,40], index: 13, kind: output, shape index: {}]  }
   0x1   :  { %20 = vsyncpa [#allocation3 + $0x1], 0  ;;  %s2062_s25 = smov 0   ;;  %s2064_s26 = smov 0  }
   0x2   :  { %s2066_s27 = smov 0   ;;  %s2068_s28 = smov 0  }
   0x3 LB: > { %3126 = sst [smem:[#allocation5_spill]] %s1983_s27  ;;  %s2083_s29 = sadd.s32 4294967295, %s1987_s28   ;;  %s1987_s28 = sphi %s2068_s28, %s3133_s28   ;;  %s1983_s27 = sphi %s2066_s27, %s3135_s27   ;;  %s1979_s26 = sphi %s2064_s26, %s3137_s26   ;;  %s1975_s25 = sphi %s2062_s25, %s3136_s25  }
   0x4   : > { %s1469_s30 = sadd.s32 4294967294, %s1987_s28   ;;  %s2087_s14 = sadd.s32 1, %s1987_s28  }
   0x5   : > { %3127 = sst [smem:[#allocation6_spill]] %s2087_s14  ;;  %s311_s15 = sadd.s32 1, %s1983_s27 }
   0x6   : > { %s308_s16 = ssub.s32 %s1987_s28, %s2087_s14  ;;  %p321_p0 = scmp.ne.s32.totalorder %s1983_s27, %s1979_s26 }
   0x7   : > { %p309_p1 = scmp.eq.s32.totalorder %s308_s16, 0  ;;  %p322_p2 = scmp.eq.s32.totalorder %s2083_s29, 1 }
   0x8   : > { %p327_p3 = scmp.ne.s32.totalorder %s1979_s26, %s1975_s25  ;;  %p328_p4 = scmp.eq.s32.totalorder %s1469_s30, 1 }
   0x9   : > { %s2098_s17 = scalar_select %p309_p1, %s1983_s27, %s311_s15  }
   0xa   : > { %p2100_p5 = por %p322_p2, %p321_p0  ;;  %p2104_p6 = por %p328_p4, %p327_p3 }
   0xb   : > { %3128 = sst [smem:[#allocation7_spill]] %s2098_s17  ;;  %p1472_p7 = scmp.ge.s32.totalorder %s1987_s28, 1 }
   0xc   : > { %s3130_s19 = scalar_select %p2104_p6, 1, 0 }
   0xd   : > { %p390_p8 = scmp.lt.s32.totalorder %s1987_s28, 3 }
   0xe   : > { %3131 = sst [smem:[#allocation8_spill]] %s3130_s19 }
   0xf   : > { %p391_p9 = pnand %p1472_p7, %p390_p8 }
  0x10   : > { %v462_v0 = vld [vmem:[%s3109_s1 + $0x80] sm:$0xff] (!%p391_p9)  ;;  %v463_v1 = vld [vmem:[%s3109_s1 + $0x88] sm:$0xff] (!%p391_p9)  ;;  %p433_p10 = scmp.lt.s32.totalorder (!%p391_p9), %s2083_s29, 1  ;;  %v464_v5 = vld [vmem:[%s3109_s1 + $0x90] sm:$0xff] (!%p391_p9)  ;;  %vm684_vm2 = vcmask (!%p391_p9), 523264   ;;  %s1990_s15 = smov (!%p391_p9), 64  }
  0x11   : > { %394 = sbr.rel (%p391_p9) target bundleno = 1183 (0x49f), region = 72  ;;  %v446_v2 = vld [vmem:[%s3109_s1] sm:$0xff] (!%p391_p9)  ;;  %v1592_v3 = vpack.c.bf16 (!%p391_p9), %v463_v1, %v462_v0  ;;  %v447_v4 = vld [vmem:[%s3109_s1 + $0x8] sm:$0xff] (!%p391_p9)  ;;  %v465_v6 = vld [vmem:[%s3109_s1 + $0x98] sm:$0xff] (!%p391_p9)  ;;  %s431_s14 = sand.u32 (!%p391_p9), 1, %s1979_s26   ;;  %vm1399_vm9 = vcmask (!%p391_p9), 319488  }
  0x12   : > { %v1594_v7 = vpack.c.bf16 (!%p391_p9), %v447_v4, %v446_v2  ;;  %v1596_v8 = vpack.c.bf16 (!%p391_p9), %v465_v6, %v464_v5  ;;  %v448_v9 = vld [vmem:[%s3109_s1 + $0x10] sm:$0xff] (!%p391_p9)  ;;  %v449_v10 = vld [vmem:[%s3109_s1 + $0x18] sm:$0xff] (!%p391_p9)  ;;  %v466_v11 = vld [vmem:[%s3109_s1 + $0xa0] sm:$0xff] (!%p391_p9)  ;;  %s432_s21 = scalar_lea.vmem (!%p391_p9), [#allocation2], %s431_s14 }
  0x13   : > { %1593 = vmatprep.subr.bf16.mxu1 (!%p391_p9), %v1592_v3  ;;  %v467_v12 = vld [vmem:[%s3109_s1 + $0xa8] sm:$0xff] (!%p391_p9)  ;;  %v1598_v13 = vpack.c.bf16 (!%p391_p9), %v449_v10, %v448_v9  ;;  %v450_v15 = vld [vmem:[%s3109_s1 + $0x20] sm:$0xff] (!%p391_p9)  ;;  %v468_v17 = vld [vmem:[%s3109_s1 + $0xb0] sm:$0xff] (!%p391_p9)  ;;  %s1414_s22 = sshll.u32 (!%p391_p9), %s432_s21, 4  ;;  %s3068_s22 = int_to_ptr.vmem [resolvable:$true] %s1414_s22 }
  0x14   : > { %1595 = vmatpush3.bf16.msra.mxu1 (!%p391_p9), %v1594_v7  ;;  %v1600_v14 = vpack.c.bf16 (!%p391_p9), %v467_v12, %v466_v11  ;;  %v451_v16 = vld [vmem:[%s3109_s1 + $0x28] sm:$0xff] (!%p391_p9)  ;;  %v469_v18 = vld [vmem:[%s3109_s1 + $0xb8] sm:$0xff] (!%p391_p9)  ;;  %v452_v21 = vld [vmem:[%s3109_s1 + $0x30] sm:$0xff] (!%p391_p9)  ;;  %s1925_s16 = scalar_lea.vmem (!%p391_p9), %s3068_s22, 16 }
  0x15   : > { %1597 = vmatprep.subr.bf16.mxu1 (!%p391_p9), %v1596_v8  ;;  %v1602_v19 = vpack.c.bf16 (!%p391_p9), %v451_v16, %v450_v15  ;;  %v1604_v20 = vpack.c.bf16 (!%p391_p9), %v469_v18, %v468_v17  ;;  %v453_v22 = vld [vmem:[%s3109_s1 + $0x38] sm:$0xff] (!%p391_p9)  ;;  %v470_v23 = vld [vmem:[%s3109_s1 + $0xc0] sm:$0xff] (!%p391_p9)  ;;  %v471_v24 = vld [vmem:[%s3109_s1 + $0xc8] sm:$0xff] (!%p391_p9)  ;;  %p1926_p11 = scmp.ne.s32.totalorder (!%p391_p9), %s3068_s22, %s1925_s16 }
  0x16   : > { %v1606_v26 = vpack.c.bf16 (!%p391_p9), %v453_v22, %v452_v21  ;;  %v1608_v27 = vpack.c.bf16 (!%p391_p9), %v471_v24, %v470_v23  ;;  %v454_v28 = vld [vmem:[%s3109_s1 + $0x40] sm:$0xff] (!%p391_p9)  ;;  %v455_v29 = vld [vmem:[%s3109_s1 + $0x48] sm:$0xff] (!%p391_p9)  ;;  %v472_v30 = vld [vmem:[%s3109_s1 + $0xd0] sm:$0xff] (!%p391_p9) }
  0x17   : > { %v473_v31 = vld [vmem:[%s3109_s1 + $0xd8] sm:$0xff] (!%p391_p9)  ;;  %v1610_v32 = vpack.c.bf16 (!%p391_p9), %v455_v29, %v454_v28  ;;  %v456_v34 = vld [vmem:[%s3109_s1 + $0x50] sm:$0xff] (!%p391_p9)  ;;  %v474_v36 = vld [vmem:[%s3109_s1 + $0xe0] sm:$0xff] (!%p391_p9)  ;;  %p1927_p12 = pnand (!%p391_p9), %p1926_p11, %p2100_p5 }
  0x18   : > { %s434_s27 = scalar_select %p433_p10, %s2083_s29, 1  ;;  %1599 = vmatpush3.bf16.msra.mxu1 %v1598_v13  ;;  %v1612_v33 = vpack.c.bf16 %v473_v31, %v472_v30  ;;  %v457_v35 = vld [vmem:[%s3109_s1 + $0x58] sm:$0xff]  ;;  %v475_v37 = vld [vmem:[%s3109_s1 + $0xe8] sm:$0xff]  ;;  %v458_v40 = vld [vmem:[%s3109_s1 + $0x60] sm:$0xff] }
  0x19   : > { %1601 = vmatprep.subr.bf16.mxu1 %v1600_v14  ;;  %v1614_v38 = vpack.c.bf16 %v457_v35, %v456_v34  ;;  %v1616_v39 = vpack.c.bf16 %v475_v37, %v474_v36  ;;  %v459_v41 = vld [vmem:[%s3109_s1 + $0x68] sm:$0xff]  ;;  %v476_v42 = vld [vmem:[%s3109_s1 + $0xf0] sm:$0xff]  ;;  %v477_v43 = vld [vmem:[%s3109_s1 + $0xf8] sm:$0xff]  ;;  %p1928_p13 = pneg %p1927_p12 }
  0x1a   : > { %s1480_s20 = sshll.u32 %s434_s27, 6  ;;  %v1618_v44 = vpack.c.bf16 %v459_v41, %v458_v40  ;;  %v1620_v45 = vpack.c.bf16 %v477_v43, %v476_v42  ;;  %v460_v46 = vld [vmem:[%s3109_s1 + $0x70] sm:$0xff]  ;;  %v461_v47 = vld [vmem:[%s3109_s1 + $0x78] sm:$0xff]  ;;  %v494_v48 = vld [vmem:[%s3109_s1 + $0x180] sm:$0xff]  ;;  %s1477_s27 = sshll.u32 %s2083_s29, 4 }
  0x1b   : > { %s2157_s19 = scalar_lea.vmem %s3108_s0, %s1480_s20  ;;  %v495_v49 = vld [vmem:[%s3109_s1 + $0x188] sm:$0xff]  ;;  %v1622_v50 = vpack.c.bf16 %v461_v47, %v460_v46  ;;  %v478_v52 = vld [vmem:[%s3109_s1 + $0x100] sm:$0xff]  ;;  %v496_v54 = vld [vmem:[%s3109_s1 + $0x190] sm:$0xff]  ;;  %s3066_s30 = scalar_lea.hbm %s3121_s13, %s1477_s27 }
  0x1c   : > { %v439_v25 = vld [vmem:[%s2157_s19 + $0x8] sm:$0xff]  ;;  %1603 = vmatpush3.bf16.msra.mxu1 %v1602_v19  ;;  %v1624_v51 = vpack.c.bf16 %v495_v49, %v494_v48  ;;  %v497_v55 = vld [vmem:[%s3109_s1 + $0x198] sm:$0xff]  ;;  %v438_v56 = vld [vmem:[%s2157_s19] sm:$0xff]  ;;  %s1991_s29 = smov [#allocation2]  }
  0x1d   : > { %574 = vmatprep.mubr.f32.mxu1 %v439_v25  ;;  %1605 = vmatprep.subr.bf16.mxu1 %v1604_v20  ;;  %v479_v53 = vld [vmem:[%s3109_s1 + $0x108] sm:$0xff]  ;;  %v1628_v58 = vpack.c.bf16 %v497_v55, %v496_v54  ;;  %v480_v59 = vld [vmem:[%s3109_s1 + $0x110] sm:$0xff]  ;;  %v481_v60 = vld [vmem:[%s3109_s1 + $0x118] sm:$0xff]  ;;  %s1929_s20 = sshll.u32 %s1991_s29, 4  ;;  %s1930_s20 = int_to_ptr.vmem [resolvable:$false] %s1929_s20 }
  0x1e   : > { %v1626_v57 = vpack.c.bf16 %v479_v53, %v478_v52  ;;  %v443_v61 = vld [vmem:[%s2157_s19 + $0x28] sm:$0xff]  ;;  %v498_v62 = vld [vmem:[%s3109_s1 + $0x1a0] sm:$0xff]  ;;  %v1630_v0 = vpack.c.bf16 %v481_v60, %v480_v59  ;;  %v441_v5 = vld [vmem:[%s2157_s19 + $0x18] sm:$0xff]  ;;  %s1931_s17 = scalar_lea.vmem %s1930_s20, 32  ;;  %p1932_p0 = scmp.lt.s32.totalorder %s3068_s22, %s1930_s20 }
  0x1f   : > { %v499_v63 = vld [vmem:[%s3109_s1 + $0x1a8] sm:$0xff]  ;;  %v442_v1 = vld [vmem:[%s2157_s19 + $0x20] sm:$0xff]  ;;  %v500_v6 = vld [vmem:[%s3109_s1 + $0x1b0] sm:$0xff]  ;;  %p1933_p1 = scmp.lt.s32.totalorder %s1931_s17, %s1925_s16 }
  0x20   : > { %1607 = vmatpush3.bf16.msra.mxu1 %v1606_v26  ;;  %v1632_v2 = vpack.c.bf16 %v499_v63, %v498_v62  ;;  %v482_v3 = vld [vmem:[%s3109_s1 + $0x120] sm:$0xff]  ;;  %v483_v4 = vld [vmem:[%s3109_s1 + $0x128] sm:$0xff]  ;;  %v501_v7 = vld [vmem:[%s3109_s1 + $0x1b8] sm:$0xff] }
  0x21   : > { %1609 = vmatprep.subr.bf16.mxu1 %v1608_v27  ;;  %v1634_v8 = vpack.c.bf16 %v483_v4, %v482_v3  ;;  %v1636_v9 = vpack.c.bf16 %v501_v7, %v500_v6  ;;  %v484_v10 = vld [vmem:[%s3109_s1 + $0x130] sm:$0xff]  ;;  %v485_v11 = vld [vmem:[%s3109_s1 + $0x138] sm:$0xff]  ;;  %v502_v12 = vld [vmem:[%s3109_s1 + $0x1c0] sm:$0xff]  ;;  %p1934_p2 = por %p1933_p1, %p1932_p0 }
  0x22   : > { %v503_v13 = vld [vmem:[%s3109_s1 + $0x1c8] sm:$0xff]  ;;  %v1638_v14 = vpack.c.bf16 %v485_v11, %v484_v10  ;;  %v486_v16 = vld [vmem:[%s3109_s1 + $0x140] sm:$0xff]  ;;  %v504_v18 = vld [vmem:[%s3109_s1 + $0x1d0] sm:$0xff] }
  0x23   : > { %v1640_v15 = vpack.c.bf16 %v503_v13, %v502_v12  ;;  %v487_v17 = vld [vmem:[%s3109_s1 + $0x148] sm:$0xff]  ;;  %v505_v19 = vld [vmem:[%s3109_s1 + $0x1d8] sm:$0xff]  ;;  %v488_v22 = vld [vmem:[%s3109_s1 + $0x150] sm:$0xff]  ;;  %p1935_p3 = pnand %p1934_p2, %p1928_p13 }
  0x24   : > { %1611 = vmatpush3.bf16.msra.mxu1 %v1610_v32  ;;  %v1642_v20 = vpack.c.bf16 %v487_v17, %v486_v16  ;;  %v1644_v21 = vpack.c.bf16 %v505_v19, %v504_v18  ;;  %v489_v23 = vld [vmem:[%s3109_s1 + $0x158] sm:$0xff]  ;;  %v506_v24 = vld [vmem:[%s3109_s1 + $0x1e0] sm:$0xff]  ;;  %v507_v25 = vld [vmem:[%s3109_s1 + $0x1e8] sm:$0xff] }
  0x25   : > { %1613 = vmatprep.subr.bf16.mxu1 %v1612_v33  ;;  %v1646_v26 = vpack.c.bf16 %v489_v23, %v488_v22  ;;  %v1648_v27 = vpack.c.bf16 %v507_v25, %v506_v24  ;;  %v490_v28 = vld [vmem:[%s3109_s1 + $0x160] sm:$0xff]  ;;  %v491_v29 = vld [vmem:[%s3109_s1 + $0x168] sm:$0xff]  ;;  %v508_v30 = vld [vmem:[%s3109_s1 + $0x1f0] sm:$0xff] }
  0x26   : > { %v509_v31 = vld [vmem:[%s3109_s1 + $0x1f8] sm:$0xff]  ;;  %v1650_v32 = vpack.c.bf16 %v491_v29, %v490_v28  ;;  %v492_v34 = vld [vmem:[%s3109_s1 + $0x170] sm:$0xff]  ;;  %v711_v40 = vld [vmem:[%s3112_s4 + $0x8] sm:$0xff] }
  0x27   : > { %v1652_v33 = vpack.c.bf16 %v509_v31, %v508_v30  ;;  %v493_v35 = vld [vmem:[%s3109_s1 + $0x178] sm:$0xff]  ;;  %v440_v37 = vld [vmem:[%s2157_s19 + $0x10] sm:$0xff]  ;;  %v715_v41 = vld [vmem:[%s3112_s4 + $0x28] sm:$0xff] }
  0x28   : > { %1615 = vmatpush3.bf16.msra.mxu1 %v1614_v38  ;;  %v1654_v36 = vpack.c.bf16 %v493_v35, %v492_v34  ;;  %v445_v38 = vld [vmem:[%s2157_s19 + $0x38] sm:$0xff]  ;;  %v1656_v43 = vpack.c.bf16 %v715_v41, %v711_v40  ;;  %v714_v46 = vld [vmem:[%s3112_s4 + $0x20] sm:$0xff]  ;;  %v712_v49 = vld [vmem:[%s3112_s4 + $0x10] sm:$0xff] }
  0x29   : > { %1617 = vmatprep.subr.bf16.mxu1 %v1616_v39  ;;  %v444_v39 = vld [vmem:[%s2157_s19 + $0x30] sm:$0xff]  ;;  %v713_v42 = vld [vmem:[%s3112_s4 + $0x18] sm:$0xff]  ;;  %v723_v53 = vld [vmem:[%s3112_s4 + $0x68] sm:$0xff] }
  0x2a   : > { %1657 = vmatprep.subr.bf16.mxu0 %v1656_v43  ;;  %v721_v54 = vld [vmem:[%s3112_s4 + $0x58] sm:$0xff]  ;;  %v722_v59 = vld [vmem:[%s3112_s4 + $0x60] sm:$0xff]  ;;  %v720_v60 = vld [vmem:[%s3112_s4 + $0x50] sm:$0xff] }
  0x2b   : > { %v725_v55 = vld [vmem:[%s3112_s4 + $0x78] sm:$0xff]  ;;  %v724_v62 = vld [vmem:[%s3112_s4 + $0x70] sm:$0xff]  ;;  %v727_v63 = vld [vmem:[%s3112_s4 + $0x88] sm:$0xff] }
  0x2c   : > { %1619 = vmatpush3.bf16.msra.mxu1 %v1618_v44  ;;  %v717_v44 = vld [vmem:[%s3112_s4 + $0x38] sm:$0xff]  ;;  %v730_v7 = vld [vmem:[%s3112_s4 + $0xa0] sm:$0xff]  ;;  %v735_v11 = vld [vmem:[%s3112_s4 + $0xc8] sm:$0xff] }
  0x2d   : > { %1621 = vmatprep.subr.bf16.mxu1 %v1620_v45  ;;  %v710_v45 = vld [vmem:[%s3112_s4] sm:$0xff]  ;;  %v1688_v47 = vpack.c.bf16 %v717_v44, %v713_v42  ;;  %v729_v3 = vld [vmem:[%s3112_s4 + $0x98] sm:$0xff]  ;;  %v739_v12 = vld [vmem:[%s3112_s4 + $0xe8] sm:$0xff] }
  0x2e   : > { %v1658_v48 = vpack.c.bf16 %v714_v46, %v710_v45  ;;  %v733_v4 = vld [vmem:[%s3112_s4 + $0xb8] sm:$0xff]  ;;  %v734_v17 = vld [vmem:[%s3112_s4 + $0xc0] sm:$0xff]  ;;  %v743_v22 = vld [vmem:[%s3112_s4 + $0x108] sm:$0xff] }
  0x2f   : > { %v1696_v6 = vpack.c.bf16 %v733_v4, %v729_v3  ;;  %v737_v13 = vld [vmem:[%s3112_s4 + $0xd8] sm:$0xff]  ;;  %v738_v18 = vld [vmem:[%s3112_s4 + $0xe0] sm:$0xff]  ;;  %v747_v23 = vld [vmem:[%s3112_s4 + $0x128] sm:$0xff] }
  0x30   : > { %1623 = vmatpush3.bf16.msra.mxu1 %v1622_v50  ;;  %v716_v50 = vld [vmem:[%s3112_s4 + $0x30] sm:$0xff]  ;;  %1659 = vmatpush1.bf16.msra.mxu0 %v1658_v48  ;;  %v741_v16 = vld [vmem:[%s3112_s4 + $0xf8] sm:$0xff]  ;;  %v1672_v28 = vpack.c.bf16 %v747_v23, %v743_v22  ;;  %v742_v29 = vld [vmem:[%s3112_s4 + $0x100] sm:$0xff] }
  0x31   : > { %1625 = vmatprep.subr.bf16.mxu1 %v1624_v51  ;;  %v719_v51 = vld [vmem:[%s3112_s4 + $0x48] sm:$0xff]  ;;  %v1690_v52 = vpack.c.bf16 %v716_v50, %v712_v49  ;;  %v1700_v19 = vpack.c.bf16 %v741_v16, %v737_v13  ;;  %v745_v24 = vld [vmem:[%s3112_s4 + $0x118] sm:$0xff]  ;;  %v746_v30 = vld [vmem:[%s3112_s4 + $0x120] sm:$0xff] }
  0x32   : > { %v749_v25 = vld [vmem:[%s3112_s4 + $0x138] sm:$0xff]  ;;  %v744_v31 = vld [vmem:[%s3112_s4 + $0x110] sm:$0xff]  ;;  %v751_v34 = vld [vmem:[%s3112_s4 + $0x148] sm:$0xff] }
  0x33   : > { %575 = vmatmul.mubr.f32.vlgmr.msra.gmra.mrb[0].mxu1 %v438_v56  ;;  %v1660_v56 = vpack.c.bf16 %v723_v53, %v719_v51  ;;  %v755_v35 = vld [vmem:[%s3112_s4 + $0x168] sm:$0xff]  ;;  %v750_v41 = vld [vmem:[%s3112_s4 + $0x140] sm:$0xff]  ;;  %v752_v43 = vld [vmem:[%s3112_s4 + $0x150] sm:$0xff] }
  0x34   : > { %1627 = vmatpush3.bf16.msra.mxu1 %v1626_v57  ;;  %579 = vmatprep.mubr.f32.mxu1 %v443_v61  ;;  %v1692_v57 = vpack.c.bf16 %v725_v55, %v721_v54  ;;  %v1676_v40 = vpack.c.bf16 %v755_v35, %v751_v34  ;;  %v754_v42 = vld [vmem:[%s3112_s4 + $0x160] sm:$0xff]  ;;  %v756_v45 = vld [vmem:[%s3112_s4 + $0x170] sm:$0xff]  ;;  %v759_v46 = vld [vmem:[%s3112_s4 + $0x188] sm:$0xff] }
  0x35   : > { %1629 = vmatprep.subr.bf16.mxu1 %v1628_v58  ;;  %v718_v58 = vld [vmem:[%s3112_s4 + $0x40] sm:$0xff]  ;;  %1661 = vmatprep.subr.bf16.mxu0 %v1660_v56  ;;  %v761_v48 = vld [vmem:[%s3112_s4 + $0x198] sm:$0xff]  ;;  %v1678_v50 = vpack.c.bf16 %v754_v42, %v750_v41  ;;  %v1710_v51 = vpack.c.bf16 %v756_v45, %v752_v43  ;;  %v760_v55 = vld [vmem:[%s3112_s4 + $0x190] sm:$0xff] }
  0x36   : > { %v1662_v61 = vpack.c.bf16 %v722_v59, %v718_v58  ;;  %v765_v49 = vld [vmem:[%s3112_s4 + $0x1b8] sm:$0xff]  ;;  %v758_v53 = vld [vmem:[%s3112_s4 + $0x180] sm:$0xff]  ;;  %v767_v58 = vld [vmem:[%s3112_s4 + $0x1c8] sm:$0xff] }
  0x37   : > { %580 = vmatmul.mubr.f32.gmra.mrb[2].mxu1 %v442_v1  ;;  %v1694_v1 = vpack.c.bf16 %v724_v62, %v720_v60  ;;  %v762_v54 = vld [vmem:[%s3112_s4 + $0x1a0] sm:$0xff]  ;;  %v1712_v56 = vpack.c.bf16 %v765_v49, %v761_v48  ;;  %v771_v59 = vld [vmem:[%s3112_s4 + $0x1e8] sm:$0xff]  ;;  %v769_v60 = vld [vmem:[%s3112_s4 + $0x1d8] sm:$0xff] }
  0x38   : > { %1631 = vmatpush3.bf16.msra.mxu1 %v1630_v0  ;;  %649 = vmatprep.mubr.f32.mxu1 %v441_v5  ;;  %v731_v0 = vld [vmem:[%s3112_s4 + $0xa8] sm:$0xff]  ;;  %v726_v5 = vld [vmem:[%s3112_s4 + $0x80] sm:$0xff]  ;;  %v1682_v62 = vpack.c.bf16 %v762_v54, %v758_v53  ;;  %v768_v4 = vld [vmem:[%s3112_s4 + $0x1d0] sm:$0xff] }
  0x39   : > { %1633 = vmatprep.subr.bf16.mxu1 %v1632_v2  ;;  %v1664_v2 = vpack.c.bf16 %v731_v0, %v727_v63  ;;  %1663 = vmatpush1.bf16.msra.mxu0 %v1662_v61  ;;  %v1666_v10 = vpack.c.bf16 %v730_v7, %v726_v5  ;;  %v773_v61 = vld [vmem:[%s3112_s4 + $0x1f8] sm:$0xff]  ;;  %v1684_v0 = vpack.c.bf16 %v771_v59, %v767_v58  ;;  %v772_v5 = vld [vmem:[%s3112_s4 + $0x1f0] sm:$0xff]  ;;  %v981_v41 = vld [vmem:[%s3115_s7 + $0x8] sm:$0xff] }
  0x3a   : > { %v1716_v3 = vpack.c.bf16 %v773_v61, %v769_v60  ;;  %v1718_v7 = vpack.c.bf16 %v772_v5, %v768_v4  ;;  %v983_v42 = vld [vmem:[%s3115_s7 + $0x18] sm:$0xff]  ;;  %v980_v54 = vld [vmem:[%s3115_s7] sm:$0xff] }
  0x3b   : > { %1665 = vmatprep.subr.bf16.mxu0 %v1664_v2  ;;  %v770_v2 = vld [vmem:[%s3112_s4 + $0x1e0] sm:$0xff]  ;;  %v1720_v43 = vpack.c.bf16 %v983_v42, %v981_v41  ;;  %v1014_v42 = vld [vmem:[%s3115_s7 + $0x110] sm:$0xff] }
  0x3c   : > { %1635 = vmatpush3.bf16.msra.mxu1 %v1634_v8  ;;  %v728_v8 = vld [vmem:[%s3112_s4 + $0x90] sm:$0xff]  ;;  %v988_v5 = vld [vmem:[%s3115_s7 + $0x40] sm:$0xff] }
  0x3d   : > { %1637 = vmatprep.subr.bf16.mxu1 %v1636_v9  ;;  %v732_v9 = vld [vmem:[%s3112_s4 + $0xb0] sm:$0xff]  ;;  %1667 = vmatpush1.bf16.msra.mxu0 %v1666_v10  ;;  %v1012_v41 = vld [vmem:[%s3115_s7 + $0x100] sm:$0xff] }
  0x40   : > { %1639 = vmatpush3.bf16.msra.mxu1 %v1638_v14  ;;  %v1698_v14 = vpack.c.bf16 %v732_v9, %v728_v8 }
  0x41   : > { %1641 = vmatprep.subr.bf16.mxu1 %v1640_v15  ;;  %v1668_v15 = vpack.c.bf16 %v739_v12, %v735_v11 }
  0x43   : > { %1669 = vmatprep.subr.bf16.mxu0 %v1668_v15 }
  0x44   : > { %1643 = vmatpush3.bf16.msra.mxu1 %v1642_v20  ;;  %v736_v20 = vld [vmem:[%s3112_s4 + $0xd0] sm:$0xff] }
  0x45   : > { %1645 = vmatprep.subr.bf16.mxu1 %v1644_v21  ;;  %v740_v21 = vld [vmem:[%s3112_s4 + $0xf0] sm:$0xff] }
  0x48   : > { %1647 = vmatpush3.bf16.msra.mxu1 %v1646_v26  ;;  %v1670_v26 = vpack.c.bf16 %v738_v18, %v734_v17  ;;  %v1475_v17 = vld [vmem:[%s3110_s2] ss:$0 sm:$0xff] }
  0x49   : > { %1649 = vmatprep.subr.bf16.mxu1 %v1648_v27  ;;  %v1702_v27 = vpack.c.bf16 %v740_v21, %v736_v20  ;;  %v1476_v20 = vld [vmem:[%s3111_s3] ss:$0 sm:$0xff] }
  0x4a   : > { %1671 = vmatpush1.bf16.msra.mxu0 %v1670_v26 }
  0x4b   : > { %1673 = vmatprep.subr.bf16.mxu0 %v1672_v28 }
  0x4c   : > { %1651 = vmatpush3.bf16.msra.mxu1 %v1650_v32  ;;  %v1704_v32 = vpack.c.bf16 %v749_v25, %v745_v24 }
  0x4d   : > { %1653 = vmatprep.subr.bf16.mxu1 %v1652_v33  ;;  %v748_v33 = vld [vmem:[%s3112_s4 + $0x130] sm:$0xff] }
  0x50   : > { %1655 = vmatpush3.bf16.msra.mxu1 %v1654_v36  ;;  %v753_v36 = vld [vmem:[%s3112_s4 + $0x158] sm:$0xff] }
  0x51   : > { %1689 = vmatprep.subr.bf16.mxu1 %v1688_v47  ;;  %v763_v47 = vld [vmem:[%s3112_s4 + $0x1a8] sm:$0xff] }
  0x53   : > { %650 = vmatmul.mubr.f32.vlgmr.msra.gmra.mrb[4].mxu1 %v440_v37  ;;  %v757_v37 = vld [vmem:[%s3112_s4 + $0x178] sm:$0xff] }
  0x54   : > { %654 = vmatprep.mubr.f32.mxu1 %v445_v38  ;;  %1691 = vmatpush1.bf16.msra.mxu1 %v1690_v52  ;;  %v1674_v38 = vpack.c.bf16 %v746_v30, %v742_v29  ;;  %v1708_v44 = vpack.c.bf16 %v757_v37, %v753_v36  ;;  %v1680_v52 = vpack.c.bf16 %v763_v47, %v759_v46 }
  0x55   : > { %1693 = vmatprep.subr.bf16.mxu1 %v1692_v57  ;;  %v764_v57 = vld [vmem:[%s3112_s4 + $0x1b0] sm:$0xff] }
  0x56   : > { %1675 = vmatpush1.bf16.msra.mxu0 %v1674_v38  ;;  %v1714_v63 = vpack.c.bf16 %v764_v57, %v760_v55  ;;  %v982_v55 = vld [vmem:[%s3115_s7 + $0x10] sm:$0xff]  ;;  %v987_v57 = vld [vmem:[%s3115_s7 + $0x38] sm:$0xff] }
  0x57   : > { %655 = vmatmul.mubr.f32.gmra.mrb[6].mxu1 %v444_v39  ;;  %v1706_v39 = vpack.c.bf16 %v748_v33, %v744_v31  ;;  %1677 = vmatprep.subr.bf16.mxu0 %v1676_v40  ;;  %v1722_v59 = vpack.c.bf16 %v982_v55, %v980_v54  ;;  %v1022_v54 = vld [vmem:[%s3115_s7 + $0x150] sm:$0xff]  ;;  %v1025_v55 = vld [vmem:[%s3115_s7 + $0x168] sm:$0xff] }
  0x58   : > { %1695 = vmatpush1.bf16.msra.mxu1 %v1694_v1  ;;  %v766_v1 = vld [vmem:[%s3112_s4 + $0x1c0] sm:$0xff] }
  0x59   : > { %1697 = vmatprep.subr.bf16.mxu1 %v1696_v6  ;;  %v1686_v6 = vpack.c.bf16 %v770_v2, %v766_v1  ;;  %v989_v1 = vld [vmem:[%s3115_s7 + $0x48] sm:$0xff]  ;;  %v991_v2 = vld [vmem:[%s3115_s7 + $0x58] sm:$0xff] }
  0x5a   : > { %1679 = vmatpush1.bf16.msra.mxu0 %v1678_v50  ;;  %v1728_v4 = vpack.c.bf16 %v991_v2, %v989_v1  ;;  %v1028_v1 = vld [vmem:[%s3115_s7 + $0x180] sm:$0xff]  ;;  %v1030_v2 = vld [vmem:[%s3115_s7 + $0x190] sm:$0xff] }
  0x5b   : > { %1681 = vmatprep.subr.bf16.mxu0 %v1680_v52 }
  0x5c   : > { %1699 = vmatpush1.bf16.msra.mxu1 %v1698_v14 }
  0x5d   : > { %1701 = vmatprep.subr.bf16.mxu1 %v1700_v19 }
  0x5e   : > { %1683 = vmatpush1.bf16.msra.mxu0 %v1682_v62  ;;  %v984_v62 = vld [vmem:[%s3115_s7 + $0x20] sm:$0xff] }
  0x5f   : > { %1685 = vmatprep.subr.bf16.mxu0 %v1684_v0 }
  0x60   : > { %1703 = vmatpush1.bf16.msra.mxu1 %v1702_v27 }
  0x61   : > { %1705 = vmatprep.subr.bf16.mxu1 %v1704_v32 }
  0x62   : > { %1687 = vmatpush1.bf16.msra.mxu0 %v1686_v6  ;;  %v990_v6 = vld [vmem:[%s3115_s7 + $0x50] sm:$0xff] }
  0x63   : > { %1721 = vmatprep.subr.bf16.mxu0 %v1720_v43  ;;  %v1017_v43 = vld [vmem:[%s3115_s7 + $0x128] sm:$0xff] }
  0x64   : > { %1707 = vmatpush1.bf16.msra.mxu1 %v1706_v39  ;;  %v1989_v39 = vmov 0.0  }
  0x65   : > { %1709 = vmatprep.subr.bf16.mxu1 %v1708_v44  ;;  %838 = vmatprep.mubr.f32.mxu0 %v1989_v39 }
  0x66   : > { %909 = vmatprep.mubr.f32.mxu1 %v1989_v39 }
  0x68   : > { %1711 = vmatpush1.bf16.msra.mxu1 %v1710_v51 }
  0x69   : > { %1713 = vmatprep.subr.bf16.mxu1 %v1712_v56  ;;  %v985_v56 = vld [vmem:[%s3115_s7 + $0x28] sm:$0xff] }
  0x6a   : > { %v1724_v61 = vpack.c.bf16 %v987_v57, %v985_v56  ;;  %v1027_v56 = vld [vmem:[%s3115_s7 + $0x178] sm:$0xff] }
  0x6c   : > { %1715 = vmatpush1.bf16.msra.mxu1 %v1714_v63  ;;  %v986_v63 = vld [vmem:[%s3115_s7 + $0x30] sm:$0xff] }
  0x6d   : > { %1717 = vmatprep.subr.bf16.mxu1 %v1716_v3  ;;  %v1726_v3 = vpack.c.bf16 %v986_v63, %v984_v62  ;;  %v1031_v62 = vld [vmem:[%s3115_s7 + $0x198] sm:$0xff] }
  0x70   : > { %1719 = vmatpush1.bf16.msra.mxu1 %v1718_v7  ;;  %v993_v7 = vld [vmem:[%s3115_s7 + $0x68] sm:$0xff] }
 0x106   : > { %v1513_v8 = vpop.f32.mrb[0].mxu1 }
 0x107   : > { %v1514_v9 = vpop.f32.mrb[1].mxu1 }
 0x108   : > { %v1515_v10 = vadd.f32 %v1514_v9, %v1513_v8  ;;  %v995_v8 = vld [vmem:[%s3115_s7 + $0x78] sm:$0xff]  ;;  %v1730_v9 = vpack.c.bf16 %v990_v6, %v988_v5  ;;  %v1770_v5 = vpack.c.bf16 %v1030_v2, %v1028_v1 }
 0x10a   : > { %v1516_v11 = vpop.f32.mrb[2].mxu1 }
 0x10b   : > { %v1517_v12 = vpop.f32.mrb[3].mxu1 }
 0x10c   : > { %v1518_v13 = vadd.f32 %v1517_v12, %v1516_v11  ;;  %v992_v11 = vld [vmem:[%s3115_s7 + $0x60] sm:$0xff]  ;;  %v994_v12 = vld [vmem:[%s3115_s7 + $0x70] sm:$0xff] }
 0x126   : > { %v1551_v14 = vpop.f32.mrb[4].mxu1 }
 0x127   : > { %v1552_v15 = vpop.f32.mrb[5].mxu1 }
 0x128   : > { %v1553_v16 = vadd.f32 %v1552_v15, %v1551_v14  ;;  %v999_v14 = vld [vmem:[%s3115_s7 + $0x98] sm:$0xff]  ;;  %v1734_v15 = vpack.c.bf16 %v994_v12, %v992_v11 }
 0x12a   : > { %v652_v18 = vadd.f32 %v1553_v16, %v1515_v10  ;;  %v1554_v19 = vpop.f32.mrb[6].mxu1  ;;  %v1732_v10 = vpack.c.bf16 %v995_v8, %v993_v7  ;;  %v1032_v7 = vld [vmem:[%s3115_s7 + $0x1a0] sm:$0xff]  ;;  %v1034_v8 = vld [vmem:[%s3115_s7 + $0x1b0] sm:$0xff] }
 0x12b   : > { %v1555_v21 = vpop.f32.mrb[7].mxu1 }
 0x12c   : > { %v667_v22 = vmul.f32 %v1475_v17, %v652_v18  ;;  %v1556_v23 = vadd.f32 %v1555_v21, %v1554_v19  ;;  %v998_v18 = vld [vmem:[%s3115_s7 + $0x90] sm:$0xff]  ;;  %v1001_v19 = vld [vmem:[%s3115_s7 + $0xa8] sm:$0xff] }
 0x12e   : > { %v676_v24 = vadd.f32 %v1476_v20, %v667_v22  ;;  %v657_v25 = vadd.f32 %v1556_v23, %v1518_v13  ;;  %v997_v13 = vld [vmem:[%s3115_s7 + $0x88] sm:$0xff]  ;;  %v1000_v23 = vld [vmem:[%s3115_s7 + $0xa0] sm:$0xff] }
 0x12f   : > { %v1736_v16 = vpack.c.bf16 %v999_v14, %v997_v13  ;;  %v2694_v13 = vld [vmem:[%s3113_s5] sm:$0xf]  ;;  %v1037_v14 = vld [vmem:[%s3115_s7 + $0x1c8] sm:$0xff] }
 0x130   : > { %v680_v26 = vmul.f32 0.2, %v676_v24  ;;  %v668_v27 = vmul.f32 %v1475_v17, %v657_v25  ;;  %vm678_vm0 = vcmp.gt.f32.partialorder %v676_v24, 0.0  ;;  %v996_v17 = vld [vmem:[%s3115_s7 + $0x80] sm:$0xff]  ;;  %v1005_v25 = vld [vmem:[%s3115_s7 + $0xc8] sm:$0xff] }
 0x131   : > { %v1738_v21 = vpack.c.bf16 %v998_v18, %v996_v17  ;;  %v1036_v18 = vld [vmem:[%s3115_s7 + $0x1c0] sm:$0xff] }
 0x132   : > { %v677_v28 = vadd.f32 %v1476_v20, %v668_v27  ;;  %v682_v30 = vsel %vm678_vm0, %v676_v24, %v680_v26  ;;  %v1003_v20 = vld [vmem:[%s3115_s7 + $0xb8] sm:$0xff]  ;;  %v1002_v24 = vld [vmem:[%s3115_s7 + $0xb0] sm:$0xff] }
 0x133   : > { %v685_v32 = vsel %vm684_vm2, %v682_v30, -inf  ;;  %v694_v34 = vsel %vm684_vm2, %v682_v30, 0.0  ;;  %v1740_v22 = vpack.c.bf16 %v1003_v20, %v1001_v19  ;;  %v1007_v26 = vld [vmem:[%s3115_s7 + $0xd8] sm:$0xff]  ;;  %v1742_v27 = vpack.c.bf16 %v1002_v24, %v1000_v23  ;;  %v1006_v30 = vld [vmem:[%s3115_s7 + $0xd0] sm:$0xff]  ;;  %v2714_v20 = vld [vmem:[%s3114_s6] sm:$0xf] }
 0x134   : > { %vm679_vm1 = vcmp.gt.f32.partialorder %v677_v28, 0.0  ;;  %v681_v29 = vmul.f32 0.2, %v677_v28  ;;  %v1038_v19 = vld [vmem:[%s3115_s7 + $0x1d0] sm:$0xff]  ;;  %v1041_v23 = vld [vmem:[%s3115_s7 + $0x1e8] sm:$0xff]  ;;  %v1043_v24 = vld [vmem:[%s3115_s7 + $0x1f8] sm:$0xff] }
 0x136   : > { %v683_v31 = vsel %vm679_vm1, %v677_v28, %v681_v29  ;;  %v1744_v28 = vpack.c.bf16 %v1007_v26, %v1005_v25  ;;  %v1004_v29 = vld [vmem:[%s3115_s7 + $0xc0] sm:$0xff]  ;;  %v1780_v25 = vpack.c.bf16 %v1043_v24, %v1041_v23 }
 0x137   : > { %v686_v33 = vsel %vm684_vm2, %v683_v31, -inf  ;;  %v695_v35 = vsel %vm684_vm2, %v683_v31, 0.0  ;;  %v1009_v31 = vld [vmem:[%s3115_s7 + $0xe8] sm:$0xff]  ;;  %v1040_v26 = vld [vmem:[%s3115_s7 + $0x1e0] sm:$0xff] }
 0x138   : > { %v687_v36 = vmax.f32 %v685_v32, %v686_v33  ;;  %v696_v37 = vadd.f32 %v695_v35, %v694_v34  ;;  %v1011_v32 = vld [vmem:[%s3115_s7 + $0xf8] sm:$0xff]  ;;  %v1746_v33 = vpack.c.bf16 %v1006_v30, %v1004_v29  ;;  %v1008_v35 = vld [vmem:[%s3115_s7 + $0xe0] sm:$0xff]  ;;  %v1045_v29 = vld [vmem:[%s3115_s7 + $0x208] sm:$0xff] }
 0x139   : > { %v1748_v34 = vpack.c.bf16 %v1011_v32, %v1009_v31  ;;  %v1047_v30 = vld [vmem:[%s3115_s7 + $0x218] sm:$0xff]  ;;  %v1312_v32 = vld [vmem:[%s3119_s11 + $0x80] sm:$0xff] }
 0x13a   : > { %v697_v38 = vrot.slane %v696_v37, 4  ;;  %v688_v49 = vrot.slane %v687_v36, 4  ;;  %v1784_v31 = vpack.c.bf16 %v1047_v30, %v1045_v29  ;;  %v1048_v29 = vld [vmem:[%s3115_s7 + $0x220] sm:$0xff]  ;;  %v1050_v30 = vld [vmem:[%s3115_s7 + $0x230] sm:$0xff] }
 0x13c   : > { %v698_v40 = vadd.f32 %v697_v38, %v696_v37  ;;  %v689_v50 = vmax.f32 %v687_v36, %v688_v49  ;;  %v1010_v36 = vld [vmem:[%s3115_s7 + $0xf0] sm:$0xff]  ;;  %v1013_v37 = vld [vmem:[%s3115_s7 + $0x108] sm:$0xff]  ;;  %v1015_v38 = vld [vmem:[%s3115_s7 + $0x118] sm:$0xff] }
 0x13d   : > { %v1750_v39 = vpack.c.bf16 %v1010_v36, %v1008_v35  ;;  %v1021_v49 = vld [vmem:[%s3115_s7 + $0x148] sm:$0xff] }
 0x13e   : > { %v699_v44 = vrot.slane %v698_v40, 2  ;;  %v690_v51 = vrot.slane %v689_v50, 2  ;;  %v1297_v36 = vld [vmem:[%s3119_s11 + $0x8] sm:$0xff] }
 0x140   : > { %v700_v45 = vadd.f32 %v699_v44, %v698_v40  ;;  %v691_v52 = vmax.f32 %v689_v50, %v690_v51  ;;  %v1752_v40 = vpack.c.bf16 %v1015_v38, %v1013_v37  ;;  %v1019_v44 = vld [vmem:[%s3115_s7 + $0x138] sm:$0xff]  ;;  %v1314_v37 = vld [vmem:[%s3119_s11 + $0x90] sm:$0xff] }
 0x141   : > { %v1023_v50 = vld [vmem:[%s3115_s7 + $0x158] sm:$0xff] }
 0x142   : > { %v701_v46 = vrot.slane %v700_v45, 1  ;;  %v692_v53 = vrot.slane %v691_v52, 1  ;;  %v1315_v38 = vld [vmem:[%s3119_s11 + $0x98] sm:$0xff] }
 0x144   : > { %v702_v47 = vadd.f32 %v701_v46, %v700_v45  ;;  %v693_v58 = vmax.f32 %v691_v52, %v692_v53  ;;  %v1754_v45 = vpack.c.bf16 %v1014_v42, %v1012_v41  ;;  %v1756_v46 = vpack.c.bf16 %v1019_v44, %v1017_v43  ;;  %v1020_v53 = vld [vmem:[%s3115_s7 + $0x140] sm:$0xff]  ;;  %v1298_v41 = vld [vmem:[%s3119_s11 + $0x10] sm:$0xff]  ;;  %v1299_v42 = vld [vmem:[%s3119_s11 + $0x18] sm:$0xff] }
 0x145   : > { %v1760_v52 = vpack.c.bf16 %v1023_v50, %v1021_v49  ;;  %v1762_v57 = vpack.c.bf16 %v1022_v54, %v1020_v53  ;;  %v1316_v43 = vld [vmem:[%s3119_s11 + $0xa0] sm:$0xff]  ;;  %v1317_v44 = vld [vmem:[%s3119_s11 + $0xa8] sm:$0xff]  ;;  %v1318_v49 = vld [vmem:[%s3119_s11 + $0xb0] sm:$0xff] }
 0x146   : > { %v704_v48 = vmul.f32 0.0625, %v702_v47  ;;  %v1016_v47 = vld [vmem:[%s3115_s7 + $0x120] sm:$0xff]  ;;  %v1319_v50 = vld [vmem:[%s3119_s11 + $0xb8] sm:$0xff]  ;;  %v1302_v53 = vld [vmem:[%s3119_s11 + $0x30] sm:$0xff] }
 0x147   : > { %v1303_v54 = vld [vmem:[%s3119_s11 + $0x38] sm:$0xff] }
 0x148   : > { %706 = vrot.lane.b32.xlu0 %v704_v48, %s1990_s15  ;;  %v1018_v48 = vld [vmem:[%s3115_s7 + $0x130] sm:$0xff]  ;;  %s1402_s15 = scalar_lea.sflag [#allocation3], %s431_s14 }
 0x149   : > { %v1758_v51 = vpack.c.bf16 %v1018_v48, %v1016_v47  ;;  %v1300_v47 = vld [vmem:[%s3119_s11 + $0x20] sm:$0xff]  ;;  %v1301_v48 = vld [vmem:[%s3119_s11 + $0x28] sm:$0xff] }
 0x1ba   : > { %v707_v60 = vpop.permute.xlu0 %706 }
 0x1bb   : > { %v709_v0 = vsel %vm684_vm2, %v693_v58, %v707_v60  ;;  %v1764_v58 = vpack.c.bf16 %v1027_v56, %v1025_v55  ;;  %v1026_v60 = vld [vmem:[%s3115_s7 + $0x170] sm:$0xff]  ;;  %v1320_v55 = vld [vmem:[%s3119_s11 + $0xc0] sm:$0xff]  ;;  %v1321_v56 = vld [vmem:[%s3119_s11 + $0xc8] sm:$0xff] }
 0x1bc   : > { %839 = vmatmul.mubr.f32.vlgmr.msra.gmra.mrb[0].mxu0 %v709_v0  ;;  %910 = vmatmul.mubr.f32.vlgmr.msra.gmra.mrb[8].mxu1 %v709_v0 }
 0x1bd   : > { %1723 = vmatpush1.bf16.msra.mxu0 %v1722_v59  ;;  %v1024_v59 = vld [vmem:[%s3115_s7 + $0x160] sm:$0xff] }
 0x1be   : > { %1725 = vmatprep.subr.bf16.mxu0 %v1724_v61  ;;  %v1029_v61 = vld [vmem:[%s3115_s7 + $0x188] sm:$0xff]  ;;  %v1766_v63 = vpack.c.bf16 %v1026_v60, %v1024_v59  ;;  %v1304_v59 = vld [vmem:[%s3119_s11 + $0x40] sm:$0xff] }
 0x1bf   : > { %v1768_v0 = vpack.c.bf16 %v1031_v62, %v1029_v61  ;;  %v1305_v60 = vld [vmem:[%s3119_s11 + $0x48] sm:$0xff] }
 0x1c0   : > { %v1866_v61 = vpack.c.bf16 %v1305_v60, %v1304_v59 }
 0x1c1   : > { %1727 = vmatpush1.bf16.msra.mxu0 %v1726_v3  ;;  %v1033_v3 = vld [vmem:[%s3115_s7 + $0x1a8] sm:$0xff] }
 0x1c2   : > { %1729 = vmatprep.subr.bf16.mxu0 %v1728_v4  ;;  %v1035_v4 = vld [vmem:[%s3115_s7 + $0x1b8] sm:$0xff] }
 0x1c3   : > { %v1772_v6 = vpack.c.bf16 %v1035_v4, %v1033_v3 }
 0x1c5   : > { %1731 = vmatpush1.bf16.msra.mxu0 %v1730_v9  ;;  %v1774_v9 = vpack.c.bf16 %v1034_v8, %v1032_v7 }
 0x1c6   : > { %1733 = vmatprep.subr.bf16.mxu0 %v1732_v10  ;;  %v918_v10 = vlaneseq }
 0x1c8   : > { %v2688_v11 = vshrl.u32 %v918_v10, 7 }
 0x1c9   : > { %1735 = vmatpush1.bf16.msra.mxu0 %v1734_v15  ;;  %v1039_v15 = vld [vmem:[%s3115_s7 + $0x1d8] sm:$0xff] }
 0x1ca   : > { %1737 = vmatprep.subr.bf16.mxu0 %v1736_v16  ;;  %v928_v12 = vsub.s32 2, %v2688_v11  ;;  %v1776_v17 = vpack.c.bf16 %v1039_v15, %v1037_v14  ;;  %v2798_v62 = vsub.s32 0, %v2688_v11 }
 0x1cc   : > { %v2703_v16 = vrot.slane %v2694_v13, %v928_v12  ;;  %v921_v1 = vrot.slane %v2694_v13, %v2798_v62  ;;  %v947_v4 = vrot.slane %v2714_v20, %v2798_v62 }
 0x1cd   : > { %1739 = vmatpush1.bf16.msra.mxu0 %v1738_v21  ;;  %v1778_v21 = vpack.c.bf16 %v1038_v19, %v1036_v18 }
 0x1ce   : > { %1741 = vmatprep.subr.bf16.mxu0 %v1740_v22  ;;  %v2717_v22 = vrot.slane %v2714_v20, %v928_v12 }
 0x1d1   : > { %1743 = vmatpush1.bf16.msra.mxu0 %v1742_v27  ;;  %v1042_v27 = vld [vmem:[%s3115_s7 + $0x1f0] sm:$0xff] }
 0x1d2   : > { %1745 = vmatprep.subr.bf16.mxu0 %v1744_v28  ;;  %v1782_v28 = vpack.c.bf16 %v1042_v27, %v1040_v26 }
 0x1d5   : > { %1747 = vmatpush1.bf16.msra.mxu0 %v1746_v33  ;;  %v1313_v33 = vld [vmem:[%s3119_s11 + $0x88] sm:$0xff] }
 0x1d6   : > { %1749 = vmatprep.subr.bf16.mxu0 %v1748_v34  ;;  %v1296_v34 = vld [vmem:[%s3119_s11] sm:$0xff]  ;;  %v1848_v35 = vpack.c.bf16 %v1313_v33, %v1312_v32  ;;  %v1053_v32 = vld [vmem:[%s3115_s7 + $0x248] sm:$0xff]  ;;  %v1055_v33 = vld [vmem:[%s3115_s7 + $0x258] sm:$0xff] }
 0x1d8   : > { %1849 = vmatprep.subr.bf16.mxu1 %v1848_v35  ;;  %v1790_v35 = vpack.c.bf16 %v1050_v30, %v1048_v29  ;;  %v1088_v30 = vld [vmem:[%s3115_s7 + $0x360] sm:$0xff] }
 0x1d9   : > { %1751 = vmatpush1.bf16.msra.mxu0 %v1750_v39  ;;  %v1850_v39 = vpack.c.bf16 %v1297_v36, %v1296_v34  ;;  %v1792_v36 = vpack.c.bf16 %v1055_v33, %v1053_v32  ;;  %v1093_v32 = vld [vmem:[%s3115_s7 + $0x388] sm:$0xff]  ;;  %v1095_v33 = vld [vmem:[%s3115_s7 + $0x398] sm:$0xff] }
 0x1da   : > { %1753 = vmatprep.subr.bf16.mxu0 %v1752_v40  ;;  %v1852_v40 = vpack.c.bf16 %v1315_v38, %v1314_v37  ;;  %v1052_v37 = vld [vmem:[%s3115_s7 + $0x240] sm:$0xff]  ;;  %v1054_v38 = vld [vmem:[%s3115_s7 + $0x250] sm:$0xff] }
 0x1db   : > { %1851 = vmatpush3.bf16.msra.mxu1 %v1850_v39  ;;  %v1057_v39 = vld [vmem:[%s3115_s7 + $0x268] sm:$0xff] }
 0x1dc   : > { %1853 = vmatprep.subr.bf16.mxu1 %v1852_v40  ;;  %v1059_v40 = vld [vmem:[%s3115_s7 + $0x278] sm:$0xff] }
 0x1dd   : > { %1755 = vmatpush1.bf16.msra.mxu0 %v1754_v45  ;;  %v1854_v45 = vpack.c.bf16 %v1299_v42, %v1298_v41  ;;  %v1794_v41 = vpack.c.bf16 %v1054_v38, %v1052_v37  ;;  %v1796_v42 = vpack.c.bf16 %v1059_v40, %v1057_v39  ;;  %v1094_v37 = vld [vmem:[%s3115_s7 + $0x390] sm:$0xff]  ;;  %v1097_v38 = vld [vmem:[%s3115_s7 + $0x3a8] sm:$0xff]  ;;  %v1099_v39 = vld [vmem:[%s3115_s7 + $0x3b8] sm:$0xff] }
 0x1de   : > { %1757 = vmatprep.subr.bf16.mxu0 %v1756_v46  ;;  %v1856_v46 = vpack.c.bf16 %v1317_v44, %v1316_v43  ;;  %v1056_v43 = vld [vmem:[%s3115_s7 + $0x260] sm:$0xff]  ;;  %v1058_v44 = vld [vmem:[%s3115_s7 + $0x270] sm:$0xff] }
 0x1df   : > { %1855 = vmatpush3.bf16.msra.mxu1 %v1854_v45  ;;  %v1061_v45 = vld [vmem:[%s3115_s7 + $0x288] sm:$0xff] }
 0x1e0   : > { %1857 = vmatprep.subr.bf16.mxu1 %v1856_v46  ;;  %v1063_v46 = vld [vmem:[%s3115_s7 + $0x298] sm:$0xff] }
 0x1e1   : > { %1759 = vmatpush1.bf16.msra.mxu0 %v1758_v51  ;;  %v1858_v51 = vpack.c.bf16 %v1301_v48, %v1300_v47  ;;  %v1798_v47 = vpack.c.bf16 %v1058_v44, %v1056_v43  ;;  %v1800_v48 = vpack.c.bf16 %v1063_v46, %v1061_v45  ;;  %v1098_v43 = vld [vmem:[%s3115_s7 + $0x3b0] sm:$0xff]  ;;  %v1101_v44 = vld [vmem:[%s3115_s7 + $0x3c8] sm:$0xff]  ;;  %v1103_v45 = vld [vmem:[%s3115_s7 + $0x3d8] sm:$0xff] }
 0x1e2   : > { %1761 = vmatprep.subr.bf16.mxu0 %v1760_v52  ;;  %v1860_v52 = vpack.c.bf16 %v1319_v50, %v1318_v49  ;;  %v1060_v49 = vld [vmem:[%s3115_s7 + $0x280] sm:$0xff]  ;;  %v1062_v50 = vld [vmem:[%s3115_s7 + $0x290] sm:$0xff] }
 0x1e3   : > { %1859 = vmatpush3.bf16.msra.mxu1 %v1858_v51  ;;  %v1065_v51 = vld [vmem:[%s3115_s7 + $0x2a8] sm:$0xff] }
 0x1e4   : > { %1861 = vmatprep.subr.bf16.mxu1 %v1860_v52  ;;  %v1067_v52 = vld [vmem:[%s3115_s7 + $0x2b8] sm:$0xff] }
 0x1e5   : > { %1763 = vmatpush1.bf16.msra.mxu0 %v1762_v57  ;;  %v1862_v57 = vpack.c.bf16 %v1303_v54, %v1302_v53  ;;  %v1802_v53 = vpack.c.bf16 %v1062_v50, %v1060_v49  ;;  %v1804_v54 = vpack.c.bf16 %v1067_v52, %v1065_v51  ;;  %v1102_v49 = vld [vmem:[%s3115_s7 + $0x3d0] sm:$0xff]  ;;  %v1105_v50 = vld [vmem:[%s3115_s7 + $0x3e8] sm:$0xff]  ;;  %v1107_v51 = vld [vmem:[%s3115_s7 + $0x3f8] sm:$0xff] }
 0x1e6   : > { %1765 = vmatprep.subr.bf16.mxu0 %v1764_v58  ;;  %v1864_v58 = vpack.c.bf16 %v1321_v56, %v1320_v55  ;;  %v1064_v55 = vld [vmem:[%s3115_s7 + $0x2a0] sm:$0xff]  ;;  %v1066_v56 = vld [vmem:[%s3115_s7 + $0x2b0] sm:$0xff] }
 0x1e7   : > { %1863 = vmatpush3.bf16.msra.mxu1 %v1862_v57  ;;  %v1069_v57 = vld [vmem:[%s3115_s7 + $0x2c8] sm:$0xff]  ;;  %v1806_v59 = vpack.c.bf16 %v1066_v56, %v1064_v55  ;;  %v1106_v55 = vld [vmem:[%s3115_s7 + $0x3f0] sm:$0xff] }
 0x1e8   : > { %1865 = vmatprep.subr.bf16.mxu1 %v1864_v58  ;;  %v1071_v58 = vld [vmem:[%s3115_s7 + $0x2d8] sm:$0xff] }
 0x1e9   : > { %1767 = vmatpush1.bf16.msra.mxu0 %v1766_v63  ;;  %v2801_v63 = vsub.s32 1, %v2688_v11  ;;  %v1808_v60 = vpack.c.bf16 %v1071_v58, %v1069_v57 }
 0x1ea   : > { %1769 = vmatprep.subr.bf16.mxu0 %v1768_v0  ;;  %v932_v0 = vsub.s32 3, %v2688_v11 }
 0x1eb   : > { %1867 = vmatpush3.bf16.msra.mxu1 %v1866_v61  ;;  %v925_v2 = vrot.slane %v2694_v13, %v2801_v63  ;;  %v951_v7 = vrot.slane %v2714_v20, %v2801_v63  ;;  %v1068_v61 = vld [vmem:[%s3115_s7 + $0x2c0] sm:$0xff] }
 0x1ec   : > { %v933_v3 = vrot.slane %v2694_v13, %v932_v0  ;;  %v959_v8 = vrot.slane %v2714_v20, %v932_v0  ;;  %v1046_v20 = vld [vmem:[%s3115_s7 + $0x210] sm:$0xff] }
 0x1ed   : > { %1771 = vmatpush1.bf16.msra.mxu0 %v1770_v5  ;;  %v1070_v0 = vld [vmem:[%s3115_s7 + $0x2d0] sm:$0xff] }
 0x1ee   : > { %1773 = vmatprep.subr.bf16.mxu0 %v1772_v6 }
 0x1f1   : > { %1775 = vmatpush1.bf16.msra.mxu0 %v1774_v9 }
 0x1f2   : > { %1777 = vmatprep.subr.bf16.mxu0 %v1776_v17 }
 0x1f5   : > { %1779 = vmatpush1.bf16.msra.mxu0 %v1778_v21  ;;  %v1044_v21 = vld [vmem:[%s3115_s7 + $0x200] sm:$0xff] }
 0x1f6   : > { %1781 = vmatprep.subr.bf16.mxu0 %v1780_v25  ;;  %v1786_v26 = vpack.c.bf16 %v1046_v20, %v1044_v21  ;;  %v1082_v21 = vld [vmem:[%s3115_s7 + $0x330] sm:$0xff]  ;;  %v1085_v20 = vld [vmem:[%s3115_s7 + $0x348] sm:$0xff] }
 0x1f9   : > { %1783 = vmatpush1.bf16.msra.mxu0 %v1782_v28 }
 0x1fa   : > { %1785 = vmatprep.subr.bf16.mxu0 %v1784_v31 }
 0x28f   : > { %v840_v5 = vpop.f32.mrb[0].mxu0  ;;  %v911_v6 = vpop.f32.mrb[8].mxu1 }
 0x290   : > { %v938_v9 = vmul.f32 %v921_v1, %v840_v5  ;;  %v940_v10 = vmul.f32 %v2703_v16, %v911_v6  ;;  %v842_v11 = vpop.f32.mrb[1].mxu0  ;;  %v913_v12 = vpop.f32.mrb[9].mxu1  ;;  %v1049_v16 = vld [vmem:[%s3115_s7 + $0x228] sm:$0xff]  ;;  %v1072_v5 = vld [vmem:[%s3115_s7 + $0x2e0] sm:$0xff]  ;;  %v1074_v6 = vld [vmem:[%s3115_s7 + $0x2f0] sm:$0xff] }
 0x291   : > { %v939_v14 = vmul.f32 %v925_v2, %v842_v11  ;;  %v941_v15 = vmul.f32 %v933_v3, %v913_v12  ;;  %v1073_v1 = vld [vmem:[%s3115_s7 + $0x2e8] sm:$0xff]  ;;  %v1075_v2 = vld [vmem:[%s3115_s7 + $0x2f8] sm:$0xff]  ;;  %v1810_v3 = vpack.c.bf16 %v1070_v0, %v1068_v61  ;;  %v1076_v11 = vld [vmem:[%s3115_s7 + $0x300] sm:$0xff] }
 0x292   : > { %v964_v17 = vadd.f32 %v947_v4, %v938_v9  ;;  %v2816_v13 = vadd.f32 %v2717_v22, %v940_v10  ;;  %v1051_v22 = vld [vmem:[%s3115_s7 + $0x238] sm:$0xff]  ;;  %v1812_v4 = vpack.c.bf16 %v1075_v2, %v1073_v1  ;;  %v1814_v9 = vpack.c.bf16 %v1074_v6, %v1072_v5  ;;  %v1078_v12 = vld [vmem:[%s3115_s7 + $0x310] sm:$0xff]  ;;  %v1308_v5 = vld [vmem:[%s3119_s11 + $0x60] sm:$0xff] }
 0x293   : > { %v965_v18 = vadd.f32 %v951_v7, %v939_v14  ;;  %v967_v19 = vadd.f32 %v959_v8, %v941_v15  ;;  %v1788_v28 = vpack.c.bf16 %v1051_v22, %v1049_v16  ;;  %v1077_v7 = vld [vmem:[%s3115_s7 + $0x308] sm:$0xff]  ;;  %v1079_v8 = vld [vmem:[%s3115_s7 + $0x318] sm:$0xff]  ;;  %v1306_v0 = vld [vmem:[%s3119_s11 + $0x50] sm:$0xff] }
 0x294   : > { %v972_v23 = vmul.f32 0.2, %v964_v17  ;;  %vm968_vm4 = vcmp.gt.f32.partialorder %v964_v17, 0.0  ;;  %v1816_v10 = vpack.c.bf16 %v1079_v8, %v1077_v7  ;;  %v1081_v14 = vld [vmem:[%s3115_s7 + $0x328] sm:$0xff]  ;;  %v1083_v15 = vld [vmem:[%s3115_s7 + $0x338] sm:$0xff]  ;;  %vm970_vm6 = vcmp.gt.f32.partialorder %v2816_v13, 0.0 }
 0x295   : > { %vm969_vm3 = vcmp.gt.f32.partialorder %v965_v18, 0.0  ;;  %v973_v24 = vmul.f32 0.2, %v965_v18  ;;  %v975_v25 = vmul.f32 0.2, %v967_v19  ;;  %vm971_vm5 = vcmp.gt.f32.partialorder %v967_v19, 0.0 }
 0x296   : > { %v976_v31 = vsel %vm968_vm4, %v964_v17, %v972_v23  ;;  %v1818_v17 = vpack.c.bf16 %v1078_v12, %v1076_v11  ;;  %v1087_v23 = vld [vmem:[%s3115_s7 + $0x358] sm:$0xff]  ;;  %v974_v57 = vmul.f32 0.2, %v2816_v13  ;;  %v1309_v6 = vld [vmem:[%s3119_s11 + $0x68] sm:$0xff]  ;;  %v1326_v8 = vld [vmem:[%s3119_s11 + $0xf0] sm:$0xff] }
 0x297   : > { %v977_v27 = vsel %vm969_vm3, %v965_v18, %v973_v24  ;;  %v979_v34 = vsel %vm971_vm5, %v967_v19, %v975_v25  ;;  %v1820_v18 = vpack.c.bf16 %v1083_v15, %v1081_v14  ;;  %v1080_v19 = vld [vmem:[%s3115_s7 + $0x320] sm:$0xff]  ;;  %v1824_v22 = vpack.c.bf16 %v1087_v23, %v1085_v20  ;;  %v1086_v25 = vld [vmem:[%s3115_s7 + $0x350] sm:$0xff]  ;;  %v1307_v1 = vld [vmem:[%s3119_s11 + $0x58] sm:$0xff] }
 0x298   : > { %1184 = vmatprep.mubr.f32.mxu0 %v977_v27  ;;  %v1822_v16 = vpack.c.bf16 %v1082_v21, %v1080_v19  ;;  %v1084_v24 = vld [vmem:[%s3115_s7 + $0x340] sm:$0xff]  ;;  %v1091_v27 = vld [vmem:[%s3115_s7 + $0x378] sm:$0xff]  ;;  %v978_v58 = vsel %vm970_vm6, %v2816_v13, %v974_v57  ;;  %v1870_v2 = vpack.c.bf16 %v1307_v1, %v1306_v0  ;;  %v1874_v7 = vpack.c.bf16 %v1309_v6, %v1308_v5  ;;  %v1310_v11 = vld [vmem:[%s3119_s11 + $0x70] sm:$0xff] }
 0x299   : > { %1185 = vmatmul.mubr.f32.vlgmr.msra.gmra.mrb[2].mxu0 %v976_v31  ;;  %v1090_v31 = vld [vmem:[%s3115_s7 + $0x370] sm:$0xff]  ;;  %v1324_v13 = vld [vmem:[%s3119_s11 + $0xe0] sm:$0xff]  ;;  %v1311_v12 = vld [vmem:[%s3119_s11 + $0x78] sm:$0xff] }
 0x29a   : > { %1787 = vmatpush1.bf16.msra.mxu0 %v1786_v26  ;;  %1255 = vmatprep.mubr.f32.mxu0 %v979_v34  ;;  %v1089_v26 = vld [vmem:[%s3115_s7 + $0x368] sm:$0xff]  ;;  %v1830_v34 = vpack.c.bf16 %v1090_v31, %v1088_v30  ;;  %v1878_v14 = vpack.c.bf16 %v1311_v12, %v1310_v11  ;;  %v1108_v15 = vld [vmem:[%s3116_s8] sm:$0x3] }
 0x29b   : > { %1789 = vmatprep.subr.bf16.mxu0 %v1788_v28  ;;  %v1826_v28 = vpack.c.bf16 %v1086_v25, %v1084_v24  ;;  %v1828_v29 = vpack.c.bf16 %v1091_v27, %v1089_v26  ;;  %v1276_v19 = vld [vmem:[%s3118_s10] sm:$0x3]  ;;  %v1117_v21 = vrot.slane %v1108_v15, %v2801_v63 }
 0x29c   : > { %v1281_v24 = vrot.slane %v1276_v19, %v2798_v62  ;;  %v1285_v27 = vrot.slane %v1276_v19, %v2801_v63 }
 0x29e   : > { %1791 = vmatpush1.bf16.msra.mxu0 %v1790_v35  ;;  %v1832_v35 = vpack.c.bf16 %v1095_v33, %v1093_v32 }
 0x29f   : > { %1793 = vmatprep.subr.bf16.mxu0 %v1792_v36  ;;  %v1092_v36 = vld [vmem:[%s3115_s7 + $0x380] sm:$0xff] }
 0x2a0   : > { %v1834_v40 = vpack.c.bf16 %v1094_v37, %v1092_v36 }
 0x2a2   : > { %1795 = vmatpush1.bf16.msra.mxu0 %v1794_v41  ;;  %v1836_v41 = vpack.c.bf16 %v1099_v39, %v1097_v38 }
 0x2a3   : > { %1797 = vmatprep.subr.bf16.mxu0 %v1796_v42  ;;  %v1096_v42 = vld [vmem:[%s3115_s7 + $0x3a0] sm:$0xff] }
 0x2a4   : > { %v1838_v46 = vpack.c.bf16 %v1098_v43, %v1096_v42 }
 0x2a6   : > { %1799 = vmatpush1.bf16.msra.mxu0 %v1798_v47  ;;  %v1840_v47 = vpack.c.bf16 %v1103_v45, %v1101_v44 }
 0x2a7   : > { %1801 = vmatprep.subr.bf16.mxu0 %v1800_v48  ;;  %v1100_v48 = vld [vmem:[%s3115_s7 + $0x3c0] sm:$0xff] }
 0x2a8   : > { %v1842_v52 = vpack.c.bf16 %v1102_v49, %v1100_v48 }
 0x2aa   : > { %1803 = vmatpush1.bf16.msra.mxu0 %v1802_v53  ;;  %v1844_v53 = vpack.c.bf16 %v1107_v51, %v1105_v50 }
 0x2ab   : > { %1805 = vmatprep.subr.bf16.mxu0 %v1804_v54  ;;  %v1104_v54 = vld [vmem:[%s3115_s7 + $0x3e0] sm:$0xff] }
 0x2ac   : > { %v1846_v56 = vpack.c.bf16 %v1106_v55, %v1104_v54 }
 0x2ae   : > { %1807 = vmatpush1.bf16.msra.mxu0 %v1806_v59  ;;  %v1322_v59 = vld [vmem:[%s3119_s11 + $0xd0] sm:$0xff] }
 0x2af   : > { %1809 = vmatprep.subr.bf16.mxu0 %v1808_v60  ;;  %v1323_v60 = vld [vmem:[%s3119_s11 + $0xd8] sm:$0xff] }
 0x2b0   : > { %v1868_v61 = vpack.c.bf16 %v1323_v60, %v1322_v59 }
 0x2b2   : > { %1811 = vmatpush1.bf16.msra.mxu0 %v1810_v3  ;;  %1869 = vmatprep.subr.bf16.mxu1 %v1868_v61  ;;  %v1325_v3 = vld [vmem:[%s3119_s11 + $0xe8] sm:$0xff] }
 0x2b3   : > { %1813 = vmatprep.subr.bf16.mxu0 %v1812_v4  ;;  %1871 = vmatpush3.bf16.msra.mxu1 %v1870_v2  ;;  %v1872_v4 = vpack.c.bf16 %v1325_v3, %v1324_v13 }
 0x2b5   : > { %1873 = vmatprep.subr.bf16.mxu1 %v1872_v4 }
 0x2b6   : > { %1815 = vmatpush1.bf16.msra.mxu0 %v1814_v9  ;;  %v1327_v9 = vld [vmem:[%s3119_s11 + $0xf8] sm:$0xff] }
 0x2b7   : > { %1817 = vmatprep.subr.bf16.mxu0 %v1816_v10  ;;  %1875 = vmatpush3.bf16.msra.mxu1 %v1874_v7  ;;  %v1876_v10 = vpack.c.bf16 %v1327_v9, %v1326_v8 }
 0x2b9   : > { %1877 = vmatprep.subr.bf16.mxu1 %v1876_v10 }
 0x2ba   : > { %1819 = vmatpush1.bf16.msra.mxu0 %v1818_v17  ;;  %v1262_v17 = vld [vmem:[%s3117_s9] sm:$0x3] }
 0x2bb   : > { %1821 = vmatprep.subr.bf16.mxu0 %v1820_v18  ;;  %1879 = vmatpush3.bf16.msra.mxu1 %v1878_v14  ;;  %v1113_v18 = vrot.slane %v1108_v15, %v2798_v62  ;;  %v1267_v20 = vrot.slane %v1262_v17, %v2798_v62 }
 0x2be   : > { %1823 = vmatpush1.bf16.msra.mxu0 %v1822_v16  ;;  %v1271_v16 = vrot.slane %v1262_v17, %v2801_v63  ;;  %v1328_v63 = vld [vmem:[%s3120_s12] sm:$0x1] }
 0x2bf   : > { %1825 = vmatprep.subr.bf16.mxu0 %v1824_v22 }
 0x2c2   : > { %1827 = vmatpush1.bf16.msra.mxu0 %v1826_v28 }
 0x2c3   : > { %1829 = vmatprep.subr.bf16.mxu0 %v1828_v29 }
 0x2c6   : > { %1831 = vmatpush1.bf16.msra.mxu0 %v1830_v34 }
 0x2c7   : > { %1833 = vmatprep.subr.bf16.mxu0 %v1832_v35 }
 0x2ca   : > { %1835 = vmatpush1.bf16.msra.mxu0 %v1834_v40 }
 0x2cb   : > { %1837 = vmatprep.subr.bf16.mxu0 %v1836_v41 }
 0x2ce   : > { %1839 = vmatpush1.bf16.msra.mxu0 %v1838_v46 }
 0x2cf   : > { %1841 = vmatprep.subr.bf16.mxu0 %v1840_v47 }
 0x2d2   : > { %1843 = vmatpush1.bf16.msra.mxu0 %v1842_v52 }
 0x2d3   : > { %1845 = vmatprep.subr.bf16.mxu0 %v1844_v53 }
 0x2d6   : > { %1847 = vmatpush1.bf16.msra.mxu0 %v1846_v56 }
 0x2d9   : > { %1256 = vmatmul.mubr.f32.vlgmr.msra.gmra.mrb[2].mxu0 %v978_v58 }
 0x3ac   : > { %v1257_v23 = vpop.f32.mrb[2].mxu0 }
 0x3ad   : > { %v1880_v22 = vadd.f32 %v1257_v23, %v1113_v18  ;;  %v1259_v25 = vpop.f32.mrb[3].mxu0 }
 0x3ae   : > { %v1881_v26 = vadd.f32 %v1259_v25, %v1117_v21 }
 0x3af   : > { %v1274_v28 = vmul.f32 %v1880_v22, %v1267_v20 }
 0x3b0   : > { %v1275_v29 = vmul.f32 %v1881_v26, %v1271_v16 }
 0x3b1   : > { %v1288_v30 = vadd.f32 %v1281_v24, %v1274_v28 }
 0x3b2   : > { %v1289_v31 = vadd.f32 %v1285_v27, %v1275_v29 }
 0x3b3   : > { %v1292_v32 = vmul.f32 0.2, %v1288_v30  ;;  %vm1290_vm8 = vcmp.gt.f32.partialorder %v1288_v30, 0.0 }
 0x3b4   : > { %vm1291_vm7 = vcmp.gt.f32.partialorder %v1289_v31, 0.0  ;;  %v1293_v33 = vmul.f32 0.2, %v1289_v31 }
 0x3b5   : > { %v1294_v35 = vsel %vm1290_vm8, %v1288_v30, %v1292_v32 }
 0x3b6   : > { %v1295_v34 = vsel %vm1291_vm7, %v1289_v31, %v1293_v33 }
 0x3b7   : > { %1393 = vmatprep.mubr.f32.mxu1 %v1295_v34 }
 0x3b8   : > { %1394 = vmatmul.mubr.f32.vlgmr.msra.gmra.mrb[10].mxu1 %v1294_v35 }
 0x48b   : > { %v1589_v62 = vpop.f32.mrb[10].mxu1 }
 0x48c   : > { %v1590_v36 = vpop.f32.mrb[11].mxu1 }
 0x48d   : > { %v1591_v37 = vadd.f32 %v1590_v36, %v1589_v62 }
 0x48f   : > { %v1396_v38 = vadd.f32 %v1591_v37, %v1328_v63 }
 0x491   : > { %1400 = vst.msk [vmem:[%s432_s21] sm:$0x1] %vm1399_vm9, %v1396_v38 }
 0x492   : > { %1938 = shalt.err (!%p1935_p3)
}
 0x493   : > { %s1939_s14 = scalar_lea.hbm %s3066_s30, 16  ;;  %s1943_s21 = scalar_lea.hbm %s3121_s13, 32 }
 0x494   : > { %p1940_p4 = scmp.ne.s32.totalorder %s3066_s30, %s1939_s14  ;;  %p1944_p9 = scmp.lt.u32.totalorder %s3066_s30, %s3121_s13 }
 0x495   : > { %p1945_p10 = scmp.lt.u32.totalorder %s1943_s21, %s1939_s14  ;;  %p1947_p12 = scmp.lt.u32.totalorder %s1939_s14, %s3066_s30 }
 0x496   : > { %p1941_p7 = pnand %p1940_p4, %p2100_p5 }
 0x497   : > { %p1946_p11 = por %p1945_p10, %p1944_p9 }
 0x498   : > { %p1942_p8 = pneg %p1941_p7 }
 0x499   : > { %p1948_p13 = por %p1947_p12, %p1946_p11 }
 0x49b   : > { %p1949_p0 = pnand %p1948_p13, %p1942_p8 }
 0x49d   : > { %1952 = shalt.err (!%p1949_p0)
}
 0x49e   : > { %1884 = dma.vmem_to_hbm [thread:$0]  (%p2100_p5), %s3068_s22, 16, %s3066_s30, %s1402_s15  }
 0x49f PF: > { %p1890_p1 = scmp.ge.s32.totalorder %s1987_s28, 2  ;;  %s1426_s29 = sand.u32 1, %s1975_s25  }
 0x4a0   : > { %s1427_s20 = scalar_lea.sflag [#allocation3], %s1426_s29 }
 0x4a1   : > { %p1887_p2 = pnand %p1890_p1, %p2104_p6 }
 0x4a3   : > { %1970 = dma.done.wait (!%p1887_p2), %s1427_s20, 16  }
 0x4a4   : > { %1972 = vsyncadd (!%p1887_p2), %s1427_s20, 4294967280  ;;  %s3133_s28 = sld [smem:[#allocation6_spill]]  ;;  %s3134_s17 = sld [smem:[#allocation5_spill]] }
 0x4a5   : > { %s3135_s27 = sld [smem:[#allocation7_spill]]  ;;  %s3136_s25 = smov %s1979_s26 }
 0x4aa   : > { %p23_p3 = scmp.ge.s32.totalorder %s3133_s28, 4   ;;  %s3137_s26 = smov %s3134_s17 }
 0x4ac   :  { %25 = sbr.rel (!%p23_p3) target bundleno = 3 (0x3), region = 107 }
 0x4b3   :  { %1431 = vsyncpa [#allocation3], 1 }
 0x4b4   :  { %1433 = vsyncpa [#allocation3 + $0x1], 1 }

</bundles_post_ra>
